<compile_context>
chip_gen: v6e
topology: v6e:2x2x1
jax: 0.10.0
libtpu: 0.0.40
codegen_flags: <defaults>
</compile_context>

<pallas_src>
import numpy as np
import jax
import jax.numpy as jnp
from jax.experimental import pallas as pl
from jax.experimental.pallas import tpu as pltpu

# ------------------------- hyperparameters (small) ---------------------------
T_ = 2        # t
PD = 4        # Pd
PX = 4        # Px
N_ = 16       # N  (output spatial size)
M_ = 16       # M  (input spatial size)
W_ = 3        # conv kernel size w (odd)
ALPHA = 4     # conv hidden channels (alpha)
L_ = 1        # number of hidden conv layers (L)
B_ = 2        # batch size (Nsample)

HALF = W_ // 2
TAPS = tuple((dh, dw) for dh in range(-HALF, HALF + 1)
             for dw in range(-HALF, HALF + 1))
N_TAPS = len(TAPS)
NL = L_ + 2                    # total number of conv layers

ROWS = 8                       # rows per half (real | imag) of the stacked slab
SROWS = 2 * ROWS               # stacked slab rows: 0..7 real, 8..15 imag
STRIDE = N_ + 2 * HALF         # padded row stride inside the slab (18)
EXT = N_ * STRIDE              # strided image extent on lanes (288)
OFF = 128                      # lane offset of pixel (0,0) (lane-tile aligned)
SLABW = 512                    # slab lane width (4 lane tiles)
NEG = -1e30                    # pad-column bias for ReLU'd layers (forces 0)

assert OFF >= HALF * STRIDE + HALF
assert SLABW >= OFF + EXT + HALF * STRIDE + HALF
assert B_ * ALPHA <= ROWS and B_ * 1 <= ROWS
assert (M_ * M_) % PD == 0 and (N_ * N_) % PX == 0


# ----------------------------- fused Pallas kernel ---------------------------
def _switch_inverse_kernel(xr_ref, xi_ref, wsw_ref, bsw_ref, cw_ref, cb_ref,
                           out_ref, lhs_ref, slab_ref):
    f32 = jnp.float32
    D = M_ * M_

    # ---- fused switch: U∘V folded into ONE dense complex affine (2x2 block) -
    # LHS rows b     = [ xr_b | -xi_b ]  -> real output rows of the slab
    # LHS rows 8 + b = [ xi_b |  xr_b ]  -> imag output rows of the slab
    lhs_ref[...] = jnp.zeros_like(lhs_ref)
    xr = xr_ref[...]
    xi = xi_ref[...]
    lhs_ref[0:B_, 0:D] = xr
    lhs_ref[0:B_, D:2 * D] = -xi
    lhs_ref[ROWS:ROWS + B_, 0:D] = xi
    lhs_ref[ROWS:ROWS + B_, D:2 * D] = xr

    # One matmul produces the strided conv-slab content directly: the dense ->
    # strided output layout and the zero intra-row pad columns are baked into
    # the folded weight/bias at init.
    v = jnp.dot(lhs_ref[...], wsw_ref[...],
                preferred_element_type=f32) + bsw_ref[...]

    slab_ref[...] = jnp.zeros_like(slab_ref)     # zero side padding once
    slab_ref[:, OFF:OFF + EXT] = v

    # ---- conv stack: strided slab, ONE matmul per layer (real+imag stacked) --
    for layer in range(NL):
        a = slab_ref[...]                                    # (SROWS, SLABW)
        wins = [a[:, OFF + dh * STRIDE + dw: OFF + dh * STRIDE + dw + EXT]
                for dh, dw in TAPS]
        xwin = jnp.concatenate(wins, axis=0)                 # (N_TAPS*SROWS, EXT)
        y = jnp.dot(cw_ref[layer], xwin,
                    preferred_element_type=f32) + cb_ref[layer]
        if layer < NL - 1:
            # ComplexReLU; the -1e30 pad-column bias makes ReLU restore exact
            # zeros at the intra-row pad columns for the next layer's taps.
            slab_ref[:, OFF:OFF + EXT] = jnp.maximum(y, 0.0)
        else:
            out_ref[...] = y


# ------------------------------- wrapper --------------------------------------
ARG_KEYS = ("wsw", "bsw", "cw", "cb")


def _full_spec(shape):
    nd = len(shape)
    return pl.BlockSpec(shape, lambda i, _nd=nd: (0,) * _nd)


def switch_inverse_forward(x_real, x_imag, params):
    B = x_real.shape[0]
    xr = x_real.reshape(B, M_ * M_).astype(jnp.float32)
    xi = x_imag.reshape(B, M_ * M_).astype(jnp.float32)
    args = [xr, xi] + [params[k] for k in ARG_KEYS]
    out = pl.pallas_call(
        _switch_inverse_kernel,
        out_shape=jax.ShapeDtypeStruct((SROWS, EXT), jnp.float32),
        grid=(1,),
        in_specs=[_full_spec(a.shape) for a in args],
        out_specs=_full_spec((SROWS, EXT)),
        scratch_shapes=[pltpu.VMEM((SROWS, 2 * M_ * M_), jnp.float32),
                        pltpu.VMEM((SROWS, SLABW), jnp.float32)],
        compiler_params=pltpu.CompilerParams(
            dimension_semantics=("arbitrary",)),
    )(*args)
    # de-stride + split real/imag (free slices/reshapes in the wrapper)
    yr = out[0:B].reshape(B, N_, STRIDE)[:, :, :N_]
    yi = out[ROWS:ROWS + B].reshape(B, N_, STRIDE)[:, :, :N_]
    return yr, yi


# -------------------- init + (init-time) weight folding -----------------------
def _vect_np(z, P):
    B, n, _ = z.shape
    s = int(np.sqrt(P))
    y = z.reshape(B, s, n // s, s, n // s).transpose(0, 1, 3, 2, 4)
    return y.reshape(B, n * n)


def _square_np(z, P):
    B, n2 = z.shape
    n = int(np.sqrt(n2))
    s = int(np.sqrt(P))
    y = z.reshape(B, s, s, n // s, n // s).transpose(0, 1, 3, 2, 4)
    return y.reshape(B, n, n)


def _switch_complex_np(xc, Wu_c, bu_c, Wv_c, bv_c):
    """Complex-arithmetic transliteration of vect -> switch -> square."""
    B = xc.shape[0]
    d = _vect_np(xc.reshape(B, M_, M_), PD)
    cu = (M_ * M_) // PD
    u = np.concatenate([d[:, p * cu:(p + 1) * cu] @ Wu_c[p] + bu_c[p]
                        for p in range(PD)], axis=1)
    u = u.reshape(B, PX, PD, T_).transpose(0, 2, 1, 3).reshape(B, PD * PX * T_)
    cv = T_ * PD
    v = np.concatenate([u[:, q * cv:(q + 1) * cv] @ Wv_c[q] + bv_c[q]
                        for q in range(PX)], axis=1)
    return _square_np(v, PX).reshape(B, N_ * N_)


def init_raw_params(seed=1, scale=0.1):
    """Random init with the same structure as the PyTorch module."""
    rng = np.random.default_rng(seed)
    cu, ou = (M_ * M_) // PD, T_ * PX
    cv, ov = T_ * PD, (N_ * N_) // PX
    raw = {
        "Wu_r": scale * rng.standard_normal((PD, cu, ou)),
        "Wu_i": scale * rng.standard_normal((PD, cu, ou)),
        "bu_r": scale * rng.standard_normal((PD, ou)),
        "bu_i": scale * rng.standard_normal((PD, ou)),
        "Wv_r": scale * rng.standard_normal((PX, cv, ov)),
        "Wv_i": scale * rng.standard_normal((PX, cv, ov)),
        "bv_r": scale * rng.standard_normal((PX, ov)),
        "bv_i": scale * rng.standard_normal((PX, ov)),
        "conv": [],
    }
    chans = [(1, ALPHA)] + [(ALPHA, ALPHA)] * L_ + [(ALPHA, 1)]
    for cin, cout in chans:
        raw["conv"].append((
            scale * rng.standard_normal((W_, W_, cin, cout)),   # wr[kh,kw,ci,co]
            scale * rng.standard_normal((W_, W_, cin, cout)),   # wi
            scale * rng.standard_normal((cout,)),                # br
            scale * rng.standard_normal((cout,)),                # bi
        ))
    return raw


def pack_params(raw):
    """Fold U∘V into one dense complex affine map (basis probing), scatter its
    output columns into the strided slab layout, and pack each complex conv as
    a single 2x2 real-block matrix acting on the stacked (real|imag) slab."""
    # ---- composed switch map: v = x @ Wc + bc (complex) ----------------------
    Wu_c = raw["Wu_r"] + 1j * raw["Wu_i"]
    bu_c = (raw["bu_r"] - raw["bu_i"]) + 1j * (raw["bu_r"] + raw["bu_i"])
    Wv_c = raw["Wv_r"] + 1j * raw["Wv_i"]
    bv_c = (raw["bv_r"] - raw["bv_i"]) + 1j * (raw["bv_r"] + raw["bv_i"])
    eye = np.eye(M_ * M_, dtype=np.complex128)
    bc = _switch_complex_np(np.zeros((1, M_ * M_), np.complex128),
                            Wu_c, bu_c, Wv_c, bv_c)[0]
    Wc = _switch_complex_np(eye, Wu_c, bu_c, Wv_c, bv_c) - bc[None, :]

    # scatter dense (row-major) output columns into the strided slab layout;
    # pad columns are left at 0 so the first conv layer sees clean zero borders.
    Wr_s = np.zeros((M_ * M_, EXT), np.float64)
    Wi_s = np.zeros((M_ * M_, EXT), np.float64)
    bsw = np.zeros((SROWS, EXT), np.float64)
    for r in range(N_):
        src = slice(r * N_, (r + 1) * N_)
        dst = slice(r * STRIDE, r * STRIDE + N_)
        Wr_s[:, dst] = Wc.real[:, src]
        Wi_s[:, dst] = Wc.imag[:, src]
        for b in range(B_):
            bsw[b, dst] = bc.real[src]
            bsw[ROWS + b, dst] = bc.imag[src]
    # kernel LHS rows b = [xr|-xi], rows 8+b = [xi|xr]  =>  stack [Wr_s ; Wi_s]
    wsw = np.concatenate([Wr_s, Wi_s], axis=0)            # (2*M*M, EXT)

    # ---- conv layers: 2x2 real-block weights on the stacked strided slab -----
    valid = np.zeros((EXT,), bool)
    for r in range(N_):
        valid[r * STRIDE:r * STRIDE + N_] = True

    chans = [(1, ALPHA)] + [(ALPHA, ALPHA)] * L_ + [(ALPHA, 1)]
    cw = np.zeros((NL, SROWS, N_TAPS * SROWS), np.float64)
    cb = np.zeros((NL, SROWS, EXT), np.float64)
    for l, (cin, cout) in enumerate(chans):
        wr, wi, br, bi = raw["conv"][l]
        for t, (dh, dw) in enumerate(TAPS):
            for b in range(B_):
                for ci in range(cin):
                    col_r = t * SROWS + b * cin + ci           # real input row
                    col_i = t * SROWS + ROWS + b * cin + ci    # imag input row
                    orow_r = slice(b * cout, (b + 1) * cout)
                    orow_i = slice(ROWS + b * cout, ROWS + (b + 1) * cout)
                    cw[l, orow_r, col_r] = wr[dh + HALF, dw + HALF, ci, :]
                    cw[l, orow_r, col_i] = -wi[dh + HALF, dw + HALF, ci, :]
                    cw[l, orow_i, col_r] = wi[dh + HALF, dw + HALF, ci, :]
                    cw[l, orow_i, col_i] = wr[dh + HALF, dw + HALF, ci, :]
        for b in range(B_):
            for co in range(cout):
                cb[l, b * cout + co, valid] = br[co] - bi[co]
                cb[l, ROWS + b * cout + co, valid] = br[co] + bi[co]
        if l < NL - 1:
            cb[l, :, ~valid] = NEG     # ReLU clamps pad columns back to exact 0

    return {"wsw": jnp.asarray(wsw, jnp.float32),
            "bsw": jnp.asarray(bsw, jnp.float32),
            "cw": jnp.asarray(cw, jnp.float32),
            "cb": jnp.asarray(cb, jnp.float32)}


# ------------------ pure-numpy reference (real arithmetic) --------------------
def _conv2d_np(x, w):
    """x: (B, cin, H, W); w: (kh, kw, cin, cout); zero padding HALF."""
    B, cin, H, Wd = x.shape
    cout = w.shape[3]
    xp = np.pad(x, ((0, 0), (0, 0), (HALF, HALF), (HALF, HALF)))
    out = np.zeros((B, cout, H, Wd))
    for kh in range(W_):
        for kw in range(W_):
            patch = xp[:, :, kh:kh + H, kw:kw + Wd]
            out += np.einsum("bchw,co->bohw", patch, w[kh, kw])
    return out


def reference_forward_np(x_real, x_imag, raw):
    """Direct transliteration of the PyTorch module's forward (float64)."""
    xr = np.asarray(x_real, np.float64)
    xi = np.asarray(x_imag, np.float64)
    B = xr.shape[0]
    dr, di = _vect_np(xr, PD), _vect_np(xi, PD)
    cu = (M_ * M_) // PD
    ur, ui = [], []
    for p in range(PD):
        ar, ai = dr[:, p * cu:(p + 1) * cu], di[:, p * cu:(p + 1) * cu]
        Wr, Wi = raw["Wu_r"][p], raw["Wu_i"][p]
        br, bi = raw["bu_r"][p], raw["bu_i"][p]
        ur.append(ar @ Wr - ai @ Wi + (br - bi))
        ui.append(ai @ Wr + ar @ Wi + (br + bi))
    ur = np.concatenate(ur, 1).reshape(B, PX, PD, T_).transpose(0, 2, 1, 3).reshape(B, -1)
    ui = np.concatenate(ui, 1).reshape(B, PX, PD, T_).transpose(0, 2, 1, 3).reshape(B, -1)
    cv = T_ * PD
    vr, vi = [], []
    for q in range(PX):
        ar, ai = ur[:, q * cv:(q + 1) * cv], ui[:, q * cv:(q + 1) * cv]
        Wr, Wi = raw["Wv_r"][q], raw["Wv_i"][q]
        br, bi = raw["bv_r"][q], raw["bv_i"][q]
        vr.append(ar @ Wr - ai @ Wi + (br - bi))
        vi.append(ai @ Wr + ar @ Wi + (br + bi))
    vr = _square_np(np.concatenate(vr, 1), PX)[:, None]    # (B,1,N,N)
    vi = _square_np(np.concatenate(vi, 1), PX)[:, None]
    for l in range(NL):
        wr, wi, br, bi = raw["conv"][l]
        r = _conv2d_np(vr, wr) - _conv2d_np(vi, wi) + (br - bi)[None, :, None, None]
        i = _conv2d_np(vi, wr) + _conv2d_np(vr, wi) + (br + bi)[None, :, None, None]
        if l < NL - 1:
            r, i = np.maximum(r, 0.0), np.maximum(i, 0.0)
        vr, vi = r, i
    return vr[:, 0], vi[:, 0]


if __name__ == "__main__":
    kx, ki = jax.random.split(jax.random.PRNGKey(0))
    x_real = jax.random.normal(kx, (B_, M_, M_), jnp.float32)
    x_imag = jax.random.normal(ki, (B_, M_, M_), jnp.float32)

    raw = init_raw_params(seed=1)
    params = pack_params(raw)

    fwd = jax.jit(switch_inverse_forward)
    y_real, y_imag = fwd(x_real, x_imag, params)
    jax.block_until_ready((y_real, y_imag))

    assert y_real.shape == (B_, N_, N_) and y_imag.shape == (B_, N_, N_)
    assert bool(jnp.all(jnp.isfinite(y_real))) and bool(jnp.all(jnp.isfinite(y_imag)))

    ref_r, ref_i = reference_forward_np(x_real, x_imag, raw)
    np.testing.assert_allclose(np.asarray(y_real), ref_r, rtol=2e-2, atol=2e-2)
    np.testing.assert_allclose(np.asarray(y_imag), ref_i, rtol=2e-2, atol=2e-2)
    print("KERNEL_OK")
</pallas_src>

<mosaic_0001>
module attributes {stable_mosaic.version = 11 : i64} {
  func.func @_switch_inverse_kernel(%arg0: i32, %arg1: memref<2x256xf32, #tpu.memory_space<vmem>>, %arg2: memref<2x256xf32, #tpu.memory_space<vmem>>, %arg3: memref<512x288xf32, #tpu.memory_space<vmem>>, %arg4: memref<16x288xf32, #tpu.memory_space<vmem>>, %arg5: memref<3x16x144xf32, #tpu.memory_space<vmem>>, %arg6: memref<3x16x288xf32, #tpu.memory_space<vmem>>, %arg7: memref<16x288xf32, #tpu.memory_space<vmem>>, %arg8: memref<16x512xf32, #tpu.memory_space<vmem>>, %arg9: memref<16x512xf32, #tpu.memory_space<vmem>>) attributes {dimension_semantics = [#tpu.dimension_semantics<arbitrary>], iteration_bounds = array<i64: 1>, scalar_prefetch = 0 : i64, scratch_operands = 2 : i64, tpu.core_type = #tpu.core_type<tc>, window_params = [{pipeline_mode = #tpu.pipeline_mode<synchronous>, transform_indices = @transform_0, window_bounds = array<i64: 2, 256>}, {pipeline_mode = #tpu.pipeline_mode<synchronous>, transform_indices = @transform_1, window_bounds = array<i64: 2, 256>}, {pipeline_mode = #tpu.pipeline_mode<synchronous>, transform_indices = @transform_2, window_bounds = array<i64: 512, 288>}, {pipeline_mode = #tpu.pipeline_mode<synchronous>, transform_indices = @transform_3, window_bounds = array<i64: 16, 288>}, {pipeline_mode = #tpu.pipeline_mode<synchronous>, transform_indices = @transform_4, window_bounds = array<i64: 3, 16, 144>}, {pipeline_mode = #tpu.pipeline_mode<synchronous>, transform_indices = @transform_5, window_bounds = array<i64: 3, 16, 288>}, {pipeline_mode = #tpu.pipeline_mode<synchronous>, transform_indices = @transform_6, window_bounds = array<i64: 16, 288>}]} {
    %cst = arith.constant 0.000000e+00 : f32
    %0 = vector.broadcast %cst : f32 to vector<16x512xf32>
    %c0 = arith.constant 0 : index
    %c0_0 = arith.constant 0 : index
    %1 = vector.load %arg8[%c0, %c0_0] : memref<16x512xf32, #tpu.memory_space<vmem>>, vector<16x512xf32>
    tpu.vector_store %arg8[%c0, %c0_0], %0 {strides = array<i32>} : memref<16x512xf32, #tpu.memory_space<vmem>>, vector<16x512xf32>,
    %c0_1 = arith.constant 0 : index
    %c0_2 = arith.constant 0 : index
    %2 = vector.load %arg1[%c0_1, %c0_2] : memref<2x256xf32, #tpu.memory_space<vmem>>, vector<2x256xf32>
    %c0_3 = arith.constant 0 : index
    %c0_4 = arith.constant 0 : index
    %3 = vector.load %arg2[%c0_3, %c0_4] : memref<2x256xf32, #tpu.memory_space<vmem>>, vector<2x256xf32>
    %c0_5 = arith.constant 0 : index
    %c0_6 = arith.constant 0 : index
    %4 = vector.load %arg8[%c0_5, %c0_6] : memref<16x512xf32, #tpu.memory_space<vmem>>, vector<2x256xf32>
    tpu.vector_store %arg8[%c0_5, %c0_6], %2 {strides = array<i32>} : memref<16x512xf32, #tpu.memory_space<vmem>>, vector<2x256xf32>,
    %cst_7 = arith.constant 0.000000e+00 : f32
    %5 = vector.broadcast %cst_7 : f32 to vector<2x256xf32>
    %6 = arith.subf %5, %3 : vector<2x256xf32>
    %c0_8 = arith.constant 0 : index
    %c256 = arith.constant 256 : index
    %7 = vector.load %arg8[%c0_8, %c256] : memref<16x512xf32, #tpu.memory_space<vmem>>, vector<2x256xf32>
    tpu.vector_store %arg8[%c0_8, %c256], %6 {strides = array<i32>} : memref<16x512xf32, #tpu.memory_space<vmem>>, vector<2x256xf32>,
    %c8 = arith.constant 8 : index
    %c0_9 = arith.constant 0 : index
    %8 = vector.load %arg8[%c8, %c0_9] : memref<16x512xf32, #tpu.memory_space<vmem>>, vector<2x256xf32>
    tpu.vector_store %arg8[%c8, %c0_9], %3 {strides = array<i32>} : memref<16x512xf32, #tpu.memory_space<vmem>>, vector<2x256xf32>,
    %c8_10 = arith.constant 8 : index
    %c256_11 = arith.constant 256 : index
    %9 = vector.load %arg8[%c8_10, %c256_11] : memref<16x512xf32, #tpu.memory_space<vmem>>, vector<2x256xf32>
    tpu.vector_store %arg8[%c8_10, %c256_11], %2 {strides = array<i32>} : memref<16x512xf32, #tpu.memory_space<vmem>>, vector<2x256xf32>,
    %c0_12 = arith.constant 0 : index
    %c0_13 = arith.constant 0 : index
    %10 = vector.load %arg8[%c0_12, %c0_13] : memref<16x512xf32, #tpu.memory_space<vmem>>, vector<16x512xf32>
    %c0_14 = arith.constant 0 : index
    %c0_15 = arith.constant 0 : index
    %11 = vector.load %arg3[%c0_14, %c0_15] : memref<512x288xf32, #tpu.memory_space<vmem>>, vector<512x288xf32>
    %cst_16 = arith.constant dense<0.000000e+00> : vector<16x288xf32>
    %12 = tpu.matmul %10, %11, %cst_16 {dimension_numbers = #tpu.dot_dimension_numbers<[1], [0], [0], [1], [0, 0, 1, 1], [], []>} : vector<16x512xf32>, vector<512x288xf32>, vector<16x288xf32> -> vector<16x288xf32>
    %c0_17 = arith.constant 0 : index
    %c0_18 = arith.constant 0 : index
    %13 = vector.load %arg4[%c0_17, %c0_18] : memref<16x288xf32, #tpu.memory_space<vmem>>, vector<16x288xf32>
    %14 = arith.addf %12, %13 : vector<16x288xf32>
    %cst_19 = arith.constant 0.000000e+00 : f32
    %15 = vector.broadcast %cst_19 : f32 to vector<16x512xf32>
    %c0_20 = arith.constant 0 : index
    %c0_21 = arith.constant 0 : index
    %16 = vector.load %arg9[%c0_20, %c0_21] : memref<16x512xf32, #tpu.memory_space<vmem>>, vector<16x512xf32>
    tpu.vector_store %arg9[%c0_20, %c0_21], %15 {strides = array<i32>} : memref<16x512xf32, #tpu.memory_space<vmem>>, vector<16x512xf32>,
    %c0_22 = arith.constant 0 : index
    %c128 = arith.constant 128 : index
    %17 = vector.load %arg9[%c0_22, %c128] : memref<16x512xf32, #tpu.memory_space<vmem>>, vector<16x288xf32>
    tpu.vector_store %arg9[%c0_22, %c128], %14 {strides = array<i32>} : memref<16x512xf32, #tpu.memory_space<vmem>>, vector<16x288xf32>,
    %c0_23 = arith.constant 0 : index
    %c0_24 = arith.constant 0 : index
    %18 = vector.load %arg9[%c0_23, %c0_24] : memref<16x512xf32, #tpu.memory_space<vmem>>, vector<16x512xf32>
    %19 = vector.extract_strided_slice %18 {offsets = [0, 109], sizes = [16, 288], strides = [1, 1]} : vector<16x512xf32> to vector<16x288xf32>
    %20 = vector.extract_strided_slice %18 {offsets = [0, 110], sizes = [16, 288], strides = [1, 1]} : vector<16x512xf32> to vector<16x288xf32>
    %21 = vector.extract_strided_slice %18 {offsets = [0, 111], sizes = [16, 288], strides = [1, 1]} : vector<16x512xf32> to vector<16x288xf32>
    %22 = vector.extract_strided_slice %18 {offsets = [0, 127], sizes = [16, 288], strides = [1, 1]} : vector<16x512xf32> to vector<16x288xf32>
    %23 = vector.extract_strided_slice %18 {offsets = [0, 128], sizes = [16, 288], strides = [1, 1]} : vector<16x512xf32> to vector<16x288xf32>
    %24 = vector.extract_strided_slice %18 {offsets = [0, 129], sizes = [16, 288], strides = [1, 1]} : vector<16x512xf32> to vector<16x288xf32>
    %25 = vector.extract_strided_slice %18 {offsets = [0, 145], sizes = [16, 288], strides = [1, 1]} : vector<16x512xf32> to vector<16x288xf32>
    %26 = vector.extract_strided_slice %18 {offsets = [0, 146], sizes = [16, 288], strides = [1, 1]} : vector<16x512xf32> to vector<16x288xf32>
    %27 = vector.extract_strided_slice %18 {offsets = [0, 147], sizes = [16, 288], strides = [1, 1]} : vector<16x512xf32> to vector<16x288xf32>
    %28 = tpu.concatenate %19, %20, %21, %22, %23, %24, %25, %26, %27 in 0 : vector<16x288xf32>, vector<16x288xf32>, vector<16x288xf32>, vector<16x288xf32>, vector<16x288xf32>, vector<16x288xf32>, vector<16x288xf32>, vector<16x288xf32>, vector<16x288xf32> -> vector<144x288xf32>
    %c0_25 = arith.constant 0 : index
    %c0_26 = arith.constant 0 : index
    %c0_27 = arith.constant 0 : index
    %29 = vector.load %arg5[%c0_25, %c0_26, %c0_27] : memref<3x16x144xf32, #tpu.memory_space<vmem>>, vector<1x16x144xf32>
    %30 = vector.shape_cast %29 : vector<1x16x144xf32> to vector<16x144xf32>
    %cst_28 = arith.constant dense<0.000000e+00> : vector<16x288xf32>
    %31 = tpu.matmul %30, %28, %cst_28 {dimension_numbers = #tpu.dot_dimension_numbers<[1], [0], [0], [1], [0, 0, 1, 1], [], []>} : vector<16x144xf32>, vector<144x288xf32>, vector<16x288xf32> -> vector<16x288xf32>
    %c0_29 = arith.constant 0 : index
    %c0_30 = arith.constant 0 : index
    %c0_31 = arith.constant 0 : index
    %32 = vector.load %arg6[%c0_29, %c0_30, %c0_31] : memref<3x16x288xf32, #tpu.memory_space<vmem>>, vector<1x16x288xf32>
    %33 = vector.shape_cast %32 : vector<1x16x288xf32> to vector<16x288xf32>
    %34 = arith.addf %31, %33 : vector<16x288xf32>
    %cst_32 = arith.constant 0.000000e+00 : f32
    %35 = vector.broadcast %cst_32 : f32 to vector<16x288xf32>
    %36 = arith.maximumf %34, %35 : vector<16x288xf32>
    %c0_33 = arith.constant 0 : index
    %c128_34 = arith.constant 128 : index
    %37 = vector.load %arg9[%c0_33, %c128_34] : memref<16x512xf32, #tpu.memory_space<vmem>>, vector<16x288xf32>
    tpu.vector_store %arg9[%c0_33, %c128_34], %36 {strides = array<i32>} : memref<16x512xf32, #tpu.memory_space<vmem>>, vector<16x288xf32>,
    %c0_35 = arith.constant 0 : index
    %c0_36 = arith.constant 0 : index
    %38 = vector.load %arg9[%c0_35, %c0_36] : memref<16x512xf32, #tpu.memory_space<vmem>>, vector<16x512xf32>
    %39 = vector.extract_strided_slice %38 {offsets = [0, 109], sizes = [16, 288], strides = [1, 1]} : vector<16x512xf32> to vector<16x288xf32>
    %40 = vector.extract_strided_slice %38 {offsets = [0, 110], sizes = [16, 288], strides = [1, 1]} : vector<16x512xf32> to vector<16x288xf32>
    %41 = vector.extract_strided_slice %38 {offsets = [0, 111], sizes = [16, 288], strides = [1, 1]} : vector<16x512xf32> to vector<16x288xf32>
    %42 = vector.extract_strided_slice %38 {offsets = [0, 127], sizes = [16, 288], strides = [1, 1]} : vector<16x512xf32> to vector<16x288xf32>
    %43 = vector.extract_strided_slice %38 {offsets = [0, 128], sizes = [16, 288], strides = [1, 1]} : vector<16x512xf32> to vector<16x288xf32>
    %44 = vector.extract_strided_slice %38 {offsets = [0, 129], sizes = [16, 288], strides = [1, 1]} : vector<16x512xf32> to vector<16x288xf32>
    %45 = vector.extract_strided_slice %38 {offsets = [0, 145], sizes = [16, 288], strides = [1, 1]} : vector<16x512xf32> to vector<16x288xf32>
    %46 = vector.extract_strided_slice %38 {offsets = [0, 146], sizes = [16, 288], strides = [1, 1]} : vector<16x512xf32> to vector<16x288xf32>
    %47 = vector.extract_strided_slice %38 {offsets = [0, 147], sizes = [16, 288], strides = [1, 1]} : vector<16x512xf32> to vector<16x288xf32>
    %48 = tpu.concatenate %39, %40, %41, %42, %43, %44, %45, %46, %47 in 0 : vector<16x288xf32>, vector<16x288xf32>, vector<16x288xf32>, vector<16x288xf32>, vector<16x288xf32>, vector<16x288xf32>, vector<16x288xf32>, vector<16x288xf32>, vector<16x288xf32> -> vector<144x288xf32>
    %c1 = arith.constant 1 : index
    %c0_37 = arith.constant 0 : index
    %c0_38 = arith.constant 0 : index
    %49 = vector.load %arg5[%c1, %c0_37, %c0_38] : memref<3x16x144xf32, #tpu.memory_space<vmem>>, vector<1x16x144xf32>
    %50 = vector.shape_cast %49 : vector<1x16x144xf32> to vector<16x144xf32>
    %cst_39 = arith.constant dense<0.000000e+00> : vector<16x288xf32>
    %51 = tpu.matmul %50, %48, %cst_39 {dimension_numbers = #tpu.dot_dimension_numbers<[1], [0], [0], [1], [0, 0, 1, 1], [], []>} : vector<16x144xf32>, vector<144x288xf32>, vector<16x288xf32> -> vector<16x288xf32>
    %c1_40 = arith.constant 1 : index
    %c0_41 = arith.constant 0 : index
    %c0_42 = arith.constant 0 : index
    %52 = vector.load %arg6[%c1_40, %c0_41, %c0_42] : memref<3x16x288xf32, #tpu.memory_space<vmem>>, vector<1x16x288xf32>
    %53 = vector.shape_cast %52 : vector<1x16x288xf32> to vector<16x288xf32>
    %54 = arith.addf %51, %53 : vector<16x288xf32>
    %cst_43 = arith.constant 0.000000e+00 : f32
    %55 = vector.broadcast %cst_43 : f32 to vector<16x288xf32>
    %56 = arith.maximumf %54, %55 : vector<16x288xf32>
    %c0_44 = arith.constant 0 : index
    %c128_45 = arith.constant 128 : index
    %57 = vector.load %arg9[%c0_44, %c128_45] : memref<16x512xf32, #tpu.memory_space<vmem>>, vector<16x288xf32>
    tpu.vector_store %arg9[%c0_44, %c128_45], %56 {strides = array<i32>} : memref<16x512xf32, #tpu.memory_space<vmem>>, vector<16x288xf32>,
    %c0_46 = arith.constant 0 : index
    %c0_47 = arith.constant 0 : index
    %58 = vector.load %arg9[%c0_46, %c0_47] : memref<16x512xf32, #tpu.memory_space<vmem>>, vector<16x512xf32>
    %59 = vector.extract_strided_slice %58 {offsets = [0, 109], sizes = [16, 288], strides = [1, 1]} : vector<16x512xf32> to vector<16x288xf32>
    %60 = vector.extract_strided_slice %58 {offsets = [0, 110], sizes = [16, 288], strides = [1, 1]} : vector<16x512xf32> to vector<16x288xf32>
    %61 = vector.extract_strided_slice %58 {offsets = [0, 111], sizes = [16, 288], strides = [1, 1]} : vector<16x512xf32> to vector<16x288xf32>
    %62 = vector.extract_strided_slice %58 {offsets = [0, 127], sizes = [16, 288], strides = [1, 1]} : vector<16x512xf32> to vector<16x288xf32>
    %63 = vector.extract_strided_slice %58 {offsets = [0, 128], sizes = [16, 288], strides = [1, 1]} : vector<16x512xf32> to vector<16x288xf32>
    %64 = vector.extract_strided_slice %58 {offsets = [0, 129], sizes = [16, 288], strides = [1, 1]} : vector<16x512xf32> to vector<16x288xf32>
    %65 = vector.extract_strided_slice %58 {offsets = [0, 145], sizes = [16, 288], strides = [1, 1]} : vector<16x512xf32> to vector<16x288xf32>
    %66 = vector.extract_strided_slice %58 {offsets = [0, 146], sizes = [16, 288], strides = [1, 1]} : vector<16x512xf32> to vector<16x288xf32>
    %67 = vector.extract_strided_slice %58 {offsets = [0, 147], sizes = [16, 288], strides = [1, 1]} : vector<16x512xf32> to vector<16x288xf32>
    %68 = tpu.concatenate %59, %60, %61, %62, %63, %64, %65, %66, %67 in 0 : vector<16x288xf32>, vector<16x288xf32>, vector<16x288xf32>, vector<16x288xf32>, vector<16x288xf32>, vector<16x288xf32>, vector<16x288xf32>, vector<16x288xf32>, vector<16x288xf32> -> vector<144x288xf32>
    %c2 = arith.constant 2 : index
    %c0_48 = arith.constant 0 : index
    %c0_49 = arith.constant 0 : index
    %69 = vector.load %arg5[%c2, %c0_48, %c0_49] : memref<3x16x144xf32, #tpu.memory_space<vmem>>, vector<1x16x144xf32>
    %70 = vector.shape_cast %69 : vector<1x16x144xf32> to vector<16x144xf32>
    %cst_50 = arith.constant dense<0.000000e+00> : vector<16x288xf32>
    %71 = tpu.matmul %70, %68, %cst_50 {dimension_numbers = #tpu.dot_dimension_numbers<[1], [0], [0], [1], [0, 0, 1, 1], [], []>} : vector<16x144xf32>, vector<144x288xf32>, vector<16x288xf32> -> vector<16x288xf32>
    %c2_51 = arith.constant 2 : index
    %c0_52 = arith.constant 0 : index
    %c0_53 = arith.constant 0 : index
    %72 = vector.load %arg6[%c2_51, %c0_52, %c0_53] : memref<3x16x288xf32, #tpu.memory_space<vmem>>, vector<1x16x288xf32>
    %73 = vector.shape_cast %72 : vector<1x16x288xf32> to vector<16x288xf32>
    %74 = arith.addf %71, %73 : vector<16x288xf32>
    %c0_54 = arith.constant 0 : index
    %c0_55 = arith.constant 0 : index
    %75 = vector.load %arg7[%c0_54, %c0_55] : memref<16x288xf32, #tpu.memory_space<vmem>>, vector<16x288xf32>
    tpu.vector_store %arg7[%c0_54, %c0_55], %74 {strides = array<i32>} : memref<16x288xf32, #tpu.memory_space<vmem>>, vector<16x288xf32>,
    return
  }
  func.func @transform_0(%arg0: i32) -> (i32, i32) {
    %c0_i32 = arith.constant 0 : i32
    %c0_i32_0 = arith.constant 0 : i32
    %c0_i32_1 = arith.constant 0 : i32
    return %c0_i32, %c0_i32_0 : i32, i32
  }
  func.func @transform_1(%arg0: i32) -> (i32, i32) {
    %c0_i32 = arith.constant 0 : i32
    %c0_i32_0 = arith.constant 0 : i32
    %c0_i32_1 = arith.constant 0 : i32
    return %c0_i32, %c0_i32_0 : i32, i32
  }
  func.func @transform_2(%arg0: i32) -> (i32, i32) {
    %c0_i32 = arith.constant 0 : i32
    %c0_i32_0 = arith.constant 0 : i32
    %c0_i32_1 = arith.constant 0 : i32
    return %c0_i32, %c0_i32_0 : i32, i32
  }
  func.func @transform_3(%arg0: i32) -> (i32, i32) {
    %c0_i32 = arith.constant 0 : i32
    %c0_i32_0 = arith.constant 0 : i32
    %c0_i32_1 = arith.constant 0 : i32
    return %c0_i32, %c0_i32_0 : i32, i32
  }
  func.func @transform_4(%arg0: i32) -> (i32, i32, i32) {
    %c0_i32 = arith.constant 0 : i32
    %c0_i32_0 = arith.constant 0 : i32
    %c0_i32_1 = arith.constant 0 : i32
    %c0_i32_2 = arith.constant 0 : i32
    return %c0_i32, %c0_i32_0, %c0_i32_1 : i32, i32, i32
  }
  func.func @transform_5(%arg0: i32) -> (i32, i32, i32) {
    %c0_i32 = arith.constant 0 : i32
    %c0_i32_0 = arith.constant 0 : i32
    %c0_i32_1 = arith.constant 0 : i32
    %c0_i32_2 = arith.constant 0 : i32
    return %c0_i32, %c0_i32_0, %c0_i32_1 : i32, i32, i32
  }
  func.func @transform_6(%arg0: i32) -> (i32, i32) {
    %c0_i32 = arith.constant 0 : i32
    %c0_i32_0 = arith.constant 0 : i32
    %c0_i32_1 = arith.constant 0 : i32
    return %c0_i32, %c0_i32_0 : i32, i32
  }
}

</mosaic_0001>

<bundles_post_ra>
// kernel: switch_inverse_forward.1
= control target key start
LH: loop header
LB: loop body
LE: loop exit
PB: predicated region body
PF: predicated region fallthrough
CT: control target
= control target key end

     0   :  { %v2579_v3 = vmov 0.0   ;;  %s2582_s9 = smov 126   ;;  %s2583_s10 = smov 127   ;;  %vm595_vm0 = vcmask 261120   ;;  %vm678_vm1 = vcmask 900096   ;;  %vm655_vm2 = vcmask 1031168   ;;  %s4867_s2 = inlined_call_operand.vmem [shape: f32[512,288], index: 2, kind: input, shape index: {}]   ;;  %s4868_s0 = inlined_call_operand.vmem [shape: f32[2,256], index: 0, kind: input, shape index: {}]   ;;  %s4869_s1 = inlined_call_operand.vmem [shape: f32[2,256], index: 1, kind: input, shape index: {}]   ;;  %s4870_s3 = inlined_call_operand.vmem [shape: f32[16,288], index: 3, kind: input, shape index: {}]   ;;  %s4871_s4 = inlined_call_operand.vmem [shape: f32[3,16,144], index: 4, kind: input, shape index: {}]   ;;  %s4872_s5 = inlined_call_operand.vmem [shape: f32[3,16,288], index: 5, kind: input, shape index: {}]   ;;  %s4873_s6 = inlined_call_operand.vmem [shape: f32[16,288], index: 6, kind: output, shape index: {}]  }
   0x1   :  { %v129_v0 = vld [vmem:[%s4867_s2 + $0x170] sm:$0xff]  ;;  %v128_v2 = vld [vmem:[%s4867_s2 + $0x168] sm:$0xff]  ;;  %24 = vst [vmem:[#allocation2 + $0x8] sm:$0xff] %v2579_v3  ;;  %23 = vst [vmem:[#allocation2] sm:$0xff] %v2579_v3  ;;  %2522 = vrot.lane.b32.xlu0 %v2579_v3, %s2582_s9  ;;  %s2584_s13 = smov 91   ;;  %s2585_s16 = smov 92  }
   0x2   :  { %v225_v1 = vld [vmem:[%s4867_s2 + $0x470] sm:$0xff]  ;;  %25 = vst [vmem:[#allocation2 + $0x10] sm:$0xff] %v2579_v3  ;;  %26 = vst [vmem:[#allocation2 + $0x18] sm:$0xff] %v2579_v3  ;;  %281 = vmatprep.subr.mxu0 %v129_v0  ;;  %v224_v4 = vld [vmem:[%s4867_s2 + $0x468] sm:$0xff]  ;;  %s2587_s17 = smov 108   ;;  %s2588_s18 = smov 109  }
   0x3   :  { %27 = vst [vmem:[#allocation2 + $0x20] sm:$0xff] %v2579_v3  ;;  %28 = vst [vmem:[#allocation2 + $0x28] sm:$0xff] %v2579_v3  ;;  %358 = vmatprep.subr.mxu1 %v225_v1  ;;  %v126_v5 = vld [vmem:[%s4867_s2 + $0x158] sm:$0xff]  ;;  %282 = vmatpush1.msra.mxu0 %v128_v2  ;;  %v125_v7 = vld [vmem:[%s4867_s2 + $0x150] sm:$0xff]  ;;  %vm748_vm3 = vcmask 744448   ;;  %vm731_vm4 = vcmask 752640  }
   0x4   :  { %29 = vst [vmem:[#allocation2 + $0x30] sm:$0xff] %v2579_v3  ;;  %30 = vst [vmem:[#allocation2 + $0x38] sm:$0xff] %v2579_v3  ;;  %v222_v6 = vld [vmem:[%s4867_s2 + $0x458] sm:$0xff]  ;;  %359 = vmatpush1.msra.mxu1 %v224_v4  ;;  %v221_v8 = vld [vmem:[%s4867_s2 + $0x450] sm:$0xff]  ;;  %283 = vmatprep.subr.mxu0 %v126_v5  ;;  %vm714_vm5 = vcmask 883712   ;;  %vm697_vm6 = vcmask 891904  }
   0x5   :  { %585 = vst [vmem:[#allocation3] sm:$0xff] %v2579_v3  ;;  %588 = vst [vmem:[#allocation3 + $0x18] sm:$0xff] %v2579_v3  ;;  %v123_v9 = vld [vmem:[%s4867_s2 + $0x140] sm:$0xff]  ;;  %360 = vmatprep.subr.mxu1 %v222_v6  ;;  %v122_v11 = vld [vmem:[%s4867_s2 + $0x138] sm:$0xff]  ;;  %284 = vmatpush1.msra.mxu0 %v125_v7  ;;  %vm632_vm7 = vcmask 1039360   ;;  %vm765_vm8 = vcmask 736256  }
   0x6   :  { %592 = vst [vmem:[#allocation3 + $0x38] sm:$0xff] %v2579_v3  ;;  %v219_v10 = vld [vmem:[%s4867_s2 + $0x440] sm:$0xff]  ;;  %v218_v12 = vld [vmem:[%s4867_s2 + $0x438] sm:$0xff]  ;;  %361 = vmatpush1.msra.mxu1 %v221_v8  ;;  %v120_v13 = vld [vmem:[%s4867_s2 + $0x128] sm:$0xff]  ;;  %285 = vmatprep.subr.mxu0 %v123_v9  ;;  %vm1033_vm9 = vcmask 130048   ;;  %vm924_vm10 = vcmask 154624  }
   0x7   :  { %v216_v14 = vld [vmem:[%s4867_s2 + $0x428] sm:$0xff]  ;;  %362 = vmatprep.subr.mxu1 %v219_v10  ;;  %v119_v15 = vld [vmem:[%s4867_s2 + $0x120] sm:$0xff]  ;;  %286 = vmatpush1.msra.mxu0 %v122_v11  ;;  %v117_v17 = vld [vmem:[%s4867_s2 + $0x110] sm:$0xff] }
   0x8   :  { %v215_v16 = vld [vmem:[%s4867_s2 + $0x420] sm:$0xff]  ;;  %363 = vmatpush1.msra.mxu1 %v218_v12  ;;  %v213_v18 = vld [vmem:[%s4867_s2 + $0x410] sm:$0xff]  ;;  %287 = vmatprep.subr.mxu0 %v120_v13  ;;  %v116_v19 = vld [vmem:[%s4867_s2 + $0x108] sm:$0xff]  ;;  %v2580_v12 = vmov 1983009808  }
   0x9   :  { %364 = vmatprep.subr.mxu1 %v216_v14  ;;  %v212_v20 = vld [vmem:[%s4867_s2 + $0x408] sm:$0xff]  ;;  %288 = vmatpush1.msra.mxu0 %v119_v15  ;;  %v114_v21 = vld [vmem:[%s4867_s2 + $0xf8] sm:$0xff]  ;;  %v113_v23 = vld [vmem:[%s4867_s2 + $0xf0] sm:$0xff]  ;;  %v49_v13 = vunpack.c.l.s4 %v2580_v12  ;;  %v51_v14 = vlaneseq }
   0xa   :  { %365 = vmatpush1.msra.mxu1 %v215_v16  ;;  %v210_v22 = vld [vmem:[%s4867_s2 + $0x3f8] sm:$0xff]  ;;  %289 = vmatprep.subr.mxu0 %v117_v17  ;;  %v209_v24 = vld [vmem:[%s4867_s2 + $0x3f0] sm:$0xff]  ;;  %v111_v25 = vld [vmem:[%s4867_s2 + $0xe0] sm:$0xff] }
   0xb   :  { %366 = vmatprep.subr.mxu1 %v213_v18  ;;  %290 = vmatpush1.msra.mxu0 %v116_v19  ;;  %v207_v26 = vld [vmem:[%s4867_s2 + $0x3e0] sm:$0xff]  ;;  %v110_v27 = vld [vmem:[%s4867_s2 + $0xd8] sm:$0xff]  ;;  %v108_v29 = vld [vmem:[%s4867_s2 + $0xc8] sm:$0xff] }
   0xc   :  { %367 = vmatpush1.msra.mxu1 %v212_v20  ;;  %291 = vmatprep.subr.mxu0 %v114_v21  ;;  %v206_v28 = vld [vmem:[%s4867_s2 + $0x3d8] sm:$0xff]  ;;  %v204_v30 = vld [vmem:[%s4867_s2 + $0x3c8] sm:$0xff]  ;;  %v107_v31 = vld [vmem:[%s4867_s2 + $0xc0] sm:$0xff] }
   0xd   :  { %368 = vmatprep.subr.mxu1 %v210_v22  ;;  %292 = vmatpush1.msra.mxu0 %v113_v23  ;;  %v203_v32 = vld [vmem:[%s4867_s2 + $0x3c0] sm:$0xff]  ;;  %v105_v33 = vld [vmem:[%s4867_s2 + $0xb0] sm:$0xff]  ;;  %v104_v35 = vld [vmem:[%s4867_s2 + $0xa8] sm:$0xff]  ;;  %v50_v23 = vunpack.c.0.s8 %v49_v13 }
   0xe   :  { %369 = vmatpush1.msra.mxu1 %v209_v24  ;;  %293 = vmatprep.subr.mxu0 %v111_v25  ;;  %v201_v34 = vld [vmem:[%s4867_s2 + $0x3b0] sm:$0xff]  ;;  %v200_v36 = vld [vmem:[%s4867_s2 + $0x3a8] sm:$0xff]  ;;  %v102_v37 = vld [vmem:[%s4867_s2 + $0x98] sm:$0xff]  ;;  %v52_v24 = vshrl.u32 %v51_v14, 7 }
   0xf   :  { %370 = vmatprep.subr.mxu1 %v207_v26  ;;  %294 = vmatpush1.msra.mxu0 %v110_v27  ;;  %v198_v38 = vld [vmem:[%s4867_s2 + $0x398] sm:$0xff]  ;;  %v101_v39 = vld [vmem:[%s4867_s2 + $0x90] sm:$0xff]  ;;  %v99_v41 = vld [vmem:[%s4867_s2 + $0x80] sm:$0xff] }
  0x10   :  { %371 = vmatpush1.msra.mxu1 %v206_v28  ;;  %295 = vmatprep.subr.mxu0 %v108_v29  ;;  %v197_v40 = vld [vmem:[%s4867_s2 + $0x390] sm:$0xff]  ;;  %v195_v42 = vld [vmem:[%s4867_s2 + $0x380] sm:$0xff]  ;;  %v98_v43 = vld [vmem:[%s4867_s2 + $0x78] sm:$0xff] }
  0x11   :  { %372 = vmatprep.subr.mxu1 %v204_v30  ;;  %296 = vmatpush1.msra.mxu0 %v107_v31  ;;  %v194_v44 = vld [vmem:[%s4867_s2 + $0x378] sm:$0xff]  ;;  %v96_v45 = vld [vmem:[%s4867_s2 + $0x68] sm:$0xff]  ;;  %v95_v47 = vld [vmem:[%s4867_s2 + $0x60] sm:$0xff] }
  0x12   :  { %373 = vmatpush1.msra.mxu1 %v203_v32  ;;  %297 = vmatprep.subr.mxu0 %v105_v33  ;;  %v192_v46 = vld [vmem:[%s4867_s2 + $0x368] sm:$0xff]  ;;  %v191_v48 = vld [vmem:[%s4867_s2 + $0x360] sm:$0xff]  ;;  %v93_v49 = vld [vmem:[%s4867_s2 + $0x50] sm:$0xff] }
  0x13   :  { %374 = vmatprep.subr.mxu1 %v201_v34  ;;  %298 = vmatpush1.msra.mxu0 %v104_v35  ;;  %v189_v50 = vld [vmem:[%s4867_s2 + $0x350] sm:$0xff]  ;;  %v92_v51 = vld [vmem:[%s4867_s2 + $0x48] sm:$0xff]  ;;  %v90_v53 = vld [vmem:[%s4867_s2 + $0x38] sm:$0xff]  ;;  %v53_v34 = vsub.s32 %v50_v23, %v52_v24 }
  0x14   :  { %375 = vmatpush1.msra.mxu1 %v200_v36  ;;  %299 = vmatprep.subr.mxu0 %v102_v37  ;;  %v188_v52 = vld [vmem:[%s4867_s2 + $0x348] sm:$0xff]  ;;  %v186_v54 = vld [vmem:[%s4867_s2 + $0x338] sm:$0xff]  ;;  %v89_v55 = vld [vmem:[%s4867_s2 + $0x30] sm:$0xff] }
  0x15   :  { %376 = vmatprep.subr.mxu1 %v198_v38  ;;  %300 = vmatpush1.msra.mxu0 %v101_v39  ;;  %v185_v56 = vld [vmem:[%s4867_s2 + $0x330] sm:$0xff]  ;;  %v87_v57 = vld [vmem:[%s4867_s2 + $0x20] sm:$0xff]  ;;  %v86_v59 = vld [vmem:[%s4867_s2 + $0x18] sm:$0xff] }
  0x16   :  { %377 = vmatpush1.msra.mxu1 %v197_v40  ;;  %301 = vmatprep.subr.mxu0 %v99_v41  ;;  %v183_v58 = vld [vmem:[%s4867_s2 + $0x320] sm:$0xff]  ;;  %v182_v60 = vld [vmem:[%s4867_s2 + $0x318] sm:$0xff]  ;;  %v84_v61 = vld [vmem:[%s4867_s2 + $0x8] sm:$0xff] }
  0x17   :  { %378 = vmatprep.subr.mxu1 %v195_v42  ;;  %302 = vmatpush1.msra.mxu0 %v98_v43  ;;  %v180_v62 = vld [vmem:[%s4867_s2 + $0x308] sm:$0xff]  ;;  %v83_v63 = vld [vmem:[%s4867_s2] sm:$0xff]  ;;  %v177_v1 = vld [vmem:[%s4867_s2 + $0x2f0] sm:$0xff] }
  0x18   :  { %379 = vmatpush1.msra.mxu1 %v194_v44  ;;  %303 = vmatprep.subr.mxu0 %v96_v45  ;;  %v179_v0 = vld [vmem:[%s4867_s2 + $0x300] sm:$0xff]  ;;  %v273_v2 = vld [vmem:[%s4867_s2 + $0x5f0] sm:$0xff]  ;;  %v176_v4 = vld [vmem:[%s4867_s2 + $0x2e8] sm:$0xff] }
  0x19   :  { %380 = vmatprep.subr.mxu1 %v192_v46  ;;  %304 = vmatpush1.msra.mxu0 %v95_v47  ;;  %v272_v5 = vld [vmem:[%s4867_s2 + $0x5e8] sm:$0xff]  ;;  %v174_v6 = vld [vmem:[%s4867_s2 + $0x2d8] sm:$0xff]  ;;  %v173_v8 = vld [vmem:[%s4867_s2 + $0x2d0] sm:$0xff] }
  0x1a   :  { %381 = vmatpush1.msra.mxu1 %v191_v48  ;;  %305 = vmatprep.subr.mxu0 %v93_v49  ;;  %v270_v7 = vld [vmem:[%s4867_s2 + $0x5d8] sm:$0xff]  ;;  %v269_v9 = vld [vmem:[%s4867_s2 + $0x5d0] sm:$0xff]  ;;  %v171_v10 = vld [vmem:[%s4867_s2 + $0x2c0] sm:$0xff] }
  0x1b   :  { %382 = vmatprep.subr.mxu1 %v189_v50  ;;  %306 = vmatpush1.msra.mxu0 %v92_v51  ;;  %v267_v11 = vld [vmem:[%s4867_s2 + $0x5c0] sm:$0xff]  ;;  %v170_v15 = vld [vmem:[%s4867_s2 + $0x2b8] sm:$0xff]  ;;  %v168_v17 = vld [vmem:[%s4867_s2 + $0x2a8] sm:$0xff] }
  0x1c   :  { %383 = vmatpush1.msra.mxu1 %v188_v52  ;;  %307 = vmatprep.subr.mxu0 %v90_v53  ;;  %v266_v16 = vld [vmem:[%s4867_s2 + $0x5b8] sm:$0xff]  ;;  %v264_v18 = vld [vmem:[%s4867_s2 + $0x5a8] sm:$0xff]  ;;  %v167_v19 = vld [vmem:[%s4867_s2 + $0x2a0] sm:$0xff] }
  0x1d   :  { %384 = vmatprep.subr.mxu1 %v186_v54  ;;  %308 = vmatpush1.msra.mxu0 %v89_v55  ;;  %v263_v20 = vld [vmem:[%s4867_s2 + $0x5a0] sm:$0xff]  ;;  %v165_v21 = vld [vmem:[%s4867_s2 + $0x290] sm:$0xff]  ;;  %v164_v25 = vld [vmem:[%s4867_s2 + $0x288] sm:$0xff] }
  0x1e   :  { %385 = vmatpush1.msra.mxu1 %v185_v56  ;;  %309 = vmatprep.subr.mxu0 %v87_v57  ;;  %v261_v22 = vld [vmem:[%s4867_s2 + $0x590] sm:$0xff]  ;;  %v260_v26 = vld [vmem:[%s4867_s2 + $0x588] sm:$0xff]  ;;  %v162_v27 = vld [vmem:[%s4867_s2 + $0x278] sm:$0xff] }
  0x1f   :  { %386 = vmatprep.subr.mxu1 %v183_v58  ;;  %310 = vmatpush1.msra.mxu0 %v86_v59  ;;  %v258_v28 = vld [vmem:[%s4867_s2 + $0x578] sm:$0xff]  ;;  %v161_v29 = vld [vmem:[%s4867_s2 + $0x270] sm:$0xff]  ;;  %v159_v31 = vld [vmem:[%s4867_s2 + $0x260] sm:$0xff] }
  0x20   :  { %387 = vmatpush1.msra.mxu1 %v182_v60  ;;  %311 = vmatprep.subr.mxu0 %v84_v61  ;;  %v257_v30 = vld [vmem:[%s4867_s2 + $0x570] sm:$0xff]  ;;  %v255_v32 = vld [vmem:[%s4867_s2 + $0x560] sm:$0xff]  ;;  %v158_v35 = vld [vmem:[%s4867_s2 + $0x258] sm:$0xff] }
  0x21   :  { %388 = vmatprep.subr.mxu1 %v180_v62  ;;  %312 = vmatpush1.msra.mxu0 %v83_v63  ;;  %v2394_v33 = vld.sshfl [vmem:[%s4868_s0] sm:$0x33 pattern:$0x76325410]  ;;  %v254_v36 = vld [vmem:[%s4867_s2 + $0x558] sm:$0xff]  ;;  %v156_v39 = vld [vmem:[%s4867_s2 + $0x248] sm:$0xff] }
  0x22   :  { %389 = vmatpush1.msra.mxu1 %v179_v0  ;;  %313 = vmatprep.subr.mxu0 %v177_v1  ;;  %v41_v37 = vcombine.high %v2394_v33, %v2394_v33  ;;  %44 = vst [vmem:[#allocation2] sm:$0x3] %v2394_v33  ;;  %73 = vst [vmem:[#allocation2 + $0x30] sm:$0x3] %v2394_v33  ;;  %v32_v38 = vld [vmem:[%s4869_s1] sm:$0xf] }
  0x23   :  { %390 = vmatprep.subr.mxu1 %v273_v2  ;;  %314 = vmatpush2.msra.mxu0 %v176_v4  ;;  %v252_v40 = vld [vmem:[%s4867_s2 + $0x548] sm:$0xff]  ;;  %v46_v41 = vsub.f32 0.0, %v32_v38  ;;  %2396 = vst.sshfl [vmem:[#allocation2 + $0x20] sm:$0x3 pattern:$0x76325410] %v32_v38  ;;  %v67_v42 = vrot.slane %v32_v38, %v53_v34 }
  0x24   :  { %391 = vmatpush2.msra.mxu1 %v272_v5  ;;  %315 = vmatprep.subr.mxu0 %v174_v6  ;;  %v155_v43 = vld [vmem:[%s4867_s2 + $0x240] sm:$0xff]  ;;  %45 = vst [vmem:[#allocation2 + $0x8] sm:$0x3] %v41_v37  ;;  %74 = vst [vmem:[#allocation2 + $0x38] sm:$0x3] %v41_v37  ;;  %v153_v45 = vld [vmem:[%s4867_s2 + $0x230] sm:$0xff] }
  0x25   :  { %392 = vmatprep.subr.mxu1 %v270_v7  ;;  %316 = vmatpush2.msra.mxu0 %v173_v8  ;;  %v251_v44 = vld [vmem:[%s4867_s2 + $0x540] sm:$0xff]  ;;  %v249_v46 = vld [vmem:[%s4867_s2 + $0x530] sm:$0xff]  ;;  %v54_v47 = vrot.slane %v46_v41, %v53_v34  ;;  %2395 = vst.sshfl [vmem:[#allocation2 + $0x10] sm:$0x3 pattern:$0x76325410] %v46_v41  ;;  %v68_v48 = vcombine.high %v67_v42, %v67_v42 }
  0x26   :  { %393 = vmatpush2.msra.mxu1 %v269_v9  ;;  %317 = vmatprep.subr.mxu0 %v171_v10  ;;  %v152_v49 = vld [vmem:[%s4867_s2 + $0x228] sm:$0xff]  ;;  %v150_v51 = vld [vmem:[%s4867_s2 + $0x218] sm:$0xff]  ;;  %v149_v54 = vld [vmem:[%s4867_s2 + $0x210] sm:$0xff]  ;;  %s2586_s0 = smov 90  }
  0x27   :  { %394 = vmatprep.subr.mxu1 %v267_v11  ;;  %318 = vmatpush2.msra.mxu0 %v170_v15  ;;  %v248_v50 = vld [vmem:[%s4867_s2 + $0x528] sm:$0xff]  ;;  %v246_v52 = vld [vmem:[%s4867_s2 + $0x518] sm:$0xff]  ;;  %v55_v53 = vcombine.high %v54_v47, %v54_v47  ;;  %72 = vst [vmem:[#allocation2 + $0x28] sm:$0x3] %v68_v48  ;;  %v245_v55 = vld [vmem:[%s4867_s2 + $0x510] sm:$0xff] }
  0x28   :  { %395 = vmatpush2.msra.mxu1 %v266_v16  ;;  %319 = vmatprep.subr.mxu0 %v168_v17  ;;  %v147_v56 = vld [vmem:[%s4867_s2 + $0x200] sm:$0xff]  ;;  %v146_v58 = vld [vmem:[%s4867_s2 + $0x1f8] sm:$0xff]  ;;  %v144_v60 = vld [vmem:[%s4867_s2 + $0x1e8] sm:$0xff] }
  0x29   :  { %396 = vmatprep.subr.mxu1 %v264_v18  ;;  %320 = vmatpush2.msra.mxu0 %v167_v19  ;;  %v243_v57 = vld [vmem:[%s4867_s2 + $0x500] sm:$0xff]  ;;  %59 = vst [vmem:[#allocation2 + $0x18] sm:$0x3] %v55_v53  ;;  %v242_v59 = vld [vmem:[%s4867_s2 + $0x4f8] sm:$0xff]  ;;  %v240_v61 = vld [vmem:[%s4867_s2 + $0x4e8] sm:$0xff] }
  0x2a   :  { %397 = vmatpush2.msra.mxu1 %v263_v20  ;;  %321 = vmatprep.subr.mxu0 %v165_v21  ;;  %v143_v62 = vld [vmem:[%s4867_s2 + $0x1e0] sm:$0xff]  ;;  %v141_v0 = vld [vmem:[%s4867_s2 + $0x1d0] sm:$0xff]  ;;  %v140_v2 = vld [vmem:[%s4867_s2 + $0x1c8] sm:$0xff] }
  0x2b   :  { %398 = vmatprep.subr.mxu1 %v261_v22  ;;  %322 = vmatpush2.msra.mxu0 %v164_v25  ;;  %v239_v63 = vld [vmem:[%s4867_s2 + $0x4e0] sm:$0xff]  ;;  %v237_v1 = vld [vmem:[%s4867_s2 + $0x4d0] sm:$0xff]  ;;  %v236_v4 = vld [vmem:[%s4867_s2 + $0x4c8] sm:$0xff] }
  0x2c   :  { %399 = vmatpush2.msra.mxu1 %v260_v26  ;;  %323 = vmatprep.subr.mxu0 %v162_v27  ;;  %v138_v5 = vld [vmem:[%s4867_s2 + $0x1b8] sm:$0xff]  ;;  %v137_v7 = vld [vmem:[%s4867_s2 + $0x1b0] sm:$0xff]  ;;  %v135_v9 = vld [vmem:[%s4867_s2 + $0x1a0] sm:$0xff] }
  0x2d   :  { %400 = vmatprep.subr.mxu1 %v258_v28  ;;  %324 = vmatpush2.msra.mxu0 %v161_v29  ;;  %v234_v6 = vld [vmem:[%s4867_s2 + $0x4b8] sm:$0xff]  ;;  %v233_v8 = vld [vmem:[%s4867_s2 + $0x4b0] sm:$0xff]  ;;  %v231_v10 = vld [vmem:[%s4867_s2 + $0x4a0] sm:$0xff] }
  0x2e   :  { %401 = vmatpush2.msra.mxu1 %v257_v30  ;;  %325 = vmatprep.subr.mxu0 %v159_v31  ;;  %v134_v11 = vld [vmem:[%s4867_s2 + $0x198] sm:$0xff]  ;;  %v132_v13 = vld [vmem:[%s4867_s2 + $0x188] sm:$0xff]  ;;  %v131_v15 = vld [vmem:[%s4867_s2 + $0x180] sm:$0xff] }
  0x2f   :  { %402 = vmatprep.subr.mxu1 %v255_v32  ;;  %326 = vmatpush2.msra.mxu0 %v158_v35  ;;  %v230_v12 = vld [vmem:[%s4867_s2 + $0x498] sm:$0xff]  ;;  %v228_v14 = vld [vmem:[%s4867_s2 + $0x488] sm:$0xff]  ;;  %v227_v17 = vld [vmem:[%s4867_s2 + $0x480] sm:$0xff] }
  0x30   :  { %403 = vmatpush2.msra.mxu1 %v254_v36  ;;  %327 = vmatprep.subr.mxu0 %v156_v39  ;;  %v3023_v16 = vld [vmem:[#allocation2 + $0x8] sm:$0xff]  ;;  %v3028_v18 = vld [vmem:[#allocation2 + $0x18] sm:$0xff]  ;;  %v3030_v19 = vld [vmem:[#allocation2] sm:$0xff] }
  0x31   :  { %404 = vmatprep.subr.mxu1 %v252_v40  ;;  %328 = vmatpush2.msra.mxu0 %v155_v43  ;;  %v3032_v20 = vld [vmem:[#allocation2 + $0x10] sm:$0xff]  ;;  %v178_v21 = vld [vmem:[%s4867_s2 + $0x2f8] sm:$0xff]  ;;  %v175_v25 = vld [vmem:[%s4867_s2 + $0x2e0] sm:$0xff] }
  0x32   :  { %405 = vmatpush2.msra.mxu1 %v251_v44  ;;  %329 = vmatprep.subr.mxu0 %v153_v45  ;;  %v274_v22 = vld [vmem:[%s4867_s2 + $0x5f8] sm:$0xff]  ;;  %v271_v26 = vld [vmem:[%s4867_s2 + $0x5e0] sm:$0xff]  ;;  %v172_v29 = vld [vmem:[%s4867_s2 + $0x2c8] sm:$0xff] }
  0x33   :  { %406 = vmatprep.subr.mxu1 %v249_v46  ;;  %330 = vmatpush2.msra.mxu0 %v152_v49  ;;  %v130_v23 = vld [vmem:[%s4867_s2 + $0x178] sm:$0xff]  ;;  %v127_v27 = vld [vmem:[%s4867_s2 + $0x160] sm:$0xff]  ;;  %v3065_v30 = vld [vmem:[#allocation2 + $0x28] sm:$0xff] }
  0x34   :  { %407 = vmatpush2.msra.mxu1 %v248_v50  ;;  %331 = vmatprep.subr.mxu0 %v150_v51  ;;  %v226_v24 = vld [vmem:[%s4867_s2 + $0x478] sm:$0xff]  ;;  %v223_v28 = vld [vmem:[%s4867_s2 + $0x460] sm:$0xff]  ;;  %v124_v31 = vld [vmem:[%s4867_s2 + $0x148] sm:$0xff] }
  0x35   :  { %408 = vmatprep.subr.mxu1 %v246_v52  ;;  %332 = vmatpush2.msra.mxu0 %v149_v54  ;;  %v268_v32 = vld [vmem:[%s4867_s2 + $0x5c8] sm:$0xff]  ;;  %v169_v33 = vld [vmem:[%s4867_s2 + $0x2b0] sm:$0xff]  ;;  %v3076_v34 = vld [vmem:[#allocation2 + $0x20] sm:$0xff] }
  0x36   :  { %409 = vmatpush2.msra.mxu1 %v245_v55  ;;  %333 = vmatprep.subr.mxu0 %v147_v56  ;;  %v121_v35 = vld [vmem:[%s4867_s2 + $0x130] sm:$0xff]  ;;  %v220_v36 = vld [vmem:[%s4867_s2 + $0x448] sm:$0xff]  ;;  %v3085_v37 = vld [vmem:[#allocation2 + $0x38] sm:$0xff] }
  0x37   :  { %410 = vmatprep.subr.mxu1 %v243_v57  ;;  %334 = vmatpush2.msra.mxu0 %v146_v58  ;;  %v166_v38 = vld [vmem:[%s4867_s2 + $0x298] sm:$0xff]  ;;  %v265_v39 = vld [vmem:[%s4867_s2 + $0x5b0] sm:$0xff]  ;;  %v163_v43 = vld [vmem:[%s4867_s2 + $0x280] sm:$0xff] }
  0x38   :  { %411 = vmatpush2.msra.mxu1 %v242_v59  ;;  %335 = vmatprep.subr.mxu0 %v144_v60  ;;  %v3094_v40 = vld [vmem:[#allocation2 + $0x30] sm:$0xff]  ;;  %v118_v41 = vld [vmem:[%s4867_s2 + $0x118] sm:$0xff]  ;;  %v115_v45 = vld [vmem:[%s4867_s2 + $0x100] sm:$0xff] }
  0x39   :  { %412 = vmatprep.subr.mxu1 %v240_v61  ;;  %336 = vmatpush2.msra.mxu0 %v143_v62  ;;  %v217_v42 = vld [vmem:[%s4867_s2 + $0x430] sm:$0xff]  ;;  %v262_v44 = vld [vmem:[%s4867_s2 + $0x598] sm:$0xff]  ;;  %v160_v47 = vld [vmem:[%s4867_s2 + $0x268] sm:$0xff] }
  0x3a   :  { %413 = vmatpush2.msra.mxu1 %v239_v63  ;;  %337 = vmatprep.subr.mxu0 %v141_v0  ;;  %v214_v46 = vld [vmem:[%s4867_s2 + $0x418] sm:$0xff]  ;;  %v259_v48 = vld [vmem:[%s4867_s2 + $0x580] sm:$0xff]  ;;  %v112_v49 = vld [vmem:[%s4867_s2 + $0xe8] sm:$0xff] }
  0x3b   :  { %414 = vmatprep.subr.mxu1 %v237_v1  ;;  %338 = vmatpush2.msra.mxu0 %v140_v2  ;;  %v211_v50 = vld [vmem:[%s4867_s2 + $0x400] sm:$0xff]  ;;  %v157_v51 = vld [vmem:[%s4867_s2 + $0x250] sm:$0xff]  ;;  %v256_v52 = vld [vmem:[%s4867_s2 + $0x568] sm:$0xff] }
  0x3c   :  { %415 = vmatpush2.msra.mxu1 %v236_v4  ;;  %339 = vmatprep.subr.mxu0 %v138_v5  ;;  %v109_v53 = vld [vmem:[%s4867_s2 + $0xd0] sm:$0xff]  ;;  %v208_v54 = vld [vmem:[%s4867_s2 + $0x3e8] sm:$0xff]  ;;  %v154_v55 = vld [vmem:[%s4867_s2 + $0x238] sm:$0xff] }
  0x3d   :  { %416 = vmatprep.subr.mxu1 %v234_v6  ;;  %340 = vmatpush2.msra.mxu0 %v137_v7  ;;  %v253_v56 = vld [vmem:[%s4867_s2 + $0x550] sm:$0xff]  ;;  %v106_v57 = vld [vmem:[%s4867_s2 + $0xb8] sm:$0xff]  ;;  %v151_v59 = vld [vmem:[%s4867_s2 + $0x220] sm:$0xff] }
  0x3e   :  { %417 = vmatpush2.msra.mxu1 %v233_v8  ;;  %341 = vmatprep.subr.mxu0 %v135_v9  ;;  %v205_v58 = vld [vmem:[%s4867_s2 + $0x3d0] sm:$0xff]  ;;  %v250_v60 = vld [vmem:[%s4867_s2 + $0x538] sm:$0xff]  ;;  %v103_v61 = vld [vmem:[%s4867_s2 + $0xa0] sm:$0xff] }
  0x3f   :  { %418 = vmatprep.subr.mxu1 %v231_v10  ;;  %342 = vmatpush2.msra.mxu0 %v134_v11  ;;  %v202_v62 = vld [vmem:[%s4867_s2 + $0x3b8] sm:$0xff]  ;;  %v148_v63 = vld [vmem:[%s4867_s2 + $0x208] sm:$0xff]  ;;  %v247_v0 = vld [vmem:[%s4867_s2 + $0x520] sm:$0xff] }
  0x40   :  { %419 = vmatpush2.msra.mxu1 %v230_v12  ;;  %343 = vmatprep.subr.mxu0 %v132_v13  ;;  %v100_v1 = vld [vmem:[%s4867_s2 + $0x88] sm:$0xff]  ;;  %v199_v2 = vld [vmem:[%s4867_s2 + $0x3a0] sm:$0xff]  ;;  %v145_v4 = vld [vmem:[%s4867_s2 + $0x1f0] sm:$0xff] }
  0x41   :  { %420 = vmatprep.subr.mxu1 %v228_v14  ;;  %344 = vmatpush2.msra.mxu0 %v131_v15  ;;  %v244_v5 = vld [vmem:[%s4867_s2 + $0x508] sm:$0xff]  ;;  %v97_v6 = vld [vmem:[%s4867_s2 + $0x70] sm:$0xff]  ;;  %v142_v8 = vld [vmem:[%s4867_s2 + $0x1d8] sm:$0xff] }
  0x42   :  { %345 = vmatprep.mubr.f32.mxu0 %v3023_v16  ;;  %421 = vmatpush2.msra.mxu1 %v227_v17  ;;  %v196_v7 = vld [vmem:[%s4867_s2 + $0x388] sm:$0xff]  ;;  %v241_v9 = vld [vmem:[%s4867_s2 + $0x4f0] sm:$0xff]  ;;  %v94_v10 = vld [vmem:[%s4867_s2 + $0x58] sm:$0xff] }
  0x43   :  { %422 = vmatprep.mubr.f32.mxu1 %v3028_v18  ;;  %346 = vmatmul.mubr.f32.vlgmr.msra.gmra.mxu0 %v3030_v19  ;;  %v193_v11 = vld [vmem:[%s4867_s2 + $0x370] sm:$0xff]  ;;  %v139_v12 = vld [vmem:[%s4867_s2 + $0x1c0] sm:$0xff]  ;;  %v238_v13 = vld [vmem:[%s4867_s2 + $0x4d8] sm:$0xff] }
  0x44   :  { %423 = vmatmul.mubr.f32.vlgmr.msra.gmra.mxu1 %v3032_v20  ;;  %2429 = vmatprep.subr.mxu0 %v178_v21  ;;  %v91_v14 = vld [vmem:[%s4867_s2 + $0x40] sm:$0xff]  ;;  %v190_v15 = vld [vmem:[%s4867_s2 + $0x358] sm:$0xff]  ;;  %v136_v17 = vld [vmem:[%s4867_s2 + $0x1a8] sm:$0xff] }
  0x45   :  { %2467 = vmatprep.subr.mxu1 %v274_v22  ;;  %2430 = vmatpush3.msra.mxu0 %v130_v23  ;;  %v235_v21 = vld [vmem:[%s4867_s2 + $0x4c0] sm:$0xff]  ;;  %v88_v22 = vld [vmem:[%s4867_s2 + $0x28] sm:$0xff] }
  0x46   :  { %2468 = vmatpush3.msra.mxu1 %v226_v24  ;;  %2431 = vmatprep.subr.mxu0 %v175_v25  ;;  %v187_v23 = vld [vmem:[%s4867_s2 + $0x340] sm:$0xff]  ;;  %v133_v24 = vld [vmem:[%s4867_s2 + $0x190] sm:$0xff]  ;;  %v232_v25 = vld [vmem:[%s4867_s2 + $0x4a8] sm:$0xff] }
  0x47   :  { %2469 = vmatprep.subr.mxu1 %v271_v26  ;;  %2432 = vmatpush3.msra.mxu0 %v127_v27  ;;  %v85_v26 = vld [vmem:[%s4867_s2 + $0x10] sm:$0xff]  ;;  %v184_v27 = vld [vmem:[%s4867_s2 + $0x328] sm:$0xff] }
  0x48   :  { %2470 = vmatpush3.msra.mxu1 %v223_v28  ;;  %2433 = vmatprep.subr.mxu0 %v172_v29  ;;  %v229_v28 = vld [vmem:[%s4867_s2 + $0x490] sm:$0xff] }
  0x49   :  { %351 = vmatprep.mubr.f32.mxu0 %v3065_v30  ;;  %2434 = vmatpush3.msra.mxu0 %v124_v31  ;;  %v181_v29 = vld [vmem:[%s4867_s2 + $0x310] sm:$0xff]  ;;  %s2581_s2 = smov 110   ;;  %v276_v31 = vld [vmem:[%s4870_s3 + $0x8] sm:$0xff] }
  0x4a   :  { %2471 = vmatprep.subr.mxu1 %v268_v32  ;;  %2435 = vmatprep.subr.mxu0 %v169_v33 }
  0x4b   :  { %352 = vmatmul.mubr.f32.gmra.mxu0 %v3076_v34  ;;  %2472 = vmatpush3.msra.mxu1 %v220_v36  ;;  %v278_v36 = vld [vmem:[%s4870_s3 + $0x18] sm:$0xff] }
  0x4c   :  { %2436 = vmatpush3.msra.mxu0 %v121_v35  ;;  %428 = vmatprep.mubr.f32.mxu1 %v3085_v37 }
  0x4d   :  { %2437 = vmatprep.subr.mxu0 %v166_v38  ;;  %2473 = vmatprep.subr.mxu1 %v265_v39 }
  0x4e   :  { %429 = vmatmul.mubr.f32.gmra.mxu1 %v3094_v40  ;;  %2438 = vmatpush3.msra.mxu0 %v118_v41 }
  0x4f   :  { %2474 = vmatpush3.msra.mxu1 %v217_v42  ;;  %2439 = vmatprep.subr.mxu0 %v163_v43 }
  0x50   :  { %2475 = vmatprep.subr.mxu1 %v262_v44  ;;  %2440 = vmatpush3.msra.mxu0 %v115_v45  ;;  %v279_v44 = vld [vmem:[%s4870_s3 + $0x20] sm:$0xff]  ;;  %v277_v45 = vld [vmem:[%s4870_s3 + $0x10] sm:$0xff] }
  0x51   :  { %2476 = vmatpush3.msra.mxu1 %v214_v46  ;;  %2441 = vmatprep.subr.mxu0 %v160_v47 }
  0x52   :  { %2477 = vmatprep.subr.mxu1 %v259_v48  ;;  %2442 = vmatpush3.msra.mxu0 %v112_v49 }
  0x53   :  { %2478 = vmatpush3.msra.mxu1 %v211_v50  ;;  %2443 = vmatprep.subr.mxu0 %v157_v51 }
  0x54   :  { %2479 = vmatprep.subr.mxu1 %v256_v52  ;;  %2444 = vmatpush3.msra.mxu0 %v109_v53 }
  0x55   :  { %2480 = vmatpush3.msra.mxu1 %v208_v54  ;;  %2445 = vmatprep.subr.mxu0 %v154_v55  ;;  %v280_v54 = vld [vmem:[%s4870_s3 + $0x28] sm:$0xff] }
  0x56   :  { %2481 = vmatprep.subr.mxu1 %v253_v56  ;;  %2446 = vmatpush3.msra.mxu0 %v106_v57 }
  0x57   :  { %2482 = vmatpush3.msra.mxu1 %v205_v58  ;;  %2447 = vmatprep.subr.mxu0 %v151_v59 }
  0x58   :  { %2483 = vmatprep.subr.mxu1 %v250_v60  ;;  %2448 = vmatpush3.msra.mxu0 %v103_v61 }
  0x59   :  { %2484 = vmatpush3.msra.mxu1 %v202_v62  ;;  %2449 = vmatprep.subr.mxu0 %v148_v63 }
  0x5a   :  { %2485 = vmatprep.subr.mxu1 %v247_v0  ;;  %2450 = vmatpush3.msra.mxu0 %v100_v1 }
  0x5b   :  { %2486 = vmatpush3.msra.mxu1 %v199_v2  ;;  %2451 = vmatprep.subr.mxu0 %v145_v4 }
  0x5c   :  { %2487 = vmatprep.subr.mxu1 %v244_v5  ;;  %2452 = vmatpush3.msra.mxu0 %v97_v6 }
  0x5d   :  { %2488 = vmatpush3.msra.mxu1 %v196_v7  ;;  %2453 = vmatprep.subr.mxu0 %v142_v8 }
  0x5e   :  { %2489 = vmatprep.subr.mxu1 %v241_v9  ;;  %2454 = vmatpush3.msra.mxu0 %v94_v10 }
  0x5f   :  { %2490 = vmatpush3.msra.mxu1 %v193_v11  ;;  %2455 = vmatprep.subr.mxu0 %v139_v12 }
  0x60   :  { %2491 = vmatprep.subr.mxu1 %v238_v13  ;;  %2456 = vmatpush3.msra.mxu0 %v91_v14 }
  0x61   :  { %2492 = vmatpush3.msra.mxu1 %v190_v15  ;;  %2457 = vmatprep.subr.mxu0 %v136_v17 }
  0x62   :  { %2493 = vmatprep.subr.mxu1 %v235_v21  ;;  %2458 = vmatpush3.msra.mxu0 %v88_v22 }
  0x63   :  { %2494 = vmatpush3.msra.mxu1 %v187_v23  ;;  %2459 = vmatprep.subr.mxu0 %v133_v24 }
  0x64   :  { %2495 = vmatprep.subr.mxu1 %v232_v25  ;;  %2460 = vmatpush3.msra.mxu0 %v85_v26 }
  0x65   :  { %499 = vmatprep.mubr.f32.mxu0 %v3023_v16  ;;  %2496 = vmatpush3.msra.mxu1 %v184_v27  ;;  %v275_v16 = vld [vmem:[%s4870_s3] sm:$0xff]  ;;  %s2589_s3 = smov 19  }
  0x66   :  { %500 = vmatmul.mubr.f32.vlgmr.msra.gmra.mxu0 %v3030_v19  ;;  %2497 = vmatprep.subr.mxu1 %v229_v28 }
  0x67   :  { %574 = vmatprep.mubr.f32.mxu1 %v3028_v18  ;;  %2498 = vmatpush3.msra.mxu1 %v181_v29 }
  0x68   :  { %504 = vmatprep.mubr.f32.mxu0 %v3065_v30  ;;  %575 = vmatmul.mubr.f32.vlgmr.msra.gmra.mxu1 %v3032_v20 }
  0x69   :  { %1117 = vmatprep.subr.mxu1 %v2579_v3  ;;  %579 = vmatprep.mubr.f32.mxu1 %v3085_v37 }
  0x6a   :  { %505 = vmatmul.mubr.f32.gmra.mxu0 %v3076_v34  ;;  %2517 = vrot.lane.b32.xlu1 %v2579_v3, %s2581_s2 }
  0x6c   :  { %580 = vmatmul.mubr.f32.gmra.mxu1 %v3094_v40 }
  0x6e   :  { %2527 = vrot.lane.b32.xlu1 %v2579_v3, %s2583_s10 }
  0x73   :  { %v3387_v4 = vpop.permute.xlu0 %2522 }
  0x74   :  { %v2525_v22 = vunpack.i.h.bf16 %v3387_v4 }
  0xdc   :  { %v3385_v2 = vpop.permute.xlu1 %2517 }
  0xdd   :  { %v2520_v14 = vunpack.i.h.bf16 %v3385_v2 }
  0xe0   :  { %v3389_v5 = vpop.permute.xlu1 %2527 }
 0x103   :  { %v347_v18 = vpop.f32.mrf.mxu0 }
 0x104   :  { %v348_v19 = vadd.f32 %v347_v18, %v275_v16  ;;  %v424_v20 = vpop.f32.mrf.mxu1 }
 0x105   :  { %v349_v32 = vpop.f32.mrf.mxu0 }
 0x106   :  { %v3260_v30 = vadd.f32 %v424_v20, %v348_v19  ;;  %v350_v33 = vadd.f32 %v349_v32, %v276_v31  ;;  %v426_v34 = vpop.f32.mrf.mxu1 }
 0x108   :  { %664 = vrot.lane.b32.xlu0 %v3260_v30, %s2581_s2  ;;  %736 = vrot.lane.b32.xlu1 %v3260_v30, %s2584_s13  ;;  %v3277_v35 = vadd.f32 %v426_v34, %v350_v33 }
 0x10b   :  { %v353_v37 = vpop.f32.mrf.mxu0 }
 0x10c   :  { %618 = vrot.lane.b32.xlu0 %v3260_v30, %s2583_s10  ;;  %719 = vrot.lane.b32.xlu1 %v3260_v30, %s2585_s16  ;;  %v354_v38 = vadd.f32 %v353_v37, %v278_v36 }
 0x10d   :  { %v355_v40 = vpop.f32.mrf.mxu0 }
 0x10e   :  { %v430_v39 = vpop.f32.mrf.mxu1  ;;  %v356_v50 = vadd.f32 %v355_v40, %v279_v44 }
 0x10f   :  { %v3298_v41 = vadd.f32 %v430_v39, %v354_v38 }
 0x110   :  { %753 = vrot.lane.b32.xlu0 %v3260_v30, %s2586_s0  ;;  %702 = vrot.lane.b32.xlu1 %v3260_v30, %s2587_s17  ;;  %v432_v43 = vpop.f32.mrf.mxu1 }
 0x111   :  { %v3321_v59 = vadd.f32 %v432_v43, %v356_v50 }
 0x114   :  { %738 = vrot.lane.b32.xlu0 %v3277_v35, %s2584_s13  ;;  %685 = vrot.lane.b32.xlu1 %v3260_v30, %s2588_s18 }
 0x118   :  { %721 = vrot.lane.b32.xlu0 %v3277_v35, %s2585_s16  ;;  %641 = vrot.lane.b32.xlu1 %v3260_v30, %s2582_s9 }
 0x11c   :  { %704 = vrot.lane.b32.xlu0 %v3277_v35, %s2587_s17  ;;  %666 = vrot.lane.b32.xlu1 %v3277_v35, %s2581_s2 }
 0x120   :  { %687 = vrot.lane.b32.xlu0 %v3277_v35, %s2588_s18  ;;  %620 = vrot.lane.b32.xlu1 %v3277_v35, %s2583_s10 }
 0x124   :  { %643 = vrot.lane.b32.xlu0 %v3277_v35, %s2582_s9  ;;  %755 = vrot.lane.b32.xlu1 %v3277_v35, %s2586_s0 }
 0x126   :  { %v2461_v42 = vpop.f32.mrf.mxu0 }
 0x128   :  { %v2462_v46 = vpop.f32.mrf.mxu0  ;;  %742 = vrot.lane.b32.xlu0 %v3298_v41, %s2584_s13  ;;  %649 = vrot.lane.b32.xlu1 %v3298_v41, %s2582_s9  ;;  %v2499_v48 = vpop.f32.mrf.mxu1 }
 0x129   :  { %v2463_v47 = vadd.f32 %v2462_v46, %v2461_v42 }
 0x12a   :  { %v2464_v49 = vpop.f32.mrf.mxu0  ;;  %v2500_v52 = vpop.f32.mrf.mxu1 }
 0x12b   :  { %v502_v51 = vadd.f32 %v2463_v47, %v277_v45  ;;  %v2501_v53 = vadd.f32 %v2500_v52, %v2499_v48 }
 0x12c   :  { %v2465_v55 = vpop.f32.mrf.mxu0  ;;  %725 = vrot.lane.b32.xlu0 %v3298_v41, %s2585_s16  ;;  %759 = vrot.lane.b32.xlu1 %v3298_v41, %s2586_s0  ;;  %v2502_v57 = vpop.f32.mrf.mxu1 }
 0x12d   :  { %v2466_v56 = vadd.f32 %v2465_v55, %v2464_v49  ;;  %v577_v58 = vadd.f32 %v2501_v53, %v502_v51  ;;  %v2519_v53 = vunpack.i.l.bf16 %v3385_v2 }
 0x12e   :  { %v2503_v61 = vpop.f32.mrf.mxu1 }
 0x12f   :  { %v507_v60 = vadd.f32 %v2466_v56, %v280_v54  ;;  %596 = vst.msk [vmem:[#allocation3 + $0x18] sm:$0xff] %vm595_vm0, %v577_v58  ;;  %v2504_v62 = vadd.f32 %v2503_v61, %v2502_v57  ;;  %v2524_v57 = vunpack.i.l.bf16 %v3387_v4 }
 0x130   :  { %708 = vrot.lane.b32.xlu0 %v3298_v41, %s2587_s17  ;;  %727 = vrot.lane.b32.xlu1 %v3321_v59, %s2585_s16 }
 0x131   :  { %v582_v63 = vadd.f32 %v2504_v62, %v507_v60  ;;  %v2529_v62 = vunpack.i.l.bf16 %v3389_v5 }
 0x133   :  { %599 = vst.msk [vmem:[#allocation3 + $0x38] sm:$0xff] %vm595_vm0, %v582_v63 }
 0x134   :  { %691 = vrot.lane.b32.xlu0 %v3298_v41, %s2588_s18  ;;  %710 = vrot.lane.b32.xlu1 %v3321_v59, %s2587_s17 }
 0x136   :  { %v3345_v0 = vld [vmem:[#allocation3 + $0x18] sm:$0xff] }
 0x138   :  { %672 = vrot.lane.b32.xlu0 %v3298_v41, %s2581_s2  ;;  %693 = vrot.lane.b32.xlu1 %v3321_v59, %s2588_s18 }
 0x13a   :  { %v3367_v1 = vld [vmem:[#allocation3 + $0x38] sm:$0xff] }
 0x13c   :  { %626 = vrot.lane.b32.xlu0 %v3298_v41, %s2583_s10  ;;  %674 = vrot.lane.b32.xlu1 %v3321_v59, %s2581_s2 }
 0x140   :  { %744 = vrot.lane.b32.xlu0 %v3321_v59, %s2584_s13  ;;  %628 = vrot.lane.b32.xlu1 %v3321_v59, %s2583_s10 }
 0x144   :  { %651 = vrot.lane.b32.xlu0 %v3321_v59, %s2582_s9  ;;  %740 = vrot.lane.b32.xlu1 %v3345_v0, %s2584_s13 }
 0x148   :  { %761 = vrot.lane.b32.xlu0 %v3321_v59, %s2586_s0  ;;  %723 = vrot.lane.b32.xlu1 %v3345_v0, %s2585_s16 }
 0x14c   :  { %668 = vrot.lane.b32.xlu0 %v3345_v0, %s2581_s2  ;;  %706 = vrot.lane.b32.xlu1 %v3345_v0, %s2587_s17 }
 0x150   :  { %622 = vrot.lane.b32.xlu0 %v3345_v0, %s2583_s10  ;;  %689 = vrot.lane.b32.xlu1 %v3345_v0, %s2588_s18 }
 0x154   :  { %757 = vrot.lane.b32.xlu0 %v3345_v0, %s2586_s0  ;;  %645 = vrot.lane.b32.xlu1 %v3345_v0, %s2582_s9 }
 0x158   :  { %729 = vrot.lane.b32.xlu0 %v3367_v1, %s2585_s16  ;;  %746 = vrot.lane.b32.xlu1 %v3367_v1, %s2584_s13 }
 0x15c   :  { %712 = vrot.lane.b32.xlu0 %v3367_v1, %s2587_s17  ;;  %653 = vrot.lane.b32.xlu1 %v3367_v1, %s2582_s9 }
 0x160   :  { %695 = vrot.lane.b32.xlu0 %v3367_v1, %s2588_s18  ;;  %763 = vrot.lane.b32.xlu1 %v3367_v1, %s2586_s0 }
 0x164   :  { %676 = vrot.lane.b32.xlu0 %v3367_v1, %s2581_s2 }
 0x168   :  { %630 = vrot.lane.b32.xlu0 %v3367_v1, %s2583_s10 }
 0x17a   :  { %v665_v6 = vpop.permute.xlu0 %664  ;;  %v737_v7 = vpop.permute.xlu1 %736 }
 0x17b   :  { %892 = vrot.lane.b32.xlu0 %v737_v7, %s2589_s3  ;;  %v679_v21 = vsel %vm678_vm1, %v2520_v14, %v665_v6 }
 0x17e   :  { %v3392_v8 = vpop.permute.xlu0 %618  ;;  %v720_v9 = vpop.permute.xlu1 %719 }
 0x17f   :  { %876 = vrot.lane.b32.xlu0 %v720_v9, %s2589_s3 }
 0x182   :  { %v3395_v10 = vpop.permute.xlu0 %753  ;;  %v703_v11 = vpop.permute.xlu1 %702 }
 0x183   :  { %860 = vrot.lane.b32.xlu0 %v703_v11, %s2589_s3 }
 0x186   :  { %v3398_v12 = vpop.permute.xlu0 %738  ;;  %v686_v13 = vpop.permute.xlu1 %685 }
 0x187   :  { %844 = vrot.lane.b32.xlu0 %v686_v13, %s2589_s3  ;;  %v749_v28 = vsel %vm748_vm3, %v737_v7, %v3398_v12 }
 0x18a   :  { %v3402_v15 = vpop.permute.xlu0 %721  ;;  %v642_v17 = vpop.permute.xlu1 %641 }
 0x18b   :  { %828 = vrot.lane.b32.xlu0 %v679_v21, %s2589_s3  ;;  %v656_v25 = vsel %vm655_vm2, %v2525_v22, %v642_v17  ;;  %v732_v18 = vsel %vm731_vm4, %v720_v9, %v3402_v15 }
 0x18e   :  { %v3407_v23 = vpop.permute.xlu0 %704  ;;  %v3409_v24 = vpop.permute.xlu1 %666 }
 0x18f   :  { %812 = vrot.lane.b32.xlu0 %v656_v25, %s2589_s3  ;;  %v715_v31 = vsel %vm714_vm5, %v703_v11, %v3407_v23  ;;  %v680_v38 = vsel %vm678_vm1, %v665_v6, %v3409_v24 }
 0x192   :  { %v3413_v26 = vpop.permute.xlu0 %687  ;;  %v3415_v27 = vpop.permute.xlu1 %620 }
 0x193   :  { %894 = vrot.lane.b32.xlu0 %v749_v28, %s2589_s3  ;;  %v698_v34 = vsel %vm697_vm6, %v686_v13, %v3413_v26  ;;  %v634_v45 = vsel %vm632_vm7, %v3392_v8, %v3415_v27 }
 0x196   :  { %v3420_v29 = vpop.permute.xlu0 %643  ;;  %v3422_v16 = vpop.permute.xlu1 %755 }
 0x197   :  { %878 = vrot.lane.b32.xlu0 %v732_v18, %s2589_s3  ;;  %v657_v42 = vsel %vm655_vm2, %v642_v17, %v3420_v29 }
 0x19a   :  { %v743_v19 = vpop.permute.xlu0 %742  ;;  %v3427_v20 = vpop.permute.xlu1 %649 }
 0x19b   :  { %900 = vrot.lane.b32.xlu1 %v743_v19, %s2589_s3  ;;  %862 = vrot.lane.b32.xlu0 %v715_v31, %s2589_s3  ;;  %v659_v60 = vsel %vm655_vm2, %v2524_v57, %v3427_v20 }
 0x19e   :  { %v726_v32 = vpop.permute.xlu0 %725  ;;  %v3433_v33 = vpop.permute.xlu1 %759 }
 0x19f   :  { %846 = vrot.lane.b32.xlu0 %v698_v34, %s2589_s3 }
 0x1a2   :  { %v709_v36 = vpop.permute.xlu0 %708  ;;  %v3438_v37 = vpop.permute.xlu1 %727 }
 0x1a3   :  { %830 = vrot.lane.b32.xlu0 %v680_v38, %s2589_s3  ;;  %v734_v6 = vsel %vm731_vm4, %v726_v32, %v3438_v37 }
 0x1a6   :  { %v692_v39 = vpop.permute.xlu0 %691  ;;  %v3443_v40 = vpop.permute.xlu1 %710 }
 0x1a7   :  { %814 = vrot.lane.b32.xlu0 %v657_v42, %s2589_s3  ;;  %v717_v7 = vsel %vm714_vm5, %v709_v36, %v3443_v40 }
 0x1aa   :  { %v673_v43 = vpop.permute.xlu0 %672  ;;  %v3448_v44 = vpop.permute.xlu1 %693 }
 0x1ab   :  { %798 = vrot.lane.b32.xlu0 %v634_v45, %s2589_s3  ;;  %v682_v56 = vsel %vm678_vm1, %v2519_v53, %v673_v43  ;;  %v700_v13 = vsel %vm697_vm6, %v692_v39, %v3448_v44 }
 0x1ae   :  { %v627_v46 = vpop.permute.xlu0 %626  ;;  %v3454_v47 = vpop.permute.xlu1 %674 }
 0x1af   :  { %884 = vrot.lane.b32.xlu0 %v726_v32, %s2589_s3  ;;  %v636_v2 = vsel %vm632_vm7, %v2529_v62, %v627_v46  ;;  %v683_v21 = vsel %vm678_vm1, %v673_v43, %v3454_v47  ;;  %v2530_v32 = vunpack.i.h.bf16 %v3389_v5 }
 0x1b1   :  { %v633_v34 = vsel %vm632_vm7, %v2530_v32, %v3392_v8 }
 0x1b2   :  { %v745_v48 = vpop.permute.xlu0 %744  ;;  %v3457_v49 = vpop.permute.xlu1 %628 }
 0x1b3   :  { %868 = vrot.lane.b32.xlu0 %v709_v36, %s2589_s3  ;;  %v751_v50 = vsel %vm748_vm3, %v743_v19, %v745_v48  ;;  %v637_v18 = vsel %vm632_vm7, %v627_v46, %v3457_v49 }
 0x1b4   :  { %902 = vrot.lane.b32.xlu1 %v751_v50, %s2589_s3 }
 0x1b6   :  { %v3462_v51 = vpop.permute.xlu0 %651  ;;  %v741_v52 = vpop.permute.xlu1 %740 }
 0x1b7   :  { %852 = vrot.lane.b32.xlu0 %v692_v39, %s2589_s3  ;;  %v750_v14 = vsel %vm748_vm3, %v3398_v12, %v741_v52  ;;  %v660_v25 = vsel %vm655_vm2, %v3427_v20, %v3462_v51 }
 0x1b8   :  { %898 = vrot.lane.b32.xlu1 %v741_v52, %s2589_s3 }
 0x1ba   :  { %v3467_v54 = vpop.permute.xlu0 %761  ;;  %v724_v55 = vpop.permute.xlu1 %723 }
 0x1bb   :  { %836 = vrot.lane.b32.xlu0 %v682_v56, %s2589_s3  ;;  %v733_v22 = vsel %vm731_vm4, %v3402_v15, %v724_v55  ;;  %v768_v52 = vsel %vm765_vm8, %v3433_v33, %v3467_v54 }
 0x1bc   :  { %882 = vrot.lane.b32.xlu1 %v724_v55, %s2589_s3 }
 0x1be   :  { %v707_v58 = vpop.permute.xlu1 %706  ;;  %v669_v61 = vpop.permute.xlu0 %668 }
 0x1bf   :  { %820 = vrot.lane.b32.xlu0 %v659_v60, %s2589_s3  ;;  %v716_v12 = vsel %vm714_vm5, %v3407_v23, %v707_v58  ;;  %v681_v23 = vsel %vm678_vm1, %v3409_v24, %v669_v61 }
 0x1c0   :  { %866 = vrot.lane.b32.xlu1 %v707_v58, %s2589_s3 }
 0x1c2   :  { %v690_v63 = vpop.permute.xlu1 %689  ;;  %v3481_v4 = vpop.permute.xlu0 %622 }
 0x1c3   :  { %804 = vrot.lane.b32.xlu0 %v636_v2, %s2589_s3  ;;  %v699_v15 = vsel %vm697_vm6, %v3413_v26, %v690_v63  ;;  %v635_v5 = vsel %vm632_vm7, %v3415_v27, %v3481_v4  ;;  %v771_v2 = vld [vmem:[%s4871_s4 + $0x8] sm:$0xff] }
 0x1c4   :  { %850 = vrot.lane.b32.xlu1 %v690_v63, %s2589_s3  ;;  %2399 = vmatprep.mubr.msk.f32.mxu1 %vm1033_vm9, %v771_v2 }
 0x1c5   :  { %2397 = vmatprep.mubr.msk.f32.mxu0 %vm1033_vm9, %v771_v2 }
 0x1c6   :  { %v3489_v9 = vpop.permute.xlu0 %757  ;;  %v646_v11 = vpop.permute.xlu1 %645 }
 0x1c7   :  { %886 = vrot.lane.b32.xlu0 %v734_v6, %s2589_s3  ;;  %v658_v26 = vsel %vm655_vm2, %v3420_v29, %v646_v11  ;;  %v767_v38 = vsel %vm765_vm8, %v3422_v16, %v3489_v9 }
 0x1c8   :  { %834 = vrot.lane.b32.xlu1 %v669_v61, %s2589_s3 }
 0x1ca   :  { %v3499_v17 = vpop.permute.xlu0 %729  ;;  %v747_v19 = vpop.permute.xlu1 %746 }
 0x1cb   :  { %870 = vrot.lane.b32.xlu0 %v717_v7, %s2589_s3  ;;  %v752_v31 = vsel %vm748_vm3, %v745_v48, %v747_v19  ;;  %v735_v53 = vsel %vm731_vm4, %v3438_v37, %v3499_v17 }
 0x1cc   :  { %818 = vrot.lane.b32.xlu1 %v646_v11, %s2589_s3 }
 0x1ce   :  { %v3510_v28 = vpop.permute.xlu0 %712  ;;  %v654_v27 = vpop.permute.xlu1 %653 }
 0x1cf   :  { %854 = vrot.lane.b32.xlu0 %v700_v13, %s2589_s3  ;;  %v661_v60 = vsel %vm655_vm2, %v3462_v51, %v654_v27 }
 0x1d0   :  { %896 = vrot.lane.b32.xlu1 %v750_v14, %s2589_s3 }
 0x1d2   :  { %v696_v20 = vpop.permute.xlu0 %695  ;;  %v764_v39 = vpop.permute.xlu1 %763 }
 0x1d3   :  { %838 = vrot.lane.b32.xlu0 %v683_v21, %s2589_s3  ;;  %v769_v42 = vsel %vm765_vm8, %v3467_v54, %v764_v39 }
 0x1d4   :  { %880 = vrot.lane.b32.xlu1 %v733_v22, %s2589_s3 }
 0x1d6   :  { %v677_v36 = vpop.permute.xlu0 %676 }
 0x1d7   :  { %822 = vrot.lane.b32.xlu0 %v660_v25, %s2589_s3  ;;  %v684_v57 = vsel %vm678_vm1, %v3454_v47, %v677_v36 }
 0x1d8   :  { %864 = vrot.lane.b32.xlu1 %v716_v12, %s2589_s3 }
 0x1da   :  { %v631_v24 = vpop.permute.xlu0 %630 }
 0x1db   :  { %806 = vrot.lane.b32.xlu0 %v637_v18, %s2589_s3  ;;  %v638_v62 = vsel %vm632_vm7, %v3457_v49, %v631_v24 }
 0x1dc   :  { %848 = vrot.lane.b32.xlu1 %v699_v15, %s2589_s3 }
 0x1df   :  { %904 = vrot.lane.b32.xlu0 %v752_v31, %s2589_s3 }
 0x1e0   :  { %832 = vrot.lane.b32.xlu1 %v681_v23, %s2589_s3 }
 0x1e3   :  { %796 = vrot.lane.b32.xlu0 %v633_v34, %s2589_s3 }
 0x1e4   :  { %816 = vrot.lane.b32.xlu1 %v658_v26, %s2589_s3 }
 0x1e7   :  { %790 = vrot.lane.b32.xlu0 %v3298_v41, %s2589_s3 }
 0x1e8   :  { %800 = vrot.lane.b32.xlu1 %v635_v5, %s2589_s3 }
 0x1eb   :  { %2532 = vrot.lane.b32.xlu0 %v2579_v3, %s2589_s3 }
 0x1ec   :  { %906 = vrot.lane.b32.xlu1 %v747_v19, %s2589_s3 }
 0x1ed   :  { %v3543_v8 = vpop.permute.xlu0 %892 }
 0x1ef   :  { %782 = vrot.lane.b32.xlu0 %v3260_v30, %s2589_s3 }
 0x1f0   :  { %890 = vrot.lane.b32.xlu1 %v3499_v17, %s2589_s3 }
 0x1f1   :  { %v3549_v41 = vpop.permute.xlu0 %876 }
 0x1f3   :  { %794 = vrot.lane.b32.xlu0 %v3367_v1, %s2589_s3 }
 0x1f4   :  { %874 = vrot.lane.b32.xlu1 %v3510_v28, %s2589_s3 }
 0x1f5   :  { %v3555_v29 = vpop.permute.xlu0 %860 }
 0x1f7   :  { %916 = vrot.lane.b32.xlu0 %v3433_v33, %s2589_s3  ;;  %v701_v33 = vsel %vm697_vm6, %v3448_v44, %v696_v20 }
 0x1f8   :  { %858 = vrot.lane.b32.xlu1 %v696_v20, %s2589_s3 }
 0x1f9   :  { %v3560_v30 = vpop.permute.xlu0 %844 }
 0x1fb   :  { %912 = vrot.lane.b32.xlu0 %v767_v38, %s2589_s3 }
 0x1fc   :  { %842 = vrot.lane.b32.xlu1 %v677_v36, %s2589_s3  ;;  %v3694_v36 = vld [vmem:[#allocation3] sm:$0xff] }
 0x1fd   :  { %v3567_v1 = vpop.permute.xlu0 %828 }
 0x1ff   :  { %920 = vrot.lane.b32.xlu0 %v769_v42, %s2589_s3 }
 0x200   :  { %826 = vrot.lane.b32.xlu1 %v654_v27, %s2589_s3 }
 0x201   :  { %v3573_v43 = vpop.permute.xlu0 %812 }
 0x203   :  { %922 = vrot.lane.b32.xlu0 %v764_v39, %s2589_s3 }
 0x204   :  { %810 = vrot.lane.b32.xlu1 %v631_v24, %s2589_s3 }
 0x205   :  { %v3577_v45 = vpop.permute.xlu0 %894 }
 0x206   :  { %v967_v20 = vsel %vm924_vm10, %v3543_v8, %v3577_v45 }
 0x207   :  { %2542 = vrot.lane.b32.xlu0 %v2579_v3, %s2582_s9 }
 0x208   :  { %792 = vrot.lane.b32.xlu1 %v3321_v59, %s2589_s3 }
 0x209   :  { %v3583_v46 = vpop.permute.xlu0 %878 }
 0x20b   :  { %2552 = vrot.lane.b32.xlu0 %v2579_v3, %s2589_s3 }
 0x20c   :  { %802 = vrot.lane.b32.xlu1 %v3481_v4, %s2589_s3  ;;  %v766_v4 = vsel %vm765_vm8, %v3395_v10, %v3422_v16 }
 0x20d   :  { %v3589_v48 = vpop.permute.xlu0 %862  ;;  %v901_v37 = vpop.permute.xlu1 %900 }
 0x210   :  { %784 = vrot.lane.b32.xlu1 %v3277_v35, %s2589_s3  ;;  %v718_v35 = vsel %vm714_vm5, %v3443_v40, %v3510_v28 }
 0x211   :  { %v3593_v50 = vpop.permute.xlu0 %846 }
 0x214   :  { %918 = vrot.lane.b32.xlu1 %v768_v52, %s2589_s3 }
 0x215   :  { %v3599_v59 = vpop.permute.xlu0 %830 }
 0x218   :  { %888 = vrot.lane.b32.xlu1 %v735_v53, %s2589_s3 }
 0x219   :  { %v3605_v55 = vpop.permute.xlu0 %814 }
 0x21c   :  { %872 = vrot.lane.b32.xlu1 %v718_v35, %s2589_s3 }
 0x21d   :  { %v3611_v56 = vpop.permute.xlu0 %798 }
 0x220   :  { %856 = vrot.lane.b32.xlu1 %v701_v33, %s2589_s3 }
 0x221   :  { %v3616_v54 = vpop.permute.xlu0 %884 }
 0x224   :  { %840 = vrot.lane.b32.xlu1 %v684_v57, %s2589_s3 }
 0x225   :  { %v3621_v58 = vpop.permute.xlu0 %868 }
 0x226   :  { %v903_v40 = vpop.permute.xlu1 %902 }
 0x228   :  { %824 = vrot.lane.b32.xlu1 %v661_v60, %s2589_s3 }
 0x229   :  { %v3626_v61 = vpop.permute.xlu0 %852 }
 0x22a   :  { %v899_v44 = vpop.permute.xlu1 %898 }
 0x22c   :  { %808 = vrot.lane.b32.xlu1 %v638_v62, %s2589_s3 }
 0x22d   :  { %v3631_v63 = vpop.permute.xlu0 %836 }
 0x22e   :  { %v3633_v47 = vpop.permute.xlu1 %882 }
 0x230   :  { %786 = vrot.lane.b32.xlu1 %v3345_v0, %s2589_s3 }
 0x231   :  { %v3641_v51 = vpop.permute.xlu0 %820 }
 0x232   :  { %v3644_v49 = vpop.permute.xlu1 %866 }
 0x234   :  { %910 = vrot.lane.b32.xlu1 %v766_v4, %s2589_s3 }
 0x235   :  { %v3650_v6 = vpop.permute.xlu0 %804 }
 0x236   :  { %v3652_v7 = vpop.permute.xlu1 %850 }
 0x238   :  { %908 = vrot.lane.b32.xlu1 %v3395_v10, %s2589_s3 }
 0x239   :  { %v887_v0 = vpop.permute.xlu0 %886 }
 0x23a   :  { %v3656_v11 = vpop.permute.xlu1 %834  ;;  %v964_v2 = vsel %vm924_vm10, %v3616_v54, %v887_v0 }
 0x23c   :  { %914 = vrot.lane.b32.xlu1 %v3489_v9, %s2589_s3 }
 0x23d   :  { %v3660_v13 = vpop.permute.xlu0 %870 }
 0x23e   :  { %v3662_v14 = vpop.permute.xlu1 %818 }
 0x240   :  { %2537 = vrot.lane.b32.xlu1 %v2579_v3, %s2581_s2 }
 0x241   :  { %v3666_v16 = vpop.permute.xlu0 %854 }
 0x242   :  { %v897_v17 = vpop.permute.xlu1 %896 }
 0x243   :  { %v968_v15 = vsel %vm924_vm10, %v3577_v45, %v897_v17  ;;  %v969_v26 = vsel %vm924_vm10, %v897_v17, %v899_v44 }
 0x244   :  { %2547 = vrot.lane.b32.xlu1 %v2579_v3, %s2583_s10  ;;  %v970_v3 = vsel %vm924_vm10, %v901_v37, %v903_v40 }
 0x245   :  { %v3670_v10 = vpop.permute.xlu0 %838 }
 0x246   :  { %v881_v21 = vpop.permute.xlu1 %880 }
 0x247   :  { %v962_v4 = vsel %vm924_vm10, %v3583_v46, %v881_v21  ;;  %v963_v17 = vsel %vm924_vm10, %v881_v21, %v3633_v47  ;;  %v958_v47 = vsel %vm924_vm10, %v3621_v58, %v3660_v13  ;;  %v955_v58 = vsel %vm924_vm10, %v3555_v29, %v3589_v48 }
 0x249   :  { %v3672_v22 = vpop.permute.xlu0 %822 }
 0x24a   :  { %v3674_v25 = vpop.permute.xlu1 %864 }
 0x24d   :  { %v3676_v9 = vpop.permute.xlu0 %806 }
 0x24e   :  { %v3678_v28 = vpop.permute.xlu1 %848 }
 0x24f   :  { %v950_v29 = vsel %vm924_vm10, %v3593_v50, %v3678_v28 }
 0x251   :  { %v905_v12 = vpop.permute.xlu0 %904 }
 0x252   :  { %v3680_v18 = vpop.permute.xlu1 %832  ;;  %v971_v19 = vsel %vm924_vm10, %v903_v40, %v905_v12 }
 0x253   :  { %1040 = vmatprep.subr.mxu0 %v971_v19  ;;  %v961_v19 = vsel %vm924_vm10, %v3549_v41, %v3583_v46  ;;  %v956_v41 = vsel %vm924_vm10, %v3589_v48, %v3674_v25  ;;  %v957_v46 = vsel %vm924_vm10, %v3674_v25, %v3644_v49  ;;  %v952_v49 = vsel %vm924_vm10, %v3626_v61, %v3666_v16 }
 0x254   :  { %1041 = vmatpush1.msra.mxu0 %v970_v3  ;;  %v951_v48 = vsel %vm924_vm10, %v3678_v28, %v3652_v7  ;;  %v946_v7 = vsel %vm924_vm10, %v3631_v63, %v3670_v10 }
 0x255   :  { %1042 = vmatprep.subr.mxu0 %v968_v15  ;;  %v3701_v39 = vpop.permute.xlu0 %796 }
 0x256   :  { %1043 = vmatpush1.msra.mxu0 %v967_v20  ;;  %v3689_v31 = vpop.permute.xlu1 %816  ;;  %v949_v20 = vsel %vm924_vm10, %v3560_v30, %v3593_v50  ;;  %v944_v30 = vsel %vm924_vm10, %v3599_v59, %v3680_v18  ;;  %v945_v50 = vsel %vm924_vm10, %v3680_v18, %v3656_v11  ;;  %v940_v11 = vsel %vm924_vm10, %v3641_v51, %v3672_v22 }
 0x259   :  { %v3705_v45 = vpop.permute.xlu0 %790 }
 0x25a   :  { %v3691_v23 = vpop.permute.xlu1 %800 }
 0x25d   :  { %v3711_v35 = vpop.permute.xlu0 %2532 }
 0x25e   :  { %v907_v32 = vpop.permute.xlu1 %906 }
 0x25f   :  { %v972_v34 = vsel %vm924_vm10, %v905_v12, %v907_v32 }
 0x260   :  { %1118 = vmatpush1.msra.mxu1 %v972_v34  ;;  %v943_v34 = vsel %vm924_vm10, %v3567_v1, %v3599_v59  ;;  %v938_v1 = vsel %vm924_vm10, %v3605_v55, %v3689_v31  ;;  %v939_v59 = vsel %vm924_vm10, %v3689_v31, %v3662_v14  ;;  %v934_v14 = vsel %vm924_vm10, %v3650_v6, %v3676_v9 }
 0x261   :  { %1119 = vmatprep.subr.mxu1 %v3694_v36  ;;  %v3715_v37 = vpop.permute.xlu0 %782  ;;  %v931_v31 = vsel %vm924_vm10, %v3701_v39, %v3611_v56 }
 0x262   :  { %1120 = vmatpush1.msra.mxu1 %v969_v26  ;;  %v891_v5 = vpop.permute.xlu1 %890 }
 0x263   :  { %1121 = vmatprep.subr.mxu1 %v3694_v36 }
 0x265   :  { %v3721_v62 = vpop.permute.xlu0 %794 }
 0x266   :  { %v875_v24 = vpop.permute.xlu1 %874 }
 0x269   :  { %v3747_v21 = vpop.permute.xlu0 %916 }
 0x26a   :  { %v859_v8 = vpop.permute.xlu1 %858 }
 0x26d   :  { %v3773_v32 = vpop.permute.xlu0 %912 }
 0x26e   :  { %v843_v27 = vpop.permute.xlu1 %842 }
 0x271   :  { %v921_v18 = vpop.permute.xlu0 %920 }
 0x272   :  { %v3699_v38 = vpop.permute.xlu1 %826 }
 0x276   :  { %v3703_v42 = vpop.permute.xlu1 %810 }
 0x27a   :  { %v3707_v52 = vpop.permute.xlu1 %792 }
 0x27e   :  { %v3709_v53 = vpop.permute.xlu1 %802 }
 0x282   :  { %v3713_v33 = vpop.permute.xlu1 %784 }
 0x283   :  { %v926_v39 = vsel %vm924_vm10, %v3715_v37, %v3713_v33 }
 0x286   :  { %v3717_v57 = vpop.permute.xlu1 %918 }
 0x28a   :  { %v889_v40 = vpop.permute.xlu1 %888 }
 0x28b   :  { %v965_v60 = vsel %vm924_vm10, %v887_v0, %v889_v40  ;;  %v966_v44 = vsel %vm924_vm10, %v889_v40, %v891_v5  ;;  %v937_v5 = vsel %vm924_vm10, %v3573_v43, %v3605_v55  ;;  %v933_v43 = vsel %vm924_vm10, %v3691_v23, %v3709_v53 }
 0x28c   :  { %1044 = vmatprep.subr.mxu0 %v965_v60  ;;  %1122 = vmatpush1.msra.mxu1 %v966_v44  ;;  %v932_v55 = vsel %vm924_vm10, %v3611_v56, %v3691_v23  ;;  %v930_v23 = vsel %vm924_vm10, %v3707_v52, %v3721_v62  ;;  %v770_v60 = vld [vmem:[%s4871_s4] sm:$0xff] }
 0x28d   :  { %1045 = vmatpush1.msra.mxu0 %v964_v2  ;;  %1123 = vmatprep.subr.mxu1 %v3694_v36  ;;  %v772_v2 = vld [vmem:[%s4871_s4 + $0x10] sm:$0xff] }
 0x28e   :  { %1046 = vmatprep.subr.mxu0 %v962_v4  ;;  %1124 = vmatpush1.msra.mxu1 %v963_v17  ;;  %v873_v12 = vpop.permute.xlu1 %872  ;;  %v776_v4 = vld [vmem:[%s4872_s5 + $0x10] sm:$0xff] }
 0x28f   :  { %1047 = vmatpush1.msra.mxu0 %v961_v19  ;;  %1125 = vmatprep.subr.mxu1 %v3694_v36  ;;  %v959_v54 = vsel %vm924_vm10, %v3660_v13, %v873_v12  ;;  %v960_v0 = vsel %vm924_vm10, %v873_v12, %v875_v24  ;;  %v2534_v24 = vunpack.i.l.bf16 %v3711_v35 }
 0x290   :  { %1048 = vmatprep.subr.mxu0 %v959_v54  ;;  %1126 = vmatpush1.msra.mxu1 %v960_v0  ;;  %v779_v54 = vld [vmem:[%s4872_s5 + $0x28] sm:$0xff] }
 0x291   :  { %1049 = vmatpush1.msra.mxu0 %v958_v47  ;;  %1127 = vmatprep.subr.mxu1 %v3694_v36  ;;  %v928_v56 = vsel %vm924_vm10, %v2534_v24, %v3705_v45 }
 0x292   :  { %1050 = vmatprep.subr.mxu0 %v956_v41  ;;  %1128 = vmatpush1.msra.mxu1 %v957_v46  ;;  %v857_v3 = vpop.permute.xlu1 %856 }
 0x293   :  { %1051 = vmatpush1.msra.mxu0 %v955_v58  ;;  %1129 = vmatprep.subr.mxu1 %v3694_v36  ;;  %v953_v13 = vsel %vm924_vm10, %v3666_v16, %v857_v3  ;;  %v954_v15 = vsel %vm924_vm10, %v857_v3, %v859_v8  ;;  %v2535_v8 = vunpack.i.h.bf16 %v3711_v35  ;;  %v976_v35 = vsel %vm924_vm10, %v3747_v21, %v3717_v57  ;;  %v774_v58 = vld [vmem:[%s4872_s5] sm:$0xff] }
 0x294   :  { %1052 = vmatprep.subr.mxu0 %v953_v13  ;;  %1130 = vmatpush1.msra.mxu1 %v954_v15 }
 0x295   :  { %1053 = vmatpush1.msra.mxu0 %v952_v49  ;;  %1131 = vmatprep.subr.mxu1 %v3694_v36 }
 0x296   :  { %1054 = vmatprep.subr.mxu0 %v950_v29  ;;  %1132 = vmatpush1.msra.mxu1 %v951_v48  ;;  %v841_v25 = vpop.permute.xlu1 %840  ;;  %v775_v29 = vld [vmem:[%s4872_s5 + $0x8] sm:$0xff] }
 0x297   :  { %1055 = vmatpush1.msra.mxu0 %v949_v20  ;;  %1133 = vmatprep.subr.mxu1 %v3694_v36  ;;  %v947_v61 = vsel %vm924_vm10, %v3670_v10, %v841_v25  ;;  %v948_v16 = vsel %vm924_vm10, %v841_v25, %v843_v27  ;;  %v923_v27 = vpop.permute.xlu0 %922 }
 0x298   :  { %1056 = vmatprep.subr.mxu0 %v947_v61  ;;  %1134 = vmatpush1.msra.mxu1 %v948_v16  ;;  %v978_v53 = vsel %vm924_vm10, %v921_v18, %v923_v27  ;;  %v777_v16 = vld [vmem:[%s4872_s5 + $0x18] sm:$0xff] }
 0x299   :  { %1057 = vmatpush1.msra.mxu0 %v946_v7  ;;  %1135 = vmatprep.subr.mxu1 %v3694_v36 }
 0x29a   :  { %1058 = vmatprep.subr.mxu0 %v944_v30  ;;  %1136 = vmatpush1.msra.mxu1 %v945_v50  ;;  %v825_v28 = vpop.permute.xlu1 %824  ;;  %v778_v50 = vld [vmem:[%s4872_s5 + $0x20] sm:$0xff] }
 0x29b   :  { %1059 = vmatpush1.msra.mxu0 %v943_v34  ;;  %1137 = vmatprep.subr.mxu1 %v3694_v36  ;;  %v941_v63 = vsel %vm924_vm10, %v3672_v22, %v825_v28  ;;  %v942_v10 = vsel %vm924_vm10, %v825_v28, %v3699_v38 }
 0x29c   :  { %1060 = vmatprep.subr.mxu0 %v941_v63  ;;  %1138 = vmatpush1.msra.mxu1 %v942_v10  ;;  %v3940_v10 = vpop.permute.xlu0 %2542 }
 0x29d   :  { %1061 = vmatpush1.msra.mxu0 %v940_v11  ;;  %1139 = vmatprep.subr.mxu1 %v3694_v36 }
 0x29e   :  { %1062 = vmatprep.subr.mxu0 %v938_v1  ;;  %1140 = vmatpush1.msra.mxu1 %v939_v59  ;;  %v809_v26 = vpop.permute.xlu1 %808 }
 0x29f   :  { %1063 = vmatpush1.msra.mxu0 %v937_v5  ;;  %1141 = vmatprep.subr.mxu1 %v3694_v36  ;;  %v935_v51 = vsel %vm924_vm10, %v3676_v9, %v809_v26  ;;  %v936_v22 = vsel %vm924_vm10, %v809_v26, %v3703_v42  ;;  %v929_v9 = vsel %vm924_vm10, %v3705_v45, %v3707_v52 }
 0x2a0   :  { %1064 = vmatprep.subr.mxu0 %v935_v51  ;;  %1142 = vmatpush1.msra.mxu1 %v936_v22  ;;  %v925_v52 = vsel %vm924_vm10, %v2535_v8, %v3715_v37  ;;  %v977_v45 = vsel %vm924_vm10, %v3717_v57, %v921_v18  ;;  %v773_v57 = vld [vmem:[%s4871_s4 + $0x18] sm:$0xff]  ;;  %v3946_v1 = vpop.permute.xlu0 %2552 }
 0x2a1   :  { %1065 = vmatpush1.msra.mxu0 %v934_v14  ;;  %1143 = vmatprep.subr.mxu1 %v3694_v36 }
 0x2a2   :  { %1066 = vmatprep.subr.mxu0 %v932_v55  ;;  %1144 = vmatpush1.msra.mxu1 %v933_v43  ;;  %v787_v6 = vpop.permute.xlu1 %786 }
 0x2a3   :  { %1067 = vmatpush1.msra.mxu0 %v931_v31  ;;  %1145 = vmatprep.subr.mxu1 %v3694_v36  ;;  %v927_v38 = vsel %vm924_vm10, %v3713_v33, %v787_v6 }
 0x2a4   :  { %1068 = vmatprep.subr.mxu0 %v929_v9  ;;  %1146 = vmatpush1.msra.mxu1 %v930_v23 }
 0x2a5   :  { %1069 = vmatpush1.msra.mxu0 %v928_v56  ;;  %1147 = vmatprep.subr.mxu1 %v3694_v36 }
 0x2a6   :  { %1070 = vmatprep.subr.mxu0 %v926_v39  ;;  %1148 = vmatpush1.msra.mxu1 %v927_v38  ;;  %v911_v42 = vpop.permute.xlu1 %910 }
 0x2a7   :  { %1071 = vmatpush1.msra.mxu0 %v925_v52  ;;  %1177 = vmatprep.subr.mxu1 %v3694_v36  ;;  %v974_v33 = vsel %vm924_vm10, %v911_v42, %v3773_v32 }
 0x2a8   :  { %1100 = vmatprep.subr.mxu0 %v977_v45  ;;  %1178 = vmatpush2.msra.mxu1 %v978_v53 }
 0x2a9   :  { %1101 = vmatpush2.msra.mxu0 %v976_v35  ;;  %1179 = vmatprep.subr.mxu1 %v3694_v36 }
 0x2aa   :  { %1102 = vmatprep.subr.mxu0 %v974_v33  ;;  %v909_v37 = vpop.permute.xlu1 %908 }
 0x2ab   :  { %v973_v40 = vsel %vm924_vm10, %v909_v37, %v911_v42 }
 0x2ac   :  { %1103 = vmatpush2.msra.mxu0 %v973_v40  ;;  %v2545_v40 = vunpack.i.h.bf16 %v3940_v10 }
 0x2ad   :  { %1105 = vmatmul.mubr.f32.vlgmr.msra.gmra.mxu0 %v770_v60 }
 0x2ae   :  { %v915_v44 = vpop.permute.xlu1 %914  ;;  %2398 = vmatprep.mubr.msk.f32.mxu0 %vm1033_vm9, %v773_v57 }
 0x2af   :  { %v975_v62 = vsel %vm924_vm10, %v3773_v32, %v915_v44 }
 0x2b0   :  { %1180 = vmatpush2.msra.mxu1 %v975_v62 }
 0x2b1   :  { %1182 = vmatmul.mubr.f32.vlgmr.msra.gmra.mxu1 %v770_v60  ;;  %1111 = vmatmul.mubr.f32.gmra.mxu0 %v772_v2 }
 0x2b2   :  { %2400 = vmatprep.mubr.msk.f32.mxu1 %vm1033_vm9, %v773_v57  ;;  %1713 = vmatprep.subr.mxu1 %v3694_v36  ;;  %v3942_v11 = vpop.permute.xlu1 %2537 }
 0x2b3   :  { %v2540_v45 = vunpack.i.h.bf16 %v3942_v11 }
 0x2b5   :  { %1187 = vmatmul.mubr.f32.gmra.mxu1 %v772_v2 }
 0x2b6   :  { %v3948_v59 = vpop.permute.xlu1 %2547 }
 0x2b7   :  { %v2550_v62 = vunpack.i.h.bf16 %v3948_v59 }
 0x36d   :  { %v1106_v13 = vpop.f32.mrf.mxu0 }
 0x36e   :  { %v1107_v15 = vadd.f32 %v1106_v13, %v774_v58 }
 0x36f   :  { %v1108_v48 = vpop.f32.mrf.mxu0 }
 0x370   :  { %v1192_v49 = vmax.f32 %v1107_v15, 0.0  ;;  %v1109_v25 = vadd.f32 %v1108_v48, %v775_v29 }
 0x371   :  { %v1183_v17 = vpop.f32.mrf.mxu1  ;;  %v1112_v32 = vpop.f32.mrf.mxu0 }
 0x372   :  { %v1184_v12 = vadd.f32 %v1183_v17, %v776_v4  ;;  %v1193_v20 = vmax.f32 %v1109_v25, 0.0  ;;  %v1113_v7 = vadd.f32 %v1112_v32, %v777_v16 }
 0x373   :  { %v1185_v19 = vpop.f32.mrf.mxu1  ;;  %v1114_v28 = vpop.f32.mrf.mxu0 }
 0x374   :  { %v1194_v0 = vmax.f32 %v1184_v12, 0.0  ;;  %v1195_v30 = vmax.f32 %v1113_v7, 0.0  ;;  %v1115_v34 = vadd.f32 %v1114_v28, %v778_v50 }
 0x375   :  { %v1188_v47 = vpop.f32.mrf.mxu1 }
 0x376   :  { %1200 = vst.msk [vmem:[#allocation3 + $0x18] sm:$0xff] %vm595_vm0, %v1194_v0  ;;  %v1189_v41 = vadd.f32 %v1188_v47, %v779_v54  ;;  %v1196_v63 = vmax.f32 %v1115_v34, 0.0 }
 0x377   :  { %v1190_v46 = vpop.f32.mrf.mxu1 }
 0x378   :  { %v1197_v21 = vmax.f32 %v1189_v41, 0.0 }
 0x37a   :  { %1203 = vst.msk [vmem:[#allocation3 + $0x38] sm:$0xff] %vm595_vm0, %v1197_v21 }
 0x37d   :  { %v1207_v3 = vld [vmem:[#allocation3 + $0x18] sm:$0xff] }
 0x37e   :  { %1270 = vrot.lane.b32.xlu0 %v1207_v3, %s2581_s2  ;;  %1338 = vrot.lane.b32.xlu1 %v1207_v3, %s2584_s13 }
 0x381   :  { %v1211_v61 = vld [vmem:[#allocation3 + $0x38] sm:$0xff] }
 0x382   :  { %1226 = vrot.lane.b32.xlu0 %v1207_v3, %s2583_s10  ;;  %1322 = vrot.lane.b32.xlu1 %v1207_v3, %s2585_s16 }
 0x386   :  { %1354 = vrot.lane.b32.xlu0 %v1207_v3, %s2586_s0  ;;  %1306 = vrot.lane.b32.xlu1 %v1207_v3, %s2587_s17 }
 0x38a   :  { %1266 = vrot.lane.b32.xlu0 %v1192_v49, %s2581_s2  ;;  %1290 = vrot.lane.b32.xlu1 %v1207_v3, %s2588_s18 }
 0x38e   :  { %1222 = vrot.lane.b32.xlu0 %v1192_v49, %s2583_s10  ;;  %1248 = vrot.lane.b32.xlu1 %v1207_v3, %s2582_s9 }
 0x392   :  { %1350 = vrot.lane.b32.xlu0 %v1192_v49, %s2586_s0  ;;  %1384 = vrot.lane.b32.xlu1 %v1207_v3, %s2589_s3 }
 0x396   :  { %1380 = vrot.lane.b32.xlu0 %v1192_v49, %s2589_s3  ;;  %1334 = vrot.lane.b32.xlu1 %v1192_v49, %s2584_s13 }
 0x39a   :  { %1336 = vrot.lane.b32.xlu0 %v1193_v20, %s2584_s13  ;;  %1318 = vrot.lane.b32.xlu1 %v1192_v49, %s2585_s16 }
 0x39e   :  { %1320 = vrot.lane.b32.xlu0 %v1193_v20, %s2585_s16  ;;  %1302 = vrot.lane.b32.xlu1 %v1192_v49, %s2587_s17 }
 0x3a2   :  { %1304 = vrot.lane.b32.xlu0 %v1193_v20, %s2587_s17  ;;  %1286 = vrot.lane.b32.xlu1 %v1192_v49, %s2588_s18 }
 0x3a6   :  { %1288 = vrot.lane.b32.xlu0 %v1193_v20, %s2588_s18  ;;  %1244 = vrot.lane.b32.xlu1 %v1192_v49, %s2582_s9 }
 0x3aa   :  { %1246 = vrot.lane.b32.xlu0 %v1193_v20, %s2582_s9  ;;  %1268 = vrot.lane.b32.xlu1 %v1193_v20, %s2581_s2 }
 0x3ae   :  { %1344 = vrot.lane.b32.xlu0 %v1211_v61, %s2584_s13  ;;  %1224 = vrot.lane.b32.xlu1 %v1193_v20, %s2583_s10 }
 0x3b2   :  { %1328 = vrot.lane.b32.xlu0 %v1211_v61, %s2585_s16  ;;  %1352 = vrot.lane.b32.xlu1 %v1193_v20, %s2586_s0 }
 0x3b6   :  { %1312 = vrot.lane.b32.xlu0 %v1211_v61, %s2587_s17  ;;  %1382 = vrot.lane.b32.xlu1 %v1193_v20, %s2589_s3 }
 0x3ba   :  { %1296 = vrot.lane.b32.xlu0 %v1211_v61, %s2588_s18  ;;  %1256 = vrot.lane.b32.xlu1 %v1211_v61, %s2582_s9 }
 0x3be   :  { %1278 = vrot.lane.b32.xlu0 %v1211_v61, %s2581_s2  ;;  %1360 = vrot.lane.b32.xlu1 %v1211_v61, %s2586_s0 }
 0x3c2   :  { %1234 = vrot.lane.b32.xlu0 %v1211_v61, %s2583_s10  ;;  %1252 = vrot.lane.b32.xlu1 %v1195_v30, %s2582_s9 }
 0x3c6   :  { %1392 = vrot.lane.b32.xlu0 %v1211_v61, %s2589_s3  ;;  %1356 = vrot.lane.b32.xlu1 %v1195_v30, %s2586_s0 }
 0x3ca   :  { %1340 = vrot.lane.b32.xlu0 %v1195_v30, %s2584_s13  ;;  %1342 = vrot.lane.b32.xlu1 %v1196_v63, %s2584_s13 }
 0x3ce   :  { %1324 = vrot.lane.b32.xlu0 %v1195_v30, %s2585_s16  ;;  %1326 = vrot.lane.b32.xlu1 %v1196_v63, %s2585_s16 }
 0x3d2   :  { %1308 = vrot.lane.b32.xlu0 %v1195_v30, %s2587_s17  ;;  %1310 = vrot.lane.b32.xlu1 %v1196_v63, %s2587_s17 }
 0x3d6   :  { %1292 = vrot.lane.b32.xlu0 %v1195_v30, %s2588_s18  ;;  %1294 = vrot.lane.b32.xlu1 %v1196_v63, %s2588_s18 }
 0x3da   :  { %1274 = vrot.lane.b32.xlu0 %v1195_v30, %s2581_s2  ;;  %1276 = vrot.lane.b32.xlu1 %v1196_v63, %s2581_s2 }
 0x3de   :  { %1230 = vrot.lane.b32.xlu0 %v1195_v30, %s2583_s10  ;;  %1232 = vrot.lane.b32.xlu1 %v1196_v63, %s2583_s10 }
 0x3e2   :  { %1388 = vrot.lane.b32.xlu0 %v1195_v30, %s2589_s3  ;;  %1390 = vrot.lane.b32.xlu1 %v1196_v63, %s2589_s3 }
 0x3e6   :  { %1254 = vrot.lane.b32.xlu0 %v1196_v63, %s2582_s9 }
 0x3ea   :  { %1358 = vrot.lane.b32.xlu0 %v1196_v63, %s2586_s0 }
 0x3f0   :  { %v3950_v18 = vpop.permute.xlu0 %1270  ;;  %v1339_v26 = vpop.permute.xlu1 %1338 }
 0x3f1   :  { %1496 = vrot.lane.b32.xlu1 %v1339_v26, %s2589_s3 }
 0x3f4   :  { %v3953_v5 = vpop.permute.xlu0 %1226  ;;  %v1323_v51 = vpop.permute.xlu1 %1322 }
 0x3f5   :  { %1480 = vrot.lane.b32.xlu1 %v1323_v51, %s2589_s3 }
 0x3f8   :  { %v3956_v22 = vpop.permute.xlu0 %1354  ;;  %v1307_v24 = vpop.permute.xlu1 %1306 }
 0x3f9   :  { %1464 = vrot.lane.b32.xlu1 %v1307_v24, %s2589_s3 }
 0x3fc   :  { %v3959_v14 = vpop.permute.xlu0 %1266  ;;  %v3961_v43 = vpop.permute.xlu1 %1290 }
 0x3fd   :  { %1448 = vrot.lane.b32.xlu1 %v3961_v43, %s2589_s3  ;;  %v1280_v37 = vsel %vm678_vm1, %v2540_v45, %v3959_v14 }
 0x400   :  { %v3965_v55 = vpop.permute.xlu0 %1222  ;;  %v3967_v31 = vpop.permute.xlu1 %1248 }
 0x401   :  { %1432 = vrot.lane.b32.xlu1 %v3950_v18, %s2589_s3  ;;  %v1236_v17 = vsel %vm632_vm7, %v2550_v62, %v3965_v55 }
 0x404   :  { %v3971_v8 = vpop.permute.xlu0 %1350  ;;  %v3973_v6 = vpop.permute.xlu1 %1384 }
 0x405   :  { %1416 = vrot.lane.b32.xlu1 %v3967_v31, %s2589_s3 }
 0x408   :  { %v3977_v9 = vpop.permute.xlu0 %1380  ;;  %v1335_v23 = vpop.permute.xlu1 %1334 }
 0x409   :  { %1400 = vrot.lane.b32.xlu1 %v3953_v5, %s2589_s3  ;;  %1490 = vrot.lane.b32.xlu0 %v1335_v23, %s2589_s3 }
 0x40c   :  { %v1337_v27 = vpop.permute.xlu0 %1336  ;;  %v1319_v56 = vpop.permute.xlu1 %1318 }
 0x40d   :  { %1474 = vrot.lane.b32.xlu0 %v1319_v56, %s2589_s3  ;;  %v1347_v38 = vsel %vm748_vm3, %v1337_v27, %v1339_v26  ;;  %v1346_v0 = vsel %vm748_vm3, %v1335_v23, %v1337_v27 }
 0x40e   :  { %1494 = vrot.lane.b32.xlu1 %v1347_v38, %s2589_s3 }
 0x410   :  { %v1321_v39 = vpop.permute.xlu0 %1320  ;;  %v1303_v42 = vpop.permute.xlu1 %1302 }
 0x411   :  { %1458 = vrot.lane.b32.xlu0 %v1303_v42, %s2589_s3  ;;  %v1331_v54 = vsel %vm731_vm4, %v1321_v39, %v1323_v51  ;;  %v1330_v46 = vsel %vm731_vm4, %v1319_v56, %v1321_v39  ;;  %v2544_v56 = vunpack.i.l.bf16 %v3940_v10 }
 0x414   :  { %v1305_v52 = vpop.permute.xlu0 %1304  ;;  %v1287_v53 = vpop.permute.xlu1 %1286 }
 0x415   :  { %1442 = vrot.lane.b32.xlu0 %v1287_v53, %s2589_s3  ;;  %v1315_v58 = vsel %vm714_vm5, %v1305_v52, %v1307_v24  ;;  %v1314_v13 = vsel %vm714_vm5, %v1303_v42, %v1305_v52 }
 0x418   :  { %v1289_v35 = vpop.permute.xlu0 %1288  ;;  %v1245_v33 = vpop.permute.xlu1 %1244 }
 0x419   :  { %1426 = vrot.lane.b32.xlu0 %v1280_v37, %s2589_s3  ;;  %v1258_v44 = vsel %vm655_vm2, %v2545_v40, %v1245_v33  ;;  %v1298_v29 = vsel %vm697_vm6, %v1287_v53, %v1289_v35  ;;  %v1299_v20 = vsel %vm697_vm6, %v1289_v35, %v3961_v43 }
 0x41c   :  { %v1247_v60 = vpop.permute.xlu0 %1246  ;;  %v1269_v57 = vpop.permute.xlu1 %1268 }
 0x41d   :  { %1410 = vrot.lane.b32.xlu0 %v1258_v44, %s2589_s3  ;;  %v1281_v61 = vsel %vm678_vm1, %v3959_v14, %v1269_v57  ;;  %v1259_v7 = vsel %vm655_vm2, %v1245_v33, %v1247_v60  ;;  %v1282_v50 = vsel %vm678_vm1, %v1269_v57, %v3950_v18  ;;  %v1260_v24 = vsel %vm655_vm2, %v1247_v60, %v3967_v31 }
 0x41e   :  { %v2539_v31 = vunpack.i.l.bf16 %v3942_v11  ;;  %v2549_v11 = vunpack.i.l.bf16 %v3948_v59 }
 0x420   :  { %v3995_v2 = vpop.permute.xlu0 %1344  ;;  %v1225_v4 = vpop.permute.xlu1 %1224 }
 0x421   :  { %1504 = vrot.lane.b32.xlu1 %v3995_v2, %s2589_s3  ;;  %1394 = vrot.lane.b32.xlu0 %v1236_v17, %s2589_s3  ;;  %v1237_v28 = vsel %vm632_vm7, %v3965_v55, %v1225_v4  ;;  %v1238_v43 = vsel %vm632_vm7, %v1225_v4, %v3953_v5 }
 0x424   :  { %v4002_v12 = vpop.permute.xlu0 %1328  ;;  %v4004_v19 = vpop.permute.xlu1 %1352 }
 0x425   :  { %1478 = vrot.lane.b32.xlu1 %v1331_v54, %s2589_s3  ;;  %1492 = vrot.lane.b32.xlu0 %v1346_v0, %s2589_s3 }
 0x428   :  { %v4010_v47 = vpop.permute.xlu0 %1312  ;;  %v4012_v41 = vpop.permute.xlu1 %1382 }
 0x429   :  { %1488 = vrot.lane.b32.xlu1 %v4002_v12, %s2589_s3  ;;  %1476 = vrot.lane.b32.xlu0 %v1330_v46, %s2589_s3  ;;  %v1362_v46 = vsel %vm765_vm8, %v3971_v8, %v4004_v19 }
 0x42c   :  { %v4018_v21 = vpop.permute.xlu0 %1296  ;;  %v4020_v3 = vpop.permute.xlu1 %1256 }
 0x42d   :  { %1462 = vrot.lane.b32.xlu1 %v1315_v58, %s2589_s3  ;;  %1460 = vrot.lane.b32.xlu0 %v1314_v13, %s2589_s3  ;;  %v2402_v58 = vld [vmem:[%s4871_s4 + $0x28] sm:$0xff] }
 0x42e   :  { %2413 = vmatprep.mubr.msk.f32.mxu1 %vm1033_vm9, %v2402_v58  ;;  %2411 = vmatprep.mubr.msk.f32.mxu0 %vm1033_vm9, %v2402_v58 }
 0x430   :  { %v4026_v15 = vpop.permute.xlu0 %1278  ;;  %v4028_v49 = vpop.permute.xlu1 %1360 }
 0x431   :  { %1472 = vrot.lane.b32.xlu1 %v4010_v47, %s2589_s3  ;;  %1444 = vrot.lane.b32.xlu0 %v1298_v29, %s2589_s3  ;;  %v1363_v29 = vsel %vm765_vm8, %v4004_v19, %v3956_v22 }
 0x434   :  { %v4034_v48 = vpop.permute.xlu0 %1234  ;;  %v4036_v25 = vpop.permute.xlu1 %1252 }
 0x435   :  { %1446 = vrot.lane.b32.xlu1 %v1299_v20, %s2589_s3  ;;  %1428 = vrot.lane.b32.xlu0 %v1281_v61, %s2589_s3  ;;  %v1261_v5 = vsel %vm655_vm2, %v2544_v56, %v4036_v25 }
 0x438   :  { %v4044_v16 = vpop.permute.xlu0 %1392  ;;  %v4046_v32 = vpop.permute.xlu1 %1356 }
 0x439   :  { %1456 = vrot.lane.b32.xlu1 %v4018_v21, %s2589_s3  ;;  %1412 = vrot.lane.b32.xlu0 %v1259_v7, %s2589_s3 }
 0x43c   :  { %v1341_v30 = vpop.permute.xlu0 %1340  ;;  %v1343_v34 = vpop.permute.xlu1 %1342 }
 0x43d   :  { %1430 = vrot.lane.b32.xlu1 %v1282_v50, %s2589_s3  ;;  %1396 = vrot.lane.b32.xlu0 %v1237_v28, %s2589_s3  ;;  %v1348_v42 = vsel %vm748_vm3, %v1341_v30, %v1343_v34  ;;  %v1349_v45 = vsel %vm748_vm3, %v1343_v34, %v3995_v2 }
 0x440   :  { %v1325_v63 = vpop.permute.xlu0 %1324  ;;  %v1327_v26 = vpop.permute.xlu1 %1326 }
 0x441   :  { %1440 = vrot.lane.b32.xlu1 %v4026_v15, %s2589_s3  ;;  %1482 = vrot.lane.b32.xlu0 %v1325_v63, %s2589_s3  ;;  %v1333_v53 = vsel %vm731_vm4, %v1327_v26, %v4002_v12  ;;  %v1332_v35 = vsel %vm731_vm4, %v1325_v63, %v1327_v26 }
 0x444   :  { %v1309_v51 = vpop.permute.xlu0 %1308  ;;  %v1311_v14 = vpop.permute.xlu1 %1310 }
 0x445   :  { %1414 = vrot.lane.b32.xlu1 %v1260_v24, %s2589_s3  ;;  %1466 = vrot.lane.b32.xlu0 %v1309_v51, %s2589_s3  ;;  %v1317_v59 = vsel %vm714_vm5, %v1311_v14, %v4010_v47  ;;  %v1316_v60 = vsel %vm714_vm5, %v1309_v51, %v1311_v14 }
 0x448   :  { %v1293_v18 = vpop.permute.xlu0 %1292  ;;  %v1295_v23 = vpop.permute.xlu1 %1294 }
 0x449   :  { %1424 = vrot.lane.b32.xlu1 %v4020_v3, %s2589_s3  ;;  %1450 = vrot.lane.b32.xlu0 %v1293_v18, %s2589_s3  ;;  %v1301_v40 = vsel %vm697_vm6, %v1295_v23, %v4018_v21  ;;  %v1300_v62 = vsel %vm697_vm6, %v1293_v18, %v1295_v23 }
 0x44c   :  { %v1275_v55 = vpop.permute.xlu0 %1274  ;;  %v1277_v38 = vpop.permute.xlu1 %1276 }
 0x44d   :  { %1398 = vrot.lane.b32.xlu1 %v1238_v43, %s2589_s3  ;;  %1514 = vrot.lane.b32.xlu0 %v4046_v32, %s2589_s3  ;;  %v1283_v27 = vsel %vm678_vm1, %v2539_v31, %v1275_v55  ;;  %v1285_v44 = vsel %vm678_vm1, %v1277_v38, %v4026_v15  ;;  %v1284_v12 = vsel %vm678_vm1, %v1275_v55, %v1277_v38 }
 0x450   :  { %v1231_v39 = vpop.permute.xlu0 %1230  ;;  %v1233_v10 = vpop.permute.xlu1 %1232 }
 0x451   :  { %1408 = vrot.lane.b32.xlu1 %v4034_v48, %s2589_s3  ;;  %1434 = vrot.lane.b32.xlu0 %v1283_v27, %s2589_s3  ;;  %v1239_v52 = vsel %vm632_vm7, %v2549_v11, %v1231_v39  ;;  %v1241_v54 = vsel %vm632_vm7, %v1233_v10, %v4034_v48  ;;  %v1240_v21 = vsel %vm632_vm7, %v1231_v39, %v1233_v10 }
 0x454   :  { %v4097_v33 = vpop.permute.xlu1 %1390  ;;  %v4101_v37 = vpop.permute.xlu0 %1388 }
 0x455   :  { %1498 = vrot.lane.b32.xlu1 %v1341_v30, %s2589_s3  ;;  %1418 = vrot.lane.b32.xlu0 %v1261_v5, %s2589_s3 }
 0x458   :  { %v1255_v2 = vpop.permute.xlu0 %1254 }
 0x459   :  { %1500 = vrot.lane.b32.xlu1 %v1348_v42, %s2589_s3  ;;  %1402 = vrot.lane.b32.xlu0 %v1239_v52, %s2589_s3  ;;  %v1263_v17 = vsel %vm655_vm2, %v1255_v2, %v4020_v3  ;;  %v1262_v0 = vsel %vm655_vm2, %v4036_v25, %v1255_v2 }
 0x45c   :  { %v1359_v3 = vpop.permute.xlu0 %1358 }
 0x45d   :  { %1486 = vrot.lane.b32.xlu1 %v1333_v53, %s2589_s3  ;;  %1502 = vrot.lane.b32.xlu0 %v1349_v45, %s2589_s3  ;;  %v1364_v15 = vsel %vm765_vm8, %v4046_v32, %v1359_v3  ;;  %v1365_v25 = vsel %vm765_vm8, %v1359_v3, %v4028_v49 }
 0x461   :  { %1470 = vrot.lane.b32.xlu1 %v1317_v59, %s2589_s3  ;;  %1484 = vrot.lane.b32.xlu0 %v1332_v35, %s2589_s3 }
 0x463   :  { %v4106_v57 = vpop.permute.xlu1 %1496 }
 0x465   :  { %1454 = vrot.lane.b32.xlu1 %v1301_v40, %s2589_s3  ;;  %1468 = vrot.lane.b32.xlu0 %v1316_v60, %s2589_s3 }
 0x467   :  { %v4115_v4 = vpop.permute.xlu1 %1480 }
 0x469   :  { %1438 = vrot.lane.b32.xlu1 %v1285_v44, %s2589_s3  ;;  %1452 = vrot.lane.b32.xlu0 %v1300_v62, %s2589_s3 }
 0x46b   :  { %v4126_v47 = vpop.permute.xlu1 %1464 }
 0x46d   :  { %1422 = vrot.lane.b32.xlu1 %v1263_v17, %s2589_s3  ;;  %1436 = vrot.lane.b32.xlu0 %v1284_v12, %s2589_s3 }
 0x46f   :  { %v4139_v13 = vpop.permute.xlu1 %1448 }
 0x471   :  { %1406 = vrot.lane.b32.xlu1 %v1241_v54, %s2589_s3  ;;  %1420 = vrot.lane.b32.xlu0 %v1262_v0, %s2589_s3 }
 0x473   :  { %v4152_v20 = vpop.permute.xlu1 %1432 }
 0x475   :  { %1508 = vrot.lane.b32.xlu1 %v1362_v46, %s2589_s3  ;;  %1404 = vrot.lane.b32.xlu0 %v1240_v21, %s2589_s3 }
 0x477   :  { %v4163_v19 = vpop.permute.xlu1 %1416 }
 0x479   :  { %1516 = vrot.lane.b32.xlu1 %v1364_v15, %s2589_s3  ;;  %1510 = vrot.lane.b32.xlu0 %v1363_v29, %s2589_s3 }
 0x47b   :  { %v1491_v48 = vpop.permute.xlu0 %1490  ;;  %v4169_v30 = vpop.permute.xlu1 %1400 }
 0x47d   :  { %1506 = vrot.lane.b32.xlu1 %v3971_v8, %s2589_s3  ;;  %1518 = vrot.lane.b32.xlu0 %v1365_v25, %s2589_s3 }
 0x47f   :  { %v4157_v61 = vpop.permute.xlu0 %1474 }
 0x480   :  { %v1495_v8 = vpop.permute.xlu1 %1494 }
 0x481   :  { %1512 = vrot.lane.b32.xlu1 %v3956_v22, %s2589_s3  ;;  %1520 = vrot.lane.b32.xlu0 %v4028_v49, %s2589_s3  ;;  %v1566_v21 = vsel %vm924_vm10, %v1495_v8, %v4106_v57 }
 0x483   :  { %v4165_v32 = vpop.permute.xlu0 %1458 }
 0x487   :  { %v4167_v7 = vpop.permute.xlu0 %1442 }
 0x48b   :  { %v4171_v50 = vpop.permute.xlu0 %1426 }
 0x48f   :  { %v4173_v28 = vpop.permute.xlu0 %1410 }
 0x493   :  { %v1505_v34 = vpop.permute.xlu1 %1504  ;;  %v4175_v63 = vpop.permute.xlu0 %1394 }
 0x497   :  { %v1479_v22 = vpop.permute.xlu1 %1478  ;;  %v1493_v26 = vpop.permute.xlu0 %1492 }
 0x498   :  { %v1565_v46 = vsel %vm924_vm10, %v1493_v26, %v1495_v8  ;;  %v1564_v15 = vsel %vm924_vm10, %v1491_v48, %v1493_v26  ;;  %v1560_v8 = vsel %vm924_vm10, %v1479_v22, %v4115_v4 }
 0x49b   :  { %v1489_v51 = vpop.permute.xlu1 %1488  ;;  %v1477_v49 = vpop.permute.xlu0 %1476 }
 0x49c   :  { %v1559_v57 = vsel %vm924_vm10, %v1477_v49, %v1479_v22 }
 0x49f   :  { %v4177_v24 = vpop.permute.xlu1 %1462  ;;  %v4179_v18 = vpop.permute.xlu0 %1460 }
 0x4a0   :  { %v1553_v4 = vsel %vm924_vm10, %v4179_v18, %v4177_v24 }
 0x4a3   :  { %v1473_v14 = vpop.permute.xlu1 %1472  ;;  %v4181_v43 = vpop.permute.xlu0 %1444 }
 0x4a7   :  { %v4183_v55 = vpop.permute.xlu1 %1446  ;;  %v4185_v31 = vpop.permute.xlu0 %1428 }
 0x4ab   :  { %v4187_v23 = vpop.permute.xlu1 %1456  ;;  %v4189_v27 = vpop.permute.xlu0 %1412 }
 0x4af   :  { %v4191_v56 = vpop.permute.xlu1 %1430  ;;  %v4193_v5 = vpop.permute.xlu0 %1396 }
 0x4b3   :  { %v4195_v38 = vpop.permute.xlu1 %1440  ;;  %v1483_v39 = vpop.permute.xlu0 %1482 }
 0x4b7   :  { %v4197_v11 = vpop.permute.xlu1 %1414  ;;  %v1467_v42 = vpop.permute.xlu0 %1466 }
 0x4bb   :  { %v4199_v52 = vpop.permute.xlu1 %1424  ;;  %v1451_v10 = vpop.permute.xlu0 %1450 }
 0x4bf   :  { %v4201_v53 = vpop.permute.xlu1 %1398  ;;  %v4203_v45 = vpop.permute.xlu0 %1514 }
 0x4c3   :  { %v4205_v59 = vpop.permute.xlu1 %1408  ;;  %v4207_v35 = vpop.permute.xlu0 %1434 }
 0x4c7   :  { %v1499_v40 = vpop.permute.xlu1 %1498  ;;  %v4209_v60 = vpop.permute.xlu0 %1418 }
 0x4cb   :  { %v1501_v44 = vpop.permute.xlu1 %1500  ;;  %v4211_v62 = vpop.permute.xlu0 %1402 }
 0x4cc   :  { %v1567_v0 = vsel %vm924_vm10, %v1499_v40, %v1501_v44  ;;  %v1558_v40 = vsel %vm924_vm10, %v4157_v61, %v1477_v49  ;;  %v1554_v61 = vsel %vm924_vm10, %v4177_v24, %v4126_v47  ;;  %v1547_v47 = vsel %vm924_vm10, %v4181_v43, %v4183_v55 }
 0x4cf   :  { %v1487_v2 = vpop.permute.xlu1 %1486  ;;  %v1503_v17 = vpop.permute.xlu0 %1502 }
 0x4d0   :  { %v1568_v12 = vsel %vm924_vm10, %v1501_v44, %v1503_v17  ;;  %v1569_v54 = vsel %vm924_vm10, %v1503_v17, %v1505_v34  ;;  %v1563_v25 = vsel %vm924_vm10, %v1487_v2, %v1489_v51 }
 0x4d1   :  { %1636 = vmatprep.subr.mxu0 %v1568_v12  ;;  %1714 = vmatpush1.msra.mxu1 %v1569_v54 }
 0x4d2   :  { %1637 = vmatpush1.msra.mxu0 %v1567_v0  ;;  %1715 = vmatprep.subr.mxu1 %v3694_v36 }
 0x4d3   :  { %v1471_v3 = vpop.permute.xlu1 %1470  ;;  %1638 = vmatprep.subr.mxu0 %v1565_v46  ;;  %1716 = vmatpush1.msra.mxu1 %v1566_v21  ;;  %v1485_v58 = vpop.permute.xlu0 %1484 }
 0x4d4   :  { %1639 = vmatpush1.msra.mxu0 %v1564_v15  ;;  %1717 = vmatprep.subr.mxu1 %v3694_v36  ;;  %v1562_v29 = vsel %vm924_vm10, %v1485_v58, %v1487_v2  ;;  %v1561_v34 = vsel %vm924_vm10, %v1483_v39, %v1485_v58  ;;  %v1557_v39 = vsel %vm924_vm10, %v1471_v3, %v1473_v14 }
 0x4d5   :  { %1640 = vmatprep.subr.mxu0 %v1562_v29  ;;  %1718 = vmatpush1.msra.mxu1 %v1563_v25  ;;  %v1552_v14 = vsel %vm924_vm10, %v4165_v32, %v4179_v18  ;;  %v1548_v32 = vsel %vm924_vm10, %v4183_v55, %v4139_v13  ;;  %v1526_v58 = vsel %vm924_vm10, %v4101_v37, %v4097_v33 }
 0x4d6   :  { %1641 = vmatpush1.msra.mxu0 %v1561_v34  ;;  %1719 = vmatprep.subr.mxu1 %v3694_v36 }
 0x4d7   :  { %v1455_v48 = vpop.permute.xlu1 %1454  ;;  %1642 = vmatprep.subr.mxu0 %v1559_v57  ;;  %1720 = vmatpush1.msra.mxu1 %v1560_v8  ;;  %v1469_v26 = vpop.permute.xlu0 %1468 }
 0x4d8   :  { %1643 = vmatpush1.msra.mxu0 %v1558_v40  ;;  %1721 = vmatprep.subr.mxu1 %v3694_v36  ;;  %v1556_v51 = vsel %vm924_vm10, %v1469_v26, %v1471_v3  ;;  %v1555_v44 = vsel %vm924_vm10, %v1467_v42, %v1469_v26  ;;  %v1551_v2 = vsel %vm924_vm10, %v1455_v48, %v4187_v23  ;;  %v2405_v40 = vld [vmem:[%s4872_s5 + $0x30] sm:$0xff] }
 0x4d9   :  { %1644 = vmatprep.subr.mxu0 %v1556_v51  ;;  %1722 = vmatpush1.msra.mxu1 %v1557_v39  ;;  %v1546_v23 = vsel %vm924_vm10, %v4167_v7, %v4181_v43  ;;  %v1541_v7 = vsel %vm924_vm10, %v4185_v31, %v4191_v56  ;;  %v1542_v43 = vsel %vm924_vm10, %v4191_v56, %v4152_v20  ;;  %v2406_v39 = vld [vmem:[%s4872_s5 + $0x38] sm:$0xff] }
 0x4da   :  { %1645 = vmatpush1.msra.mxu0 %v1555_v44  ;;  %1723 = vmatprep.subr.mxu1 %v3694_v36  ;;  %v1535_v20 = vsel %vm924_vm10, %v4189_v27, %v4197_v11  ;;  %v2407_v44 = vld [vmem:[%s4872_s5 + $0x40] sm:$0xff] }
 0x4db   :  { %v1439_v22 = vpop.permute.xlu1 %1438  ;;  %1646 = vmatprep.subr.mxu0 %v1553_v4  ;;  %1724 = vmatpush1.msra.mxu1 %v1554_v61  ;;  %v1453_v49 = vpop.permute.xlu0 %1452 }
 0x4dc   :  { %1647 = vmatpush1.msra.mxu0 %v1552_v14  ;;  %1725 = vmatprep.subr.mxu1 %v3694_v36  ;;  %v1550_v42 = vsel %vm924_vm10, %v1453_v49, %v1455_v48  ;;  %v1549_v17 = vsel %vm924_vm10, %v1451_v10, %v1453_v49  ;;  %v4260_v10 = vld [vmem:[#allocation3] sm:$0xff]  ;;  %v1545_v12 = vsel %vm924_vm10, %v1439_v22, %v4195_v38  ;;  %v2403_v48 = vld [vmem:[%s4871_s4 + $0x30] sm:$0xff] }
 0x4dd   :  { %1648 = vmatprep.subr.mxu0 %v1550_v42  ;;  %1726 = vmatpush1.msra.mxu1 %v1551_v2  ;;  %v2556_v26 = vpack.i.bf16 %v4260_v10, %v4260_v10 }
 0x4de   :  { %1649 = vmatpush1.msra.mxu0 %v1549_v17  ;;  %1727 = vmatprep.subr.mxu1 %v3694_v36 }
 0x4df   :  { %v1423_v24 = vpop.permute.xlu1 %1422  ;;  %1650 = vmatprep.subr.mxu0 %v1547_v47  ;;  %1728 = vmatpush1.msra.mxu1 %v1548_v32  ;;  %v1437_v18 = vpop.permute.xlu0 %1436  ;;  %v2409_v47 = vld [vmem:[%s4872_s5 + $0x50] sm:$0xff] }
 0x4e0   :  { %1651 = vmatpush1.msra.mxu0 %v1546_v23  ;;  %1729 = vmatprep.subr.mxu1 %v4260_v10  ;;  %v1544_v36 = vsel %vm924_vm10, %v1437_v18, %v1439_v22  ;;  %v1543_v13 = vsel %vm924_vm10, %v4207_v35, %v1437_v18  ;;  %v1540_v35 = vsel %vm924_vm10, %v4171_v50, %v4185_v31  ;;  %v2408_v22 = vld [vmem:[%s4872_s5 + $0x48] sm:$0xff]  ;;  %v2410_v18 = vld [vmem:[%s4872_s5 + $0x58] sm:$0xff] }
 0x4e1   :  { %1652 = vmatprep.subr.mxu0 %v1544_v36  ;;  %1730 = vmatpush1.msra.mxu1 %v1545_v12  ;;  %v1539_v0 = vsel %vm924_vm10, %v1423_v24, %v4199_v52  ;;  %v1536_v50 = vsel %vm924_vm10, %v4197_v11, %v4163_v19  ;;  %v1534_v52 = vsel %vm924_vm10, %v4173_v28, %v4189_v27  ;;  %v2554_v27 = vunpack.i.l.bf16 %v3946_v1 }
 0x4e2   :  { %1653 = vmatpush1.msra.mxu0 %v1543_v13  ;;  %1731 = vmatprep.subr.mxu1 %v4260_v10  ;;  %v1529_v19 = vsel %vm924_vm10, %v4193_v5, %v4201_v53  ;;  %v1530_v28 = vsel %vm924_vm10, %v4201_v53, %v4169_v30  ;;  %v1527_v30 = vsel %vm924_vm10, %v4097_v33, %v4044_v16  ;;  %v2555_v53 = vunpack.i.h.bf16 %v3946_v1 }
 0x4e3   :  { %v1407_v55 = vpop.permute.xlu1 %1406  ;;  %1654 = vmatprep.subr.mxu0 %v1541_v7  ;;  %1732 = vmatpush1.msra.mxu1 %v1542_v43  ;;  %v1421_v38 = vpop.permute.xlu0 %1420  ;;  %v1525_v15 = vsel %vm924_vm10, %v2554_v27, %v4101_v37 }
 0x4e4   :  { %1655 = vmatpush1.msra.mxu0 %v1540_v35  ;;  %1733 = vmatprep.subr.mxu1 %v4260_v10  ;;  %v1538_v54 = vsel %vm924_vm10, %v1421_v38, %v1423_v24  ;;  %v1537_v46 = vsel %vm924_vm10, %v4209_v60, %v1421_v38  ;;  %v1533_v21 = vsel %vm924_vm10, %v1407_v55, %v4205_v59 }
 0x4e5   :  { %1656 = vmatprep.subr.mxu0 %v1538_v54  ;;  %1734 = vmatpush1.msra.mxu1 %v1539_v0  ;;  %v1522_v16 = vsel %vm924_vm10, %v2555_v53, %v3977_v9 }
 0x4e6   :  { %1657 = vmatpush1.msra.mxu0 %v1537_v46  ;;  %1735 = vmatprep.subr.mxu1 %v4260_v10 }
 0x4e7   :  { %v1509_v31 = vpop.permute.xlu1 %1508  ;;  %1658 = vmatprep.subr.mxu0 %v1535_v20  ;;  %1736 = vmatpush1.msra.mxu1 %v1536_v50  ;;  %v1405_v56 = vpop.permute.xlu0 %1404 }
 0x4e8   :  { %1659 = vmatpush1.msra.mxu0 %v1534_v52  ;;  %1737 = vmatprep.subr.mxu1 %v4260_v10  ;;  %v1532_v60 = vsel %vm924_vm10, %v1405_v56, %v1407_v55  ;;  %v1531_v3 = vsel %vm924_vm10, %v4211_v62, %v1405_v56  ;;  %v1528_v62 = vsel %vm924_vm10, %v4175_v63, %v4193_v5 }
 0x4e9   :  { %1660 = vmatprep.subr.mxu0 %v1532_v60  ;;  %1738 = vmatpush1.msra.mxu1 %v1533_v21  ;;  %v1523_v63 = vsel %vm924_vm10, %v3977_v9, %v4012_v41  ;;  %v1524_v5 = vsel %vm924_vm10, %v4012_v41, %v3973_v6  ;;  %v2401_v9 = vld [vmem:[%s4871_s4 + $0x20] sm:$0xff] }
 0x4ea   :  { %1661 = vmatpush1.msra.mxu0 %v1531_v3  ;;  %1739 = vmatprep.subr.mxu1 %v4260_v10 }
 0x4eb   :  { %v1517_v11 = vpop.permute.xlu1 %1516  ;;  %1662 = vmatprep.subr.mxu0 %v1529_v19  ;;  %1740 = vmatpush1.msra.mxu1 %v1530_v28  ;;  %v1511_v59 = vpop.permute.xlu0 %1510 }
 0x4ec   :  { %1663 = vmatpush1.msra.mxu0 %v1528_v62  ;;  %1741 = vmatprep.subr.mxu1 %v4260_v10  ;;  %v1573_v37 = vsel %vm924_vm10, %v4203_v45, %v1517_v11  ;;  %v1571_v25 = vsel %vm924_vm10, %v1509_v31, %v1511_v59  ;;  %v2404_v45 = vld [vmem:[%s4871_s4 + $0x38] sm:$0xff] }
 0x4ed   :  { %1664 = vmatprep.subr.mxu0 %v1526_v58  ;;  %1742 = vmatpush1.msra.mxu1 %v1527_v30 }
 0x4ee   :  { %1665 = vmatpush1.msra.mxu0 %v1525_v15  ;;  %1743 = vmatprep.subr.mxu1 %v4260_v10 }
 0x4ef   :  { %v1507_v29 = vpop.permute.xlu1 %1506  ;;  %1666 = vmatprep.subr.mxu0 %v1523_v63  ;;  %1744 = vmatpush1.msra.mxu1 %v1524_v5  ;;  %v1519_v1 = vpop.permute.xlu0 %1518 }
 0x4f0   :  { %1667 = vmatpush1.msra.mxu0 %v1522_v16  ;;  %v1574_v33 = vsel %vm924_vm10, %v1517_v11, %v1519_v1  ;;  %1773 = vmatprep.subr.mxu1 %v4260_v10  ;;  %v1570_v6 = vsel %vm924_vm10, %v1507_v29, %v1509_v31 }
 0x4f1   :  { %1696 = vmatprep.subr.mxu0 %v1574_v33  ;;  %2557 = vrot.lane.b32.xlu1 %v2556_v26, %s2581_s2 }
 0x4f2   :  { %1697 = vmatpush2.msra.mxu0 %v1573_v37  ;;  %2562 = vrot.lane.b32.xlu0 %v2556_v26, %s2582_s9 }
 0x4f3   :  { %v1513_v41 = vpop.permute.xlu1 %1512  ;;  %1698 = vmatprep.subr.mxu0 %v1571_v25  ;;  %v1521_v34 = vpop.permute.xlu0 %1520 }
 0x4f4   :  { %v1575_v57 = vsel %vm924_vm10, %v1519_v1, %v1521_v34  ;;  %1699 = vmatpush2.msra.mxu0 %v1570_v6  ;;  %v1572_v8 = vsel %vm924_vm10, %v1511_v59, %v1513_v41 }
 0x4f5   :  { %1774 = vmatpush2.msra.mxu1 %v1575_v57  ;;  %1701 = vmatmul.mubr.f32.vlgmr.msra.gmra.mxu0 %v2401_v9 }
 0x4f6   :  { %1775 = vmatprep.subr.mxu1 %v4260_v10  ;;  %2412 = vmatprep.mubr.msk.f32.mxu0 %vm1033_vm9, %v2404_v45 }
 0x4f7   :  { %1776 = vmatpush2.msra.mxu1 %v1572_v8  ;;  %2567 = vrot.lane.b32.xlu1 %v2556_v26, %s2583_s10 }
 0x4f8   :  { %1778 = vmatmul.mubr.f32.vlgmr.msra.gmra.mxu1 %v2401_v9  ;;  %2309 = vmatprep.subr.mxu1 %v4260_v10 }
 0x4f9   :  { %2414 = vmatprep.mubr.msk.f32.mxu1 %vm1033_vm9, %v2404_v45  ;;  %1707 = vmatmul.mubr.f32.gmra.mxu0 %v2403_v48 }
 0x4fa   :  { %2572 = vrot.lane.b32.xlu0 %v2556_v26, %s2589_s3 }
 0x4fc   :  { %1783 = vmatmul.mubr.f32.gmra.mxu1 %v2403_v48 }
 0x563   :  { %v4429_v20 = vpop.permute.xlu1 %2557 }
 0x564   :  { %v4431_v50 = vpop.permute.xlu0 %2562  ;;  %v2560_v25 = vunpack.i.h.bf16 %v4429_v20 }
 0x565   :  { %v2565_v57 = vunpack.i.h.bf16 %v4431_v50 }
 0x569   :  { %v4435_v31 = vpop.permute.xlu1 %2567 }
 0x56a   :  { %v2570_v48 = vunpack.i.h.bf16 %v4435_v31 }
 0x56c   :  { %v4437_v56 = vpop.permute.xlu0 %2572 }
 0x5b5   :  { %v1702_v51 = vpop.f32.mrf.mxu0 }
 0x5b6   :  { %v1703_v4 = vadd.f32 %v2405_v40, %v1702_v51 }
 0x5b7   :  { %v1704_v61 = vpop.f32.mrf.mxu0 }
 0x5b8   :  { %v1779_v49 = vpop.f32.mrf.mxu1  ;;  %v1788_v14 = vmax.f32 %v1703_v4, 0.0  ;;  %v1705_v42 = vadd.f32 %v2406_v39, %v1704_v61 }
 0x5b9   :  { %v1780_v2 = vadd.f32 %v2407_v44, %v1779_v49  ;;  %v1708_v17 = vpop.f32.mrf.mxu0 }
 0x5ba   :  { %v1781_v32 = vpop.f32.mrf.mxu1  ;;  %v1789_v24 = vmax.f32 %v1705_v42, 0.0  ;;  %v1709_v23 = vadd.f32 %v2408_v22, %v1708_v17 }
 0x5bb   :  { %v1790_v36 = vmax.f32 %v1780_v2, 0.0  ;;  %v1710_v12 = vpop.f32.mrf.mxu0 }
 0x5bc   :  { %v1784_v13 = vpop.f32.mrf.mxu1  ;;  %v1791_v7 = vmax.f32 %v1709_v23, 0.0  ;;  %v1711_v43 = vadd.f32 %v2409_v47, %v1710_v12 }
 0x5bd   :  { %1796 = vst.msk [vmem:[#allocation3 + $0x18] sm:$0xff] %vm595_vm0, %v1790_v36  ;;  %v1785_v55 = vadd.f32 %v2410_v18, %v1784_v13 }
 0x5be   :  { %v1786_v38 = vpop.f32.mrf.mxu1  ;;  %v1792_v35 = vmax.f32 %v1711_v43, 0.0 }
 0x5bf   :  { %v1793_v54 = vmax.f32 %v1785_v55, 0.0 }
 0x5c1   :  { %1799 = vst.msk [vmem:[#allocation3 + $0x38] sm:$0xff] %vm595_vm0, %v1793_v54 }
 0x5c4   :  { %v1803_v0 = vld [vmem:[#allocation3 + $0x18] sm:$0xff] }
 0x5c5   :  { %1866 = vrot.lane.b32.xlu0 %v1803_v0, %s2581_s2  ;;  %1934 = vrot.lane.b32.xlu1 %v1803_v0, %s2584_s13 }
 0x5c8   :  { %v1807_v46 = vld [vmem:[#allocation3 + $0x38] sm:$0xff] }
 0x5c9   :  { %1822 = vrot.lane.b32.xlu0 %v1803_v0, %s2583_s10  ;;  %1918 = vrot.lane.b32.xlu1 %v1803_v0, %s2585_s16 }
 0x5cd   :  { %1950 = vrot.lane.b32.xlu0 %v1803_v0, %s2586_s0  ;;  %1902 = vrot.lane.b32.xlu1 %v1803_v0, %s2587_s17 }
 0x5d1   :  { %1862 = vrot.lane.b32.xlu0 %v1788_v14, %s2581_s2  ;;  %1886 = vrot.lane.b32.xlu1 %v1803_v0, %s2588_s18 }
 0x5d5   :  { %1818 = vrot.lane.b32.xlu0 %v1788_v14, %s2583_s10  ;;  %1844 = vrot.lane.b32.xlu1 %v1803_v0, %s2582_s9 }
 0x5d9   :  { %1946 = vrot.lane.b32.xlu0 %v1788_v14, %s2586_s0  ;;  %1980 = vrot.lane.b32.xlu1 %v1803_v0, %s2589_s3 }
 0x5dd   :  { %1976 = vrot.lane.b32.xlu0 %v1788_v14, %s2589_s3  ;;  %1930 = vrot.lane.b32.xlu1 %v1788_v14, %s2584_s13 }
 0x5e1   :  { %1932 = vrot.lane.b32.xlu0 %v1789_v24, %s2584_s13  ;;  %1914 = vrot.lane.b32.xlu1 %v1788_v14, %s2585_s16 }
 0x5e5   :  { %1916 = vrot.lane.b32.xlu0 %v1789_v24, %s2585_s16  ;;  %1898 = vrot.lane.b32.xlu1 %v1788_v14, %s2587_s17 }
 0x5e9   :  { %1900 = vrot.lane.b32.xlu0 %v1789_v24, %s2587_s17  ;;  %1882 = vrot.lane.b32.xlu1 %v1788_v14, %s2588_s18 }
 0x5ed   :  { %1884 = vrot.lane.b32.xlu0 %v1789_v24, %s2588_s18  ;;  %1840 = vrot.lane.b32.xlu1 %v1788_v14, %s2582_s9 }
 0x5f1   :  { %1842 = vrot.lane.b32.xlu0 %v1789_v24, %s2582_s9  ;;  %1864 = vrot.lane.b32.xlu1 %v1789_v24, %s2581_s2 }
 0x5f5   :  { %1940 = vrot.lane.b32.xlu0 %v1807_v46, %s2584_s13  ;;  %1820 = vrot.lane.b32.xlu1 %v1789_v24, %s2583_s10 }
 0x5f9   :  { %1924 = vrot.lane.b32.xlu0 %v1807_v46, %s2585_s16  ;;  %1948 = vrot.lane.b32.xlu1 %v1789_v24, %s2586_s0 }
 0x5fd   :  { %1908 = vrot.lane.b32.xlu0 %v1807_v46, %s2587_s17  ;;  %1978 = vrot.lane.b32.xlu1 %v1789_v24, %s2589_s3 }
 0x601   :  { %1892 = vrot.lane.b32.xlu0 %v1807_v46, %s2588_s18  ;;  %1852 = vrot.lane.b32.xlu1 %v1807_v46, %s2582_s9 }
 0x605   :  { %1874 = vrot.lane.b32.xlu0 %v1807_v46, %s2581_s2  ;;  %1956 = vrot.lane.b32.xlu1 %v1807_v46, %s2586_s0 }
 0x609   :  { %1830 = vrot.lane.b32.xlu0 %v1807_v46, %s2583_s10  ;;  %1848 = vrot.lane.b32.xlu1 %v1791_v7, %s2582_s9 }
 0x60d   :  { %1988 = vrot.lane.b32.xlu0 %v1807_v46, %s2589_s3  ;;  %1952 = vrot.lane.b32.xlu1 %v1791_v7, %s2586_s0 }
 0x611   :  { %1936 = vrot.lane.b32.xlu0 %v1791_v7, %s2584_s13  ;;  %1938 = vrot.lane.b32.xlu1 %v1792_v35, %s2584_s13 }
 0x615   :  { %1920 = vrot.lane.b32.xlu0 %v1791_v7, %s2585_s16  ;;  %1922 = vrot.lane.b32.xlu1 %v1792_v35, %s2585_s16 }
 0x619   :  { %1904 = vrot.lane.b32.xlu0 %v1791_v7, %s2587_s17  ;;  %1906 = vrot.lane.b32.xlu1 %v1792_v35, %s2587_s17 }
 0x61d   :  { %1888 = vrot.lane.b32.xlu0 %v1791_v7, %s2588_s18  ;;  %1890 = vrot.lane.b32.xlu1 %v1792_v35, %s2588_s18 }
 0x621   :  { %1870 = vrot.lane.b32.xlu0 %v1791_v7, %s2581_s2  ;;  %1872 = vrot.lane.b32.xlu1 %v1792_v35, %s2581_s2 }
 0x625   :  { %1826 = vrot.lane.b32.xlu0 %v1791_v7, %s2583_s10  ;;  %1828 = vrot.lane.b32.xlu1 %v1792_v35, %s2583_s10 }
 0x629   :  { %1984 = vrot.lane.b32.xlu0 %v1791_v7, %s2589_s3  ;;  %1986 = vrot.lane.b32.xlu1 %v1792_v35, %s2589_s3 }
 0x62d   :  { %1850 = vrot.lane.b32.xlu0 %v1792_v35, %s2582_s9 }
 0x631   :  { %1954 = vrot.lane.b32.xlu0 %v1792_v35, %s2586_s0 }
 0x637   :  { %v1935_v52 = vpop.permute.xlu1 %1934  ;;  %v4439_v60 = vpop.permute.xlu0 %1866 }
 0x638   :  { %2092 = vrot.lane.b32.xlu1 %v1935_v52, %s2589_s3 }
 0x63b   :  { %v1919_v21 = vpop.permute.xlu1 %1918  ;;  %v4442_v3 = vpop.permute.xlu0 %1822 }
 0x63c   :  { %2076 = vrot.lane.b32.xlu1 %v1919_v21, %s2589_s3 }
 0x63f   :  { %v1903_v19 = vpop.permute.xlu1 %1902  ;;  %v4445_v28 = vpop.permute.xlu0 %1950 }
 0x640   :  { %2060 = vrot.lane.b32.xlu1 %v1903_v19, %s2589_s3 }
 0x643   :  { %v4448_v27 = vpop.permute.xlu1 %1886  ;;  %v4450_v11 = vpop.permute.xlu0 %1862 }
 0x644   :  { %2044 = vrot.lane.b32.xlu1 %v4448_v27, %s2589_s3  ;;  %v1876_v34 = vsel %vm678_vm1, %v2560_v25, %v4450_v11 }
 0x647   :  { %v4454_v59 = vpop.permute.xlu1 %1844  ;;  %v4456_v62 = vpop.permute.xlu0 %1818 }
 0x648   :  { %2028 = vrot.lane.b32.xlu1 %v4439_v60, %s2589_s3  ;;  %v1832_v51 = vsel %vm632_vm7, %v2570_v48, %v4456_v62 }
 0x64b   :  { %v4460_v58 = vpop.permute.xlu1 %1980  ;;  %v4462_v30 = vpop.permute.xlu0 %1946 }
 0x64c   :  { %2012 = vrot.lane.b32.xlu1 %v4454_v59, %s2589_s3 }
 0x64f   :  { %v1931_v53 = vpop.permute.xlu1 %1930  ;;  %v4466_v15 = vpop.permute.xlu0 %1976 }
 0x650   :  { %2086 = vrot.lane.b32.xlu0 %v1931_v53, %s2589_s3  ;;  %1996 = vrot.lane.b32.xlu1 %v4442_v3, %s2589_s3 }
 0x653   :  { %v1915_v63 = vpop.permute.xlu1 %1914  ;;  %v1933_v5 = vpop.permute.xlu0 %1932 }
 0x654   :  { %2070 = vrot.lane.b32.xlu0 %v1915_v63, %s2589_s3  ;;  %v1943_v29 = vsel %vm748_vm3, %v1933_v5, %v1935_v52  ;;  %v1942_v61 = vsel %vm748_vm3, %v1931_v53, %v1933_v5 }
 0x655   :  { %2090 = vrot.lane.b32.xlu1 %v1943_v29, %s2589_s3 }
 0x657   :  { %v1899_v1 = vpop.permute.xlu1 %1898  ;;  %v1917_v16 = vpop.permute.xlu0 %1916 }
 0x658   :  { %2054 = vrot.lane.b32.xlu0 %v1899_v1, %s2589_s3  ;;  %v1927_v4 = vsel %vm731_vm4, %v1917_v16, %v1919_v21  ;;  %v1926_v14 = vsel %vm731_vm4, %v1915_v63, %v1917_v16 }
 0x65b   :  { %v1883_v33 = vpop.permute.xlu1 %1882  ;;  %v1901_v37 = vpop.permute.xlu0 %1900 }
 0x65c   :  { %2038 = vrot.lane.b32.xlu0 %v1883_v33, %s2589_s3  ;;  %v1911_v17 = vsel %vm714_vm5, %v1901_v37, %v1903_v19  ;;  %v1910_v47 = vsel %vm714_vm5, %v1899_v1, %v1901_v37 }
 0x65f   :  { %v1841_v6 = vpop.permute.xlu1 %1840  ;;  %v1885_v41 = vpop.permute.xlu0 %1884 }
 0x660   :  { %2022 = vrot.lane.b32.xlu0 %v1876_v34, %s2589_s3  ;;  %v1854_v9 = vsel %vm655_vm2, %v2565_v57, %v1841_v6  ;;  %v1894_v32 = vsel %vm697_vm6, %v1883_v33, %v1885_v41  ;;  %v1895_v23 = vsel %vm697_vm6, %v1885_v41, %v4448_v27 }
 0x663   :  { %v1865_v45 = vpop.permute.xlu1 %1864  ;;  %v1843_v8 = vpop.permute.xlu0 %1842 }
 0x664   :  { %2006 = vrot.lane.b32.xlu0 %v1854_v9, %s2589_s3  ;;  %v1877_v36 = vsel %vm678_vm1, %v4450_v11, %v1865_v45  ;;  %v1855_v7 = vsel %vm655_vm2, %v1841_v6, %v1843_v8  ;;  %v1878_v38 = vsel %vm678_vm1, %v1865_v45, %v4439_v60  ;;  %v1856_v21 = vsel %vm655_vm2, %v1843_v8, %v4454_v59 }
 0x665   :  { %v2559_v59 = vunpack.i.l.bf16 %v4429_v20  ;;  %v2569_v6 = vunpack.i.l.bf16 %v4435_v31 }
 0x667   :  { %v1821_v26 = vpop.permute.xlu1 %1820  ;;  %v4484_v40 = vpop.permute.xlu0 %1940 }
 0x668   :  { %2100 = vrot.lane.b32.xlu1 %v4484_v40, %s2589_s3  ;;  %1990 = vrot.lane.b32.xlu0 %v1832_v51, %s2589_s3  ;;  %v1833_v35 = vsel %vm632_vm7, %v4456_v62, %v1821_v26  ;;  %v1834_v62 = vsel %vm632_vm7, %v1821_v26, %v4442_v3  ;;  %v2564_v3 = vunpack.i.l.bf16 %v4431_v50 }
 0x66b   :  { %v4491_v39 = vpop.permute.xlu1 %1948  ;;  %v4493_v44 = vpop.permute.xlu0 %1924 }
 0x66c   :  { %2074 = vrot.lane.b32.xlu1 %v1927_v4, %s2589_s3  ;;  %2088 = vrot.lane.b32.xlu0 %v1942_v61, %s2589_s3 }
 0x66f   :  { %v4499_v22 = vpop.permute.xlu1 %1978  ;;  %v4501_v49 = vpop.permute.xlu0 %1908 }
 0x670   :  { %2084 = vrot.lane.b32.xlu1 %v4493_v44, %s2589_s3  ;;  %2072 = vrot.lane.b32.xlu0 %v1926_v14, %s2589_s3 }
 0x673   :  { %v4507_v42 = vpop.permute.xlu1 %1852  ;;  %v4509_v2 = vpop.permute.xlu0 %1892 }
 0x674   :  { %2058 = vrot.lane.b32.xlu1 %v1911_v17, %s2589_s3  ;;  %2056 = vrot.lane.b32.xlu0 %v1910_v47, %s2589_s3 }
 0x677   :  { %v4516_v24 = vpop.permute.xlu1 %1956  ;;  %v4518_v18 = vpop.permute.xlu0 %1874 }
 0x678   :  { %2068 = vrot.lane.b32.xlu1 %v4501_v49, %s2589_s3  ;;  %2040 = vrot.lane.b32.xlu0 %v1894_v32, %s2589_s3  ;;  %v1958_v32 = vsel %vm765_vm8, %v4462_v30, %v4491_v39 }
 0x67b   :  { %v4527_v12 = vpop.permute.xlu1 %1848  ;;  %v4529_v13 = vpop.permute.xlu0 %1830 }
 0x67c   :  { %2042 = vrot.lane.b32.xlu1 %v1895_v23, %s2589_s3  ;;  %2024 = vrot.lane.b32.xlu0 %v1877_v36, %s2589_s3  ;;  %v1857_v16 = vsel %vm655_vm2, %v2564_v3, %v4527_v12 }
 0x67f   :  { %v4534_v43 = vpop.permute.xlu1 %1952  ;;  %v1989_v55 = vpop.permute.xlu0 %1988 }
 0x680   :  { %2052 = vrot.lane.b32.xlu1 %v4509_v2, %s2589_s3  ;;  %2008 = vrot.lane.b32.xlu0 %v1855_v7, %s2589_s3 }
 0x683   :  { %v1939_v54 = vpop.permute.xlu1 %1938  ;;  %v1937_v0 = vpop.permute.xlu0 %1936 }
 0x684   :  { %2026 = vrot.lane.b32.xlu1 %v1878_v38, %s2589_s3  ;;  %1992 = vrot.lane.b32.xlu0 %v1833_v35, %s2589_s3  ;;  %v1944_v50 = vsel %vm748_vm3, %v1937_v0, %v1939_v54  ;;  %v1945_v34 = vsel %vm748_vm3, %v1939_v54, %v4484_v40 }
 0x687   :  { %v1923_v46 = vpop.permute.xlu1 %1922  ;;  %v1921_v52 = vpop.permute.xlu0 %1920 }
 0x688   :  { %2036 = vrot.lane.b32.xlu1 %v4518_v18, %s2589_s3  ;;  %2078 = vrot.lane.b32.xlu0 %v1921_v52, %s2589_s3  ;;  %v1929_v57 = vsel %vm731_vm4, %v1923_v46, %v4493_v44  ;;  %v1928_v31 = vsel %vm731_vm4, %v1921_v52, %v1923_v46 }
 0x68b   :  { %v1907_v60 = vpop.permute.xlu1 %1906  ;;  %v1905_v19 = vpop.permute.xlu0 %1904 }
 0x68c   :  { %2010 = vrot.lane.b32.xlu1 %v1856_v21, %s2589_s3  ;;  %2062 = vrot.lane.b32.xlu0 %v1905_v19, %s2589_s3  ;;  %v1913_v9 = vsel %vm714_vm5, %v1907_v60, %v4501_v49  ;;  %v1912_v8 = vsel %vm714_vm5, %v1905_v19, %v1907_v60 }
 0x68f   :  { %v1891_v27 = vpop.permute.xlu1 %1890  ;;  %v1889_v11 = vpop.permute.xlu0 %1888 }
 0x690   :  { %2020 = vrot.lane.b32.xlu1 %v4507_v42, %s2589_s3  ;;  %2046 = vrot.lane.b32.xlu0 %v1889_v11, %s2589_s3  ;;  %v1897_v48 = vsel %vm697_vm6, %v1891_v27, %v4509_v2  ;;  %v1896_v40 = vsel %vm697_vm6, %v1889_v11, %v1891_v27 }
 0x693   :  { %v1873_v53 = vpop.permute.xlu1 %1872  ;;  %v1871_v63 = vpop.permute.xlu0 %1870 }
 0x694   :  { %1994 = vrot.lane.b32.xlu1 %v1834_v62, %s2589_s3  ;;  %2110 = vrot.lane.b32.xlu0 %v4534_v43, %s2589_s3  ;;  %v1879_v5 = vsel %vm678_vm1, %v2559_v59, %v1871_v63  ;;  %v1881_v51 = vsel %vm678_vm1, %v1873_v53, %v4518_v18  ;;  %v1880_v61 = vsel %vm678_vm1, %v1871_v63, %v1873_v53 }
 0x697   :  { %v1829_v29 = vpop.permute.xlu1 %1828  ;;  %v1827_v1 = vpop.permute.xlu0 %1826 }
 0x698   :  { %2004 = vrot.lane.b32.xlu1 %v4529_v13, %s2589_s3  ;;  %2030 = vrot.lane.b32.xlu0 %v1879_v5, %s2589_s3  ;;  %v1835_v41 = vsel %vm632_vm7, %v2569_v6, %v1827_v1  ;;  %v1837_v2 = vsel %vm632_vm7, %v1829_v29, %v4529_v13  ;;  %v1836_v18 = vsel %vm632_vm7, %v1827_v1, %v1829_v29 }
 0x69b   :  { %v1987_v33 = vpop.permute.xlu1 %1986  ;;  %v4568_v37 = vpop.permute.xlu0 %1984 }
 0x69c   :  { %v4571_v25 = vsel %vm924_vm10, %v1987_v33, %v1989_v55  ;;  %2094 = vrot.lane.b32.xlu1 %v1937_v0, %s2589_s3  ;;  %2014 = vrot.lane.b32.xlu0 %v1857_v16, %s2589_s3  ;;  %v4577_v20 = vsel %vm924_vm10, %v4568_v37, %v1987_v33 }
 0x69f   :  { %v1851_v44 = vpop.permute.xlu0 %1850 }
 0x6a0   :  { %2096 = vrot.lane.b32.xlu1 %v1944_v50, %s2589_s3  ;;  %1998 = vrot.lane.b32.xlu0 %v1835_v41, %s2589_s3  ;;  %v1859_v49 = vsel %vm655_vm2, %v1851_v44, %v4507_v42  ;;  %v1858_v17 = vsel %vm655_vm2, %v4527_v12, %v1851_v44  ;;  %v2416_v42 = vld [vmem:[%s4871_s4 + $0x48] sm:$0xff]  ;;  %v1959_v12 = vsel %vm765_vm8, %v4491_v39, %v4445_v28 }
 0x6a1   :  { %2425 = vmatprep.mubr.msk.f32.mxu0 %vm1033_vm9, %v2416_v42  ;;  %2427 = vmatprep.mubr.msk.f32.mxu1 %vm1033_vm9, %v2416_v42 }
 0x6a3   :  { %v1955_v23 = vpop.permute.xlu0 %1954 }
 0x6a4   :  { %2082 = vrot.lane.b32.xlu1 %v1929_v57, %s2589_s3  ;;  %2098 = vrot.lane.b32.xlu0 %v1945_v34, %s2589_s3  ;;  %v1960_v13 = vsel %vm765_vm8, %v4534_v43, %v1955_v23  ;;  %v1961_v38 = vsel %vm765_vm8, %v1955_v23, %v4516_v24 }
 0x6a8   :  { %2066 = vrot.lane.b32.xlu1 %v1913_v9, %s2589_s3  ;;  %2080 = vrot.lane.b32.xlu0 %v1928_v31, %s2589_s3 }
 0x6aa   :  { %v2093_v45 = vpop.permute.xlu1 %2092 }
 0x6ac   :  { %2050 = vrot.lane.b32.xlu1 %v1897_v48, %s2589_s3  ;;  %2064 = vrot.lane.b32.xlu0 %v1912_v8, %s2589_s3 }
 0x6ae   :  { %v4600_v26 = vpop.permute.xlu1 %2076 }
 0x6b0   :  { %2034 = vrot.lane.b32.xlu1 %v1881_v51, %s2589_s3  ;;  %2048 = vrot.lane.b32.xlu0 %v1896_v40, %s2589_s3 }
 0x6b2   :  { %v4607_v4 = vpop.permute.xlu1 %2060 }
 0x6b4   :  { %2018 = vrot.lane.b32.xlu1 %v1859_v49, %s2589_s3  ;;  %2032 = vrot.lane.b32.xlu0 %v1880_v61, %s2589_s3 }
 0x6b6   :  { %v4614_v14 = vpop.permute.xlu1 %2044 }
 0x6b8   :  { %2002 = vrot.lane.b32.xlu1 %v1837_v2, %s2589_s3  ;;  %2016 = vrot.lane.b32.xlu0 %v1858_v17, %s2589_s3 }
 0x6ba   :  { %v4622_v47 = vpop.permute.xlu1 %2028 }
 0x6bc   :  { %2104 = vrot.lane.b32.xlu1 %v1958_v32, %s2589_s3  ;;  %2000 = vrot.lane.b32.xlu0 %v1836_v18, %s2589_s3 }
 0x6be   :  { %v4635_v36 = vpop.permute.xlu1 %2012 }
 0x6c0   :  { %2112 = vrot.lane.b32.xlu1 %v1960_v13, %s2589_s3  ;;  %2106 = vrot.lane.b32.xlu0 %v1959_v12, %s2589_s3 }
 0x6c2   :  { %v4644_v7 = vpop.permute.xlu1 %1996  ;;  %v2087_v55 = vpop.permute.xlu0 %2086 }
 0x6c4   :  { %2102 = vrot.lane.b32.xlu1 %v4462_v30, %s2589_s3  ;;  %2114 = vrot.lane.b32.xlu0 %v1961_v38, %s2589_s3 }
 0x6c6   :  { %v4651_v35 = vpop.permute.xlu0 %2070 }
 0x6c7   :  { %v2091_v39 = vpop.permute.xlu1 %2090 }
 0x6c8   :  { %v2162_v43 = vsel %vm924_vm10, %v2091_v39, %v2093_v45  ;;  %2108 = vrot.lane.b32.xlu1 %v4445_v28, %s2589_s3  ;;  %2116 = vrot.lane.b32.xlu0 %v4516_v24, %s2589_s3 }
 0x6ca   :  { %v4658_v54 = vpop.permute.xlu0 %2054 }
 0x6ce   :  { %v4660_v0 = vpop.permute.xlu0 %2038 }
 0x6d2   :  { %v4662_v46 = vpop.permute.xlu0 %2022 }
 0x6d6   :  { %v4664_v30 = vpop.permute.xlu0 %2006 }
 0x6da   :  { %v2101_v52 = vpop.permute.xlu1 %2100  ;;  %v4666_v21 = vpop.permute.xlu0 %1990 }
 0x6de   :  { %v2075_v60 = vpop.permute.xlu1 %2074  ;;  %v2089_v19 = vpop.permute.xlu0 %2088 }
 0x6df   :  { %v2161_v42 = vsel %vm924_vm10, %v2089_v19, %v2091_v39  ;;  %v2160_v32 = vsel %vm924_vm10, %v2087_v55, %v2089_v19  ;;  %v2156_v39 = vsel %vm924_vm10, %v2075_v60, %v4600_v26 }
 0x6e2   :  { %v2085_v27 = vpop.permute.xlu1 %2084  ;;  %v2073_v11 = vpop.permute.xlu0 %2072 }
 0x6e3   :  { %v2155_v55 = vsel %vm924_vm10, %v2073_v11, %v2075_v60 }
 0x6e6   :  { %v4668_v62 = vpop.permute.xlu1 %2058  ;;  %v4670_v28 = vpop.permute.xlu0 %2056 }
 0x6e7   :  { %v2150_v60 = vsel %vm924_vm10, %v4668_v62, %v4607_v4 }
 0x6ea   :  { %v2069_v24 = vpop.permute.xlu1 %2068  ;;  %v4672_v53 = vpop.permute.xlu0 %2040 }
 0x6ee   :  { %v4674_v63 = vpop.permute.xlu1 %2042  ;;  %v4676_v59 = vpop.permute.xlu0 %2024 }
 0x6f2   :  { %v4678_v5 = vpop.permute.xlu1 %2052  ;;  %v4680_v29 = vpop.permute.xlu0 %2008 }
 0x6f6   :  { %v4682_v1 = vpop.permute.xlu1 %2026  ;;  %v4684_v3 = vpop.permute.xlu0 %1992 }
 0x6fa   :  { %v4686_v16 = vpop.permute.xlu1 %2036  ;;  %v2079_v33 = vpop.permute.xlu0 %2078 }
 0x6fe   :  { %v4688_v6 = vpop.permute.xlu1 %2010  ;;  %v2063_v50 = vpop.permute.xlu0 %2062 }
 0x702   :  { %v4690_v41 = vpop.permute.xlu1 %2020  ;;  %v2047_v34 = vpop.permute.xlu0 %2046 }
 0x706   :  { %v4692_v57 = vpop.permute.xlu1 %1994  ;;  %v4694_v31 = vpop.permute.xlu0 %2110 }
 0x70a   :  { %v4696_v9 = vpop.permute.xlu1 %2004  ;;  %v4698_v45 = vpop.permute.xlu0 %2030 }
 0x70e   :  { %v2095_v8 = vpop.permute.xlu1 %2094  ;;  %v4700_v48 = vpop.permute.xlu0 %2014 }
 0x712   :  { %v2097_v40 = vpop.permute.xlu1 %2096  ;;  %v4702_v51 = vpop.permute.xlu0 %1998 }
 0x713   :  { %v2163_v17 = vsel %vm924_vm10, %v2095_v8, %v2097_v40 }
 0x716   :  { %v2083_v44 = vpop.permute.xlu1 %2082  ;;  %v2099_v61 = vpop.permute.xlu0 %2098 }
 0x717   :  { %v2165_v49 = vsel %vm924_vm10, %v2099_v61, %v2101_v52  ;;  %v2164_v2 = vsel %vm924_vm10, %v2097_v40, %v2099_v61  ;;  %v2159_v12 = vsel %vm924_vm10, %v2083_v44, %v2085_v27 }
 0x718   :  { %2232 = vmatprep.subr.mxu0 %v2164_v2  ;;  %2310 = vmatpush1.msra.mxu1 %v2165_v49 }
 0x719   :  { %2233 = vmatpush1.msra.mxu0 %v2163_v17  ;;  %2311 = vmatprep.subr.mxu1 %v4260_v10 }
 0x71a   :  { %v2067_v18 = vpop.permute.xlu1 %2066  ;;  %2234 = vmatprep.subr.mxu0 %v2161_v42  ;;  %2312 = vmatpush1.msra.mxu1 %v2162_v43  ;;  %v2081_v23 = vpop.permute.xlu0 %2080  ;;  %v2154_v43 = vsel %vm924_vm10, %v4651_v35, %v2073_v11  ;;  %v2149_v35 = vsel %vm924_vm10, %v4670_v28, %v4668_v62  ;;  %v2148_v11 = vsel %vm924_vm10, %v4658_v54, %v4670_v28 }
 0x71b   :  { %v2157_v13 = vsel %vm924_vm10, %v2079_v33, %v2081_v23  ;;  %2235 = vmatpush1.msra.mxu0 %v2160_v32  ;;  %2313 = vmatprep.subr.mxu1 %v4260_v10  ;;  %v2158_v38 = vsel %vm924_vm10, %v2081_v23, %v2083_v44  ;;  %v2153_v27 = vsel %vm924_vm10, %v2067_v18, %v2069_v24 }
 0x71c   :  { %2236 = vmatprep.subr.mxu0 %v2158_v38  ;;  %2314 = vmatpush1.msra.mxu1 %v2159_v12  ;;  %v2144_v54 = vsel %vm924_vm10, %v4674_v63, %v4614_v14  ;;  %v2143_v62 = vsel %vm924_vm10, %v4672_v53, %v4674_v63  ;;  %v2142_v28 = vsel %vm924_vm10, %v4660_v0, %v4672_v53 }
 0x71d   :  { %2237 = vmatpush1.msra.mxu0 %v2157_v13  ;;  %2315 = vmatprep.subr.mxu1 %v4260_v10  ;;  %v2138_v0 = vsel %vm924_vm10, %v4682_v1, %v4622_v47  ;;  %v2137_v53 = vsel %vm924_vm10, %v4676_v59, %v4682_v1  ;;  %v2136_v63 = vsel %vm924_vm10, %v4662_v46, %v4676_v59  ;;  %v2418_v13 = vld [vmem:[%s4871_s4 + $0x58] sm:$0xff] }
 0x71e   :  { %v2051_v52 = vpop.permute.xlu1 %2050  ;;  %2238 = vmatprep.subr.mxu0 %v2155_v55  ;;  %2316 = vmatpush1.msra.mxu1 %v2156_v39  ;;  %v2065_v19 = vpop.permute.xlu0 %2064  ;;  %v2132_v46 = vsel %vm924_vm10, %v4688_v6, %v4635_v36  ;;  %v2131_v59 = vsel %vm924_vm10, %v4680_v29, %v4688_v6  ;;  %v2130_v1 = vsel %vm924_vm10, %v4664_v30, %v4680_v29  ;;  %v2574_v6 = vunpack.i.l.bf16 %v4437_v56  ;;  %v2417_v39 = vld [vmem:[%s4871_s4 + $0x50] sm:$0xff]  ;;  %v2419_v55 = vld [vmem:[%s4872_s5 + $0x60] sm:$0xff] }
 0x71f   :  { %v2151_v33 = vsel %vm924_vm10, %v2063_v50, %v2065_v19  ;;  %2239 = vmatpush1.msra.mxu0 %v2154_v43  ;;  %2317 = vmatprep.subr.mxu1 %v4260_v10  ;;  %v2152_v26 = vsel %vm924_vm10, %v2065_v19, %v2067_v18  ;;  %v2147_v8 = vsel %vm924_vm10, %v2051_v52, %v4678_v5  ;;  %v2578_v18 = vld [vmem:[#allocation3] sm:$0xff] }
 0x720   :  { %2240 = vmatprep.subr.mxu0 %v2152_v26  ;;  %2318 = vmatpush1.msra.mxu1 %v2153_v27  ;;  %v2126_v30 = vsel %vm924_vm10, %v4692_v57, %v4644_v7  ;;  %v2125_v29 = vsel %vm924_vm10, %v4684_v3, %v4692_v57  ;;  %v2575_v7 = vunpack.i.h.bf16 %v4437_v56  ;;  %v2421_v27 = vld [vmem:[%s4872_s5 + $0x70] sm:$0xff]  ;;  %v2422_v26 = vld [vmem:[%s4872_s5 + $0x78] sm:$0xff] }
 0x721   :  { %2241 = vmatpush1.msra.mxu0 %v2151_v33  ;;  %2319 = vmatprep.subr.mxu1 %v4260_v10 }
 0x722   :  { %v2035_v24 = vpop.permute.xlu1 %2034  ;;  %2242 = vmatprep.subr.mxu0 %v2149_v35  ;;  %2320 = vmatpush1.msra.mxu1 %v2150_v60  ;;  %v2049_v50 = vpop.permute.xlu0 %2048 }
 0x723   :  { %v2145_v4 = vsel %vm924_vm10, %v2047_v34, %v2049_v50  ;;  %2243 = vmatpush1.msra.mxu0 %v2148_v11  ;;  %2321 = vmatprep.subr.mxu1 %v4260_v10  ;;  %v2146_v40 = vsel %vm924_vm10, %v2049_v50, %v2051_v52  ;;  %v2141_v44 = vsel %vm924_vm10, %v2035_v24, %v4686_v16  ;;  %v2420_v52 = vld [vmem:[%s4872_s5 + $0x68] sm:$0xff]  ;;  %v2423_v50 = vld [vmem:[%s4872_s5 + $0x80] sm:$0xff] }
 0x724   :  { %2244 = vmatprep.subr.mxu0 %v2146_v40  ;;  %2322 = vmatpush1.msra.mxu1 %v2147_v8  ;;  %v2424_v40 = vld [vmem:[%s4872_s5 + $0x88] sm:$0xff] }
 0x725   :  { %2245 = vmatpush1.msra.mxu0 %v2145_v4  ;;  %2323 = vmatprep.subr.mxu1 %v4260_v10 }
 0x726   :  { %v2019_v5 = vpop.permute.xlu1 %2018  ;;  %2246 = vmatprep.subr.mxu0 %v2143_v62  ;;  %2324 = vmatpush1.msra.mxu1 %v2144_v54  ;;  %v2033_v34 = vpop.permute.xlu0 %2032 }
 0x727   :  { %v2139_v14 = vsel %vm924_vm10, %v4698_v45, %v2033_v34  ;;  %2247 = vmatpush1.msra.mxu0 %v2142_v28  ;;  %2325 = vmatprep.subr.mxu1 %v4260_v10  ;;  %v2140_v61 = vsel %vm924_vm10, %v2033_v34, %v2035_v24  ;;  %v2135_v49 = vsel %vm924_vm10, %v2019_v5, %v4690_v41 }
 0x728   :  { %2248 = vmatprep.subr.mxu0 %v2140_v61  ;;  %2326 = vmatpush1.msra.mxu1 %v2141_v44 }
 0x729   :  { %2249 = vmatpush1.msra.mxu0 %v2139_v14  ;;  %2327 = vmatprep.subr.mxu1 %v4260_v10 }
 0x72a   :  { %v2003_v16 = vpop.permute.xlu1 %2002  ;;  %2250 = vmatprep.subr.mxu0 %v2137_v53  ;;  %2328 = vmatpush1.msra.mxu1 %v2138_v0  ;;  %v2017_v45 = vpop.permute.xlu0 %2016 }
 0x72b   :  { %v2133_v47 = vsel %vm924_vm10, %v4700_v48, %v2017_v45  ;;  %2251 = vmatpush1.msra.mxu0 %v2136_v63  ;;  %2329 = vmatprep.subr.mxu1 %v4260_v10  ;;  %v2134_v2 = vsel %vm924_vm10, %v2017_v45, %v2019_v5  ;;  %v2129_v17 = vsel %vm924_vm10, %v2003_v16, %v4696_v9 }
 0x72c   :  { %2252 = vmatprep.subr.mxu0 %v2134_v2  ;;  %2330 = vmatpush1.msra.mxu1 %v2135_v49  ;;  %v2124_v9 = vsel %vm924_vm10, %v4666_v21, %v4684_v3  ;;  %v2120_v21 = vsel %vm924_vm10, %v4499_v22, %v4460_v58  ;;  %v2119_v3 = vsel %vm924_vm10, %v4466_v15, %v4499_v22  ;;  %v2415_v22 = vld [vmem:[%s4871_s4 + $0x40] sm:$0xff] }
 0x72d   :  { %2253 = vmatpush1.msra.mxu0 %v2133_v47  ;;  %2331 = vmatprep.subr.mxu1 %v4260_v10 }
 0x72e   :  { %v2105_v41 = vpop.permute.xlu1 %2104  ;;  %2254 = vmatprep.subr.mxu0 %v2131_v59  ;;  %2332 = vmatpush1.msra.mxu1 %v2132_v46  ;;  %v2001_v48 = vpop.permute.xlu0 %2000 }
 0x72f   :  { %v2127_v36 = vsel %vm924_vm10, %v4702_v51, %v2001_v48  ;;  %2255 = vmatpush1.msra.mxu0 %v2130_v1  ;;  %2333 = vmatprep.subr.mxu1 %v4260_v10  ;;  %v2128_v42 = vsel %vm924_vm10, %v2001_v48, %v2003_v16 }
 0x730   :  { %2256 = vmatprep.subr.mxu0 %v2128_v42  ;;  %2334 = vmatpush1.msra.mxu1 %v2129_v17 }
 0x731   :  { %2257 = vmatpush1.msra.mxu0 %v2127_v36  ;;  %2335 = vmatprep.subr.mxu1 %v4260_v10  ;;  %v2121_v10 = vsel %vm924_vm10, %v2574_v6, %v4568_v37  ;;  %v2118_v37 = vsel %vm924_vm10, %v2575_v7, %v4466_v15 }
 0x732   :  { %v2113_v51 = vpop.permute.xlu1 %2112  ;;  %2258 = vmatprep.subr.mxu0 %v2125_v29  ;;  %2336 = vmatpush1.msra.mxu1 %v2126_v30  ;;  %v2107_v32 = vpop.permute.xlu0 %2106 }
 0x733   :  { %2259 = vmatpush1.msra.mxu0 %v2124_v9  ;;  %2337 = vmatprep.subr.mxu1 %v2578_v18  ;;  %v2169_v58 = vsel %vm924_vm10, %v4694_v31, %v2113_v51 }
 0x734   :  { %2260 = vmatprep.subr.mxu0 %v4577_v20  ;;  %2338 = vmatpush1.msra.mxu1 %v4571_v25  ;;  %v2167_v20 = vsel %vm924_vm10, %v2105_v41, %v2107_v32 }
 0x735   :  { %2261 = vmatpush1.msra.mxu0 %v2121_v10  ;;  %2339 = vmatprep.subr.mxu1 %v2578_v18 }
 0x736   :  { %v2103_v57 = vpop.permute.xlu1 %2102  ;;  %2262 = vmatprep.subr.mxu0 %v2119_v3  ;;  %2340 = vmatpush1.msra.mxu1 %v2120_v21  ;;  %v2115_v56 = vpop.permute.xlu0 %2114 }
 0x737   :  { %2263 = vmatpush1.msra.mxu0 %v2118_v37  ;;  %v2170_v25 = vsel %vm924_vm10, %v2113_v51, %v2115_v56  ;;  %2369 = vmatprep.subr.mxu1 %v2578_v18  ;;  %v2166_v23 = vsel %vm924_vm10, %v2103_v57, %v2105_v41 }
 0x738   :  { %2292 = vmatprep.subr.mxu0 %v2170_v25 }
 0x739   :  { %2293 = vmatpush2.msra.mxu0 %v2169_v58 }
 0x73a   :  { %v2109_v12 = vpop.permute.xlu1 %2108  ;;  %2294 = vmatprep.subr.mxu0 %v2167_v20  ;;  %v2117_v15 = vpop.permute.xlu0 %2116 }
 0x73b   :  { %v2171_v38 = vsel %vm924_vm10, %v2115_v56, %v2117_v15  ;;  %2295 = vmatpush2.msra.mxu0 %v2166_v23  ;;  %v2168_v31 = vsel %vm924_vm10, %v2107_v32, %v2109_v12 }
 0x73c   :  { %2297 = vmatmul.mubr.f32.vlgmr.msra.gmra.mxu0 %v2415_v22  ;;  %2370 = vmatpush2.msra.mxu1 %v2171_v38 }
 0x73d   :  { %2371 = vmatprep.subr.mxu1 %v2578_v18  ;;  %2426 = vmatprep.mubr.msk.f32.mxu0 %vm1033_vm9, %v2418_v13 }
 0x73e   :  { %2372 = vmatpush2.msra.mxu1 %v2168_v31 }
 0x73f   :  { %2374 = vmatmul.mubr.f32.vlgmr.msra.gmra.mxu1 %v2415_v22 }
 0x740   :  { %2303 = vmatmul.mubr.f32.gmra.mxu0 %v2417_v39  ;;  %2428 = vmatprep.mubr.msk.f32.mxu1 %vm1033_vm9, %v2418_v13 }
 0x743   :  { %2379 = vmatmul.mubr.f32.gmra.mxu1 %v2417_v39 }
 0x7fc   :  { %v2298_v43 = vpop.f32.mrf.mxu0 }
 0x7fd   :  { %v2299_v19 = vadd.f32 %v2419_v55, %v2298_v43 }
 0x7fe   :  { %v2300_v33 = vpop.f32.mrf.mxu0 }
 0x7ff   :  { %2384 = vst [vmem:[%s4873_s6] sm:$0xff] %v2299_v19  ;;  %v2301_v60 = vadd.f32 %v2420_v52, %v2300_v33  ;;  %v2375_v35 = vpop.f32.mrf.mxu1 }
 0x800   :  { %v2376_v11 = vadd.f32 %v2421_v27, %v2375_v35  ;;  %v2304_v24 = vpop.f32.mrf.mxu0 }
 0x801   :  { %2385 = vst [vmem:[%s4873_s6 + $0x8] sm:$0xff] %v2301_v60  ;;  %v2305_v8 = vadd.f32 %v2422_v26, %v2304_v24  ;;  %v2377_v4 = vpop.f32.mrf.mxu1 }
 0x802   :  { %2386 = vst.msk [vmem:[%s4873_s6 + $0x10] sm:$0xff] %vm595_vm0, %v2376_v11  ;;  %v2306_v54 = vpop.f32.mrf.mxu0 }
 0x803   :  { %2387 = vst [vmem:[%s4873_s6 + $0x18] sm:$0xff] %v2305_v8  ;;  %v2307_v62 = vadd.f32 %v2423_v50, %v2306_v54  ;;  %v2380_v28 = vpop.f32.mrf.mxu1 }
 0x804   :  { %v2381_v5 = vadd.f32 %v2424_v40, %v2380_v28 }
 0x805   :  { %2388 = vst [vmem:[%s4873_s6 + $0x20] sm:$0xff] %v2307_v62  ;;  %v2382_v34 = vpop.f32.mrf.mxu1 }
 0x806   :  { %2389 = vst.msk [vmem:[%s4873_s6 + $0x28] sm:$0xff] %vm595_vm0, %v2381_v5 }

</bundles_post_ra>
